<compile_context>
chip_gen: v5e
topology: v5e:2x2
jax: 0.10.0
libtpu: 0.0.40
codegen_flags: <defaults>
</compile_context>

<pallas_src>
import functools

import jax
import jax.numpy as jnp
from jax.experimental import pallas as pl
from jax.experimental.pallas import tpu as pltpu


# ---------------------------------------------------------------------------
# Fused DCGRU cell kernel — one batch tile (bB elements) per grid step.
# ---------------------------------------------------------------------------
def _dcgru_cell_kernel(xin_ref, hx_ref, sup_ref, wr_ref, wu_ref, wc_ref,
                       br_ref, bu_ref, bc_ref, out_ref, slab_ref,
                       *, N, Di, U, S, K, M, bB):
    C = Di + U
    MC = M * C

    xin = xin_ref[0]          # (N, bB*Di) f32, node-major, columns (b, ci)
    hx = hx_ref[0]            # (N, bB*U)  f32, node-major, columns (b, u)

    def put(m, col_off, width, val_f32):
        # Scatter the (N, bB*width) feature (columns (b, c)) into the
        # batch-major slab: batch b's gconv rows live at columns
        # [b*MC, (b+1)*MC), feature m at offset m*C + col_off within them.
        v = val_f32.astype(slab_ref.dtype)          # bf16 write, once per put
        for b in range(bB):
            lo = b * MC + m * C + col_off
            slab_ref[:, lo:lo + width] = v[:, b * width:(b + 1) * width]

    def diffuse_group(x_init, col_off, width):
        # Chebyshev diffusion of one column group for the whole batch tile.
        # Every step is a single (N, N) @ (N, bB*width) MXU matmul with bf16
        # inputs and f32 accumulation; the recurrence combine and the carried
        # x0/x1 stay in f32 to bound drift for larger K.
        put(0, col_off, width, x_init)
        if K == 0:
            return
        m = 1
        x0 = x_init
        for s in range(S):
            a = sup_ref[s]                                   # (N, N) bf16
            x1 = jnp.dot(a, x0.astype(a.dtype),
                         preferred_element_type=jnp.float32)
            put(m, col_off, width, x1)
            m += 1
            for _ in range(2, K + 1):
                x2 = 2.0 * jnp.dot(a, x1.astype(a.dtype),
                                   preferred_element_type=jnp.float32) - x0
                put(m, col_off, width, x2)
                m += 1
                x1, x0 = x2, x1
            # NOTE: x0 is intentionally NOT reset between supports (it carries
            # the previous support's T_{K-1}) — matches the PyTorch reference.

    # --- gate pass: gconv([inp, hx]) --------------------------------------
    diffuse_group(xin, 0, Di)       # input columns (shared with candidate pass)
    diffuse_group(hx, Di, U)        # hidden columns

    wr = wr_ref[...]                # (M*C, U) bf16
    wu = wu_ref[...]
    br = br_ref[...]                # (1, U) f32
    bu = bu_ref[...]

    u_parts = []
    rh_parts = []
    for b in range(bB):
        lhs = slab_ref[:, b * MC:(b + 1) * MC]               # (N, M*C) bf16
        r_b = jax.nn.sigmoid(
            jnp.dot(lhs, wr, preferred_element_type=jnp.float32) + br)
        u_b = jax.nn.sigmoid(
            jnp.dot(lhs, wu, preferred_element_type=jnp.float32) + bu)
        u_parts.append(u_b)
        rh_parts.append(r_b * hx[:, b * U:(b + 1) * U])
    rh = jnp.concatenate(rh_parts, axis=1)                   # (N, bB*U) f32

    # --- candidate pass: gconv([inp, r*hx]) — only hidden columns change ---
    diffuse_group(rh, Di, U)

    wc = wc_ref[...]
    bc = bc_ref[...]
    ns_parts = []
    for b in range(bB):
        lhs = slab_ref[:, b * MC:(b + 1) * MC]
        c_b = jnp.tanh(
            jnp.dot(lhs, wc, preferred_element_type=jnp.float32) + bc)
        u_b = u_parts[b]
        hx_b = hx[:, b * U:(b + 1) * U]
        ns_parts.append(u_b * hx_b + (1.0 - u_b) * c_b)      # f32 GRU blend

    # ONE lane-dense full-block store (last dim bB*U).
    out_ref[...] = jnp.concatenate(ns_parts, axis=1).reshape(1, N, bB * U)


def dcgru_cell_forward(inputs, hx, supports, params, *, N, U, K, bB=None,
                       mxu_dtype=jnp.bfloat16):
    """DCGRUCell.forward: inputs (B, N*Di), hx (B, N*U) -> new state (B, N*U)."""
    B = inputs.shape[0]
    Di = inputs.shape[1] // N
    S = supports.shape[0]
    C = Di + U
    M = 1 + S * K

    # Batch tile: prefer >=2 programs so v7x's two TensorCores both get work.
    if bB is None:
        bB = next((c for c in (8, 4, 2, 1) if B % c == 0 and B // c >= 2), B)
    assert B % bB == 0, "batch must be divisible by the batch tile"
    G = B // bB

    def to_node_major(x, width):
        # (B, N*width) -> (G, N, bB*width), columns (b_local, c); cheap XLA ops.
        return (x.astype(jnp.float32).reshape(G, bB, N, width)
                .transpose(0, 2, 1, 3).reshape(G, N, bB * width))

    xin_t = to_node_major(inputs, Di)
    hx_t = to_node_major(hx, U)
    sup_b = supports.astype(mxu_dtype)            # bf16 MXU feed for diffusion

    def reorder(w_flat, out_dim):
        # PyTorch row order c*M + m  ->  slab row order m*C + c; bf16 for MXU.
        return (w_flat.reshape(C, M, out_dim).transpose(1, 0, 2)
                .reshape(M * C, out_dim).astype(mxu_dtype))

    wg = reorder(params["wg_flat"], 2 * U)
    wr, wu = wg[:, :U], wg[:, U:]                 # lane-aligned r / u dots
    wc = reorder(params["wc_flat"], U)
    bg = params["bg"].reshape(2 * U).astype(jnp.float32)
    br, bu = bg[:U].reshape(1, U), bg[U:].reshape(1, U)
    bc = params["bc"].reshape(1, U).astype(jnp.float32)

    kernel = functools.partial(_dcgru_cell_kernel,
                               N=N, Di=Di, U=U, S=S, K=K, M=M, bB=bB)

    # Advisory cost estimate so XLA schedules the custom call sensibly inside
    # the full DCRNN step (this cell runs per timestep per layer).
    flops = int(2 * S * K * N * N * B * (C + U) + 2 * B * N * (M * C) * 3 * U)
    transcendentals = int(B * N * 3 * U)
    bytes_accessed = int((xin_t.size + hx_t.size + B * N * U) * 4
                         + sup_b.size * 2
                         + (wr.size + wu.size + wc.size) * 2)

    # Explicit VMEM budget: double-buffered in/out blocks + constants + slab.
    vmem_est = (2 * (N * bB * Di + 2 * N * bB * U) * 4
                + 2 * (sup_b.size + wr.size + wu.size + wc.size) * 2
                + N * bB * M * C * 2 + 3 * U * 4)
    vmem_limit = int(min(max(4 * vmem_est, 32 * 2 ** 20), 100 * 2 ** 20))

    out = pl.pallas_call(
        kernel,
        out_shape=jax.ShapeDtypeStruct((G, N, bB * U), jnp.float32),
        grid=(G,),
        in_specs=[
            pl.BlockSpec((1, N, bB * Di), lambda g: (g, 0, 0)),   # inputs tile
            pl.BlockSpec((1, N, bB * U), lambda g: (g, 0, 0)),    # hidden tile
            pl.BlockSpec((S, N, N), lambda g: (0, 0, 0)),         # supports
            pl.BlockSpec((M * C, U), lambda g: (0, 0)),           # W_r
            pl.BlockSpec((M * C, U), lambda g: (0, 0)),           # W_u
            pl.BlockSpec((M * C, U), lambda g: (0, 0)),           # W_c
            pl.BlockSpec((1, U), lambda g: (0, 0)),               # b_r
            pl.BlockSpec((1, U), lambda g: (0, 0)),               # b_u
            pl.BlockSpec((1, U), lambda g: (0, 0)),               # b_c
        ],
        out_specs=pl.BlockSpec((1, N, bB * U), lambda g: (g, 0, 0)),
        scratch_shapes=[pltpu.VMEM((N, bB * M * C), mxu_dtype)],  # bf16 slab
        compiler_params=pltpu.CompilerParams(
            dimension_semantics=("parallel",),
            vmem_limit_bytes=vmem_limit),
        cost_estimate=pl.CostEstimate(
            flops=flops, transcendentals=transcendentals,
            bytes_accessed=bytes_accessed),
    )(xin_t, hx_t, sup_b, wr, wu, wc, br, bu, bc)

    # (G, N, bB*U) node-major -> (B, N*U); free wrapper-side layout plumbing.
    return out.reshape(G, N, bB, U).transpose(0, 2, 1, 3).reshape(B, N * U)


# ---------------------------------------------------------------------------
# Deterministic parameter / support construction (mirrors the PyTorch init).
# ---------------------------------------------------------------------------
def xavier_normal(key, shape):
    fan_in, fan_out = shape
    std = (2.0 / (fan_in + fan_out)) ** 0.5
    return std * jax.random.normal(key, shape, dtype=jnp.float32)


def build_cell_params(key, *, Di, U, S, K):
    C = Di + U
    M = 1 + S * K
    kg, kc = jax.random.split(key)
    return dict(
        wg_flat=xavier_normal(kg, (C * M, 2 * U)),   # PyTorch layout (C*M, 2U)
        bg=jnp.full((1, 2 * U), 1.0, jnp.float32),   # bias_start = 1.0 (gates)
        wc_flat=xavier_normal(kc, (C * M, U)),       # PyTorch layout (C*M, U)
        bc=jnp.zeros((1, U), jnp.float32),           # bias_start = 0.0 (cand.)
    )


def build_supports(key, N, S):
    # Dense random-walk transition matrices (reference uses sparse with the
    # same values).
    sups = []
    for _ in range(S):
        key, k = jax.random.split(key)
        a = jax.random.uniform(k, (N, N), dtype=jnp.float32)
        sups.append(a / jnp.sum(a, axis=1, keepdims=True))
    return jnp.stack(sups, axis=0)                    # (S, N, N)


# ---------------------------------------------------------------------------
# Pure-JAX literal transcription of DCGRUCell.forward (f32 reference).
# ---------------------------------------------------------------------------
def dcgru_cell_reference(inputs, hx, supports, params, *, N, U, K):
    B = inputs.shape[0]

    def gconv(inputs_, state_, w, b, output_size):
        inp = inputs_.reshape(B, N, -1)
        st = state_.reshape(B, N, -1)
        x = jnp.concatenate([inp, st], axis=2)               # (B, N, C)
        C = x.shape[2]
        x0 = jnp.transpose(x, (1, 2, 0)).reshape(N, C * B)
        feats = [x0]
        if K > 0:
            for s in range(supports.shape[0]):
                a = supports[s]
                x1 = a @ x0
                feats.append(x1)
                for _ in range(2, K + 1):
                    x2 = 2.0 * (a @ x1) - x0
                    feats.append(x2)
                    x1, x0 = x2, x1
        M = len(feats)
        x = jnp.stack(feats, axis=0).reshape(M, N, C, B)
        x = jnp.transpose(x, (3, 1, 2, 0)).reshape(B * N, C * M)
        x = x @ w + b
        return x.reshape(B, N * output_size)

    value = jax.nn.sigmoid(
        gconv(inputs, hx, params["wg_flat"], params["bg"], 2 * U))
    value = value.reshape(-1, N, 2 * U)
    r = value[..., :U].reshape(-1, N * U)
    u = value[..., U:].reshape(-1, N * U)
    c = jnp.tanh(gconv(inputs, r * hx, params["wc_flat"], params["bc"], U))
    return u * hx + (1.0 - u) * c


if __name__ == "__main__":
    B, N, Di, U = 8, 16, 4, 32        # batch, nodes, input dim, rnn_units
    K, S = 2, 2                       # max_diffusion_step, number of supports

    root = jax.random.PRNGKey(0)
    k_sup, k_par, k_in, k_h = jax.random.split(root, 4)

    supports = build_supports(k_sup, N, S)
    params = build_cell_params(k_par, Di=Di, U=U, S=S, K=K)
    inputs = jax.random.normal(k_in, (B, N * Di), dtype=jnp.float32)
    hx = jax.random.normal(k_h, (B, N * U), dtype=jnp.float32)

    new_state = dcgru_cell_forward(inputs, hx, supports, params, N=N, U=U, K=K)
    new_state = jax.block_until_ready(new_state)
    assert new_state.shape == (B, N * U)

    # Validate against the literal f32 reference (loose tol: kernel feeds the
    # diffusion and gconv MXU matmuls in bf16 with f32 accumulation).
    ref = dcgru_cell_reference(inputs, hx, supports, params, N=N, U=U, K=K)
    err = float(jnp.max(jnp.abs(new_state - ref)))
    assert err < 0.1, f"kernel/reference mismatch: max abs err {err}"

    print("KERNEL_OK")
</pallas_src>

<mosaic_0001>
module attributes {stable_mosaic.version = 11 : i64} {
  func.func @_dcgru_cell_kernel(%arg0: i32, %arg1: memref<1x16x16xf32, #tpu.memory_space<vmem>>, %arg2: memref<1x16x128xf32, #tpu.memory_space<vmem>>, %arg3: memref<2x16x16xbf16, #tpu.memory_space<vmem>>, %arg4: memref<180x32xbf16, #tpu.memory_space<vmem>>, %arg5: memref<180x32xbf16, #tpu.memory_space<vmem>>, %arg6: memref<180x32xbf16, #tpu.memory_space<vmem>>, %arg7: memref<1x32xf32, #tpu.memory_space<vmem>>, %arg8: memref<1x32xf32, #tpu.memory_space<vmem>>, %arg9: memref<1x32xf32, #tpu.memory_space<vmem>>, %arg10: memref<1x16x128xf32, #tpu.memory_space<vmem>>, %arg11: memref<16x720xbf16, #tpu.memory_space<vmem>>) attributes {dimension_semantics = [#tpu.dimension_semantics<parallel>], iteration_bounds = array<i64: 2>, scalar_prefetch = 0 : i64, scratch_operands = 1 : i64, tpu.core_type = #tpu.core_type<tc>, window_params = [{transform_indices = @transform_0, window_bounds = array<i64: 1, 16, 16>}, {transform_indices = @transform_1, window_bounds = array<i64: 1, 16, 128>}, {pipeline_mode = #tpu.pipeline_mode<synchronous>, transform_indices = @transform_2, window_bounds = array<i64: 2, 16, 16>}, {pipeline_mode = #tpu.pipeline_mode<synchronous>, transform_indices = @transform_3, window_bounds = array<i64: 180, 32>}, {pipeline_mode = #tpu.pipeline_mode<synchronous>, transform_indices = @transform_4, window_bounds = array<i64: 180, 32>}, {pipeline_mode = #tpu.pipeline_mode<synchronous>, transform_indices = @transform_5, window_bounds = array<i64: 180, 32>}, {pipeline_mode = #tpu.pipeline_mode<synchronous>, transform_indices = @transform_6, window_bounds = array<i64: 1, 32>}, {pipeline_mode = #tpu.pipeline_mode<synchronous>, transform_indices = @transform_7, window_bounds = array<i64: 1, 32>}, {pipeline_mode = #tpu.pipeline_mode<synchronous>, transform_indices = @transform_8, window_bounds = array<i64: 1, 32>}, {transform_indices = @transform_9, window_bounds = array<i64: 1, 16, 128>}]} {
    %c0 = arith.constant 0 : index
    %c0_0 = arith.constant 0 : index
    %c0_1 = arith.constant 0 : index
    %0 = vector.load %arg1[%c0, %c0_0, %c0_1] : memref<1x16x16xf32, #tpu.memory_space<vmem>>, vector<1x16x16xf32>
    %1 = vector.shape_cast %0 : vector<1x16x16xf32> to vector<16x16xf32>
    %c0_2 = arith.constant 0 : index
    %c0_3 = arith.constant 0 : index
    %c0_4 = arith.constant 0 : index
    %2 = vector.load %arg2[%c0_2, %c0_3, %c0_4] : memref<1x16x128xf32, #tpu.memory_space<vmem>>, vector<1x16x128xf32>
    %3 = vector.shape_cast %2 : vector<1x16x128xf32> to vector<16x128xf32>
    %4 = arith.truncf %1 : vector<16x16xf32> to vector<16x16xbf16>
    %5 = vector.extract_strided_slice %4 {offsets = [0, 0], sizes = [16, 4], strides = [1, 1]} : vector<16x16xbf16> to vector<16x4xbf16>
    %c0_5 = arith.constant 0 : index
    %c0_6 = arith.constant 0 : index
    %6 = vector.load %arg11[%c0_5, %c0_6] : memref<16x720xbf16, #tpu.memory_space<vmem>>, vector<16x4xbf16>
    tpu.vector_store %arg11[%c0_5, %c0_6], %5 {strides = array<i32>} : memref<16x720xbf16, #tpu.memory_space<vmem>>, vector<16x4xbf16>,
    %7 = vector.extract_strided_slice %4 {offsets = [0, 4], sizes = [16, 4], strides = [1, 1]} : vector<16x16xbf16> to vector<16x4xbf16>
    %c0_7 = arith.constant 0 : index
    %c180 = arith.constant 180 : index
    %8 = vector.load %arg11[%c0_7, %c180] : memref<16x720xbf16, #tpu.memory_space<vmem>>, vector<16x4xbf16>
    tpu.vector_store %arg11[%c0_7, %c180], %7 {strides = array<i32>} : memref<16x720xbf16, #tpu.memory_space<vmem>>, vector<16x4xbf16>,
    %9 = vector.extract_strided_slice %4 {offsets = [0, 8], sizes = [16, 4], strides = [1, 1]} : vector<16x16xbf16> to vector<16x4xbf16>
    %c0_8 = arith.constant 0 : index
    %c360 = arith.constant 360 : index
    %10 = vector.load %arg11[%c0_8, %c360] : memref<16x720xbf16, #tpu.memory_space<vmem>>, vector<16x4xbf16>
    tpu.vector_store %arg11[%c0_8, %c360], %9 {strides = array<i32>} : memref<16x720xbf16, #tpu.memory_space<vmem>>, vector<16x4xbf16>,
    %11 = vector.extract_strided_slice %4 {offsets = [0, 12], sizes = [16, 4], strides = [1, 1]} : vector<16x16xbf16> to vector<16x4xbf16>
    %c0_9 = arith.constant 0 : index
    %c540 = arith.constant 540 : index
    %12 = vector.load %arg11[%c0_9, %c540] : memref<16x720xbf16, #tpu.memory_space<vmem>>, vector<16x4xbf16>
    tpu.vector_store %arg11[%c0_9, %c540], %11 {strides = array<i32>} : memref<16x720xbf16, #tpu.memory_space<vmem>>, vector<16x4xbf16>,
    %c0_10 = arith.constant 0 : index
    %c0_11 = arith.constant 0 : index
    %c0_12 = arith.constant 0 : index
    %13 = vector.load %arg3[%c0_10, %c0_11, %c0_12] : memref<2x16x16xbf16, #tpu.memory_space<vmem>>, vector<1x16x16xbf16>
    %14 = vector.shape_cast %13 : vector<1x16x16xbf16> to vector<16x16xbf16>
    %15 = arith.truncf %1 : vector<16x16xf32> to vector<16x16xbf16>
    %cst = arith.constant dense<0.000000e+00> : vector<16x16xf32>
    %16 = tpu.matmul %14, %15, %cst {dimension_numbers = #tpu.dot_dimension_numbers<[1], [0], [0], [1], [0, 0, 1, 1], [], []>} : vector<16x16xbf16>, vector<16x16xbf16>, vector<16x16xf32> -> vector<16x16xf32>
    %17 = arith.truncf %16 : vector<16x16xf32> to vector<16x16xbf16>
    %18 = vector.extract_strided_slice %17 {offsets = [0, 0], sizes = [16, 4], strides = [1, 1]} : vector<16x16xbf16> to vector<16x4xbf16>
    %c0_13 = arith.constant 0 : index
    %c36 = arith.constant 36 : index
    %19 = vector.load %arg11[%c0_13, %c36] : memref<16x720xbf16, #tpu.memory_space<vmem>>, vector<16x4xbf16>
    tpu.vector_store %arg11[%c0_13, %c36], %18 {strides = array<i32>} : memref<16x720xbf16, #tpu.memory_space<vmem>>, vector<16x4xbf16>,
    %20 = vector.extract_strided_slice %17 {offsets = [0, 4], sizes = [16, 4], strides = [1, 1]} : vector<16x16xbf16> to vector<16x4xbf16>
    %c0_14 = arith.constant 0 : index
    %c216 = arith.constant 216 : index
    %21 = vector.load %arg11[%c0_14, %c216] : memref<16x720xbf16, #tpu.memory_space<vmem>>, vector<16x4xbf16>
    tpu.vector_store %arg11[%c0_14, %c216], %20 {strides = array<i32>} : memref<16x720xbf16, #tpu.memory_space<vmem>>, vector<16x4xbf16>,
    %22 = vector.extract_strided_slice %17 {offsets = [0, 8], sizes = [16, 4], strides = [1, 1]} : vector<16x16xbf16> to vector<16x4xbf16>
    %c0_15 = arith.constant 0 : index
    %c396 = arith.constant 396 : index
    %23 = vector.load %arg11[%c0_15, %c396] : memref<16x720xbf16, #tpu.memory_space<vmem>>, vector<16x4xbf16>
    tpu.vector_store %arg11[%c0_15, %c396], %22 {strides = array<i32>} : memref<16x720xbf16, #tpu.memory_space<vmem>>, vector<16x4xbf16>,
    %24 = vector.extract_strided_slice %17 {offsets = [0, 12], sizes = [16, 4], strides = [1, 1]} : vector<16x16xbf16> to vector<16x4xbf16>
    %c0_16 = arith.constant 0 : index
    %c576 = arith.constant 576 : index
    %25 = vector.load %arg11[%c0_16, %c576] : memref<16x720xbf16, #tpu.memory_space<vmem>>, vector<16x4xbf16>
    tpu.vector_store %arg11[%c0_16, %c576], %24 {strides = array<i32>} : memref<16x720xbf16, #tpu.memory_space<vmem>>, vector<16x4xbf16>,
    %26 = arith.truncf %16 : vector<16x16xf32> to vector<16x16xbf16>
    %cst_17 = arith.constant dense<0.000000e+00> : vector<16x16xf32>
    %27 = tpu.matmul %14, %26, %cst_17 {dimension_numbers = #tpu.dot_dimension_numbers<[1], [0], [0], [1], [0, 0, 1, 1], [], []>} : vector<16x16xbf16>, vector<16x16xbf16>, vector<16x16xf32> -> vector<16x16xf32>
    %cst_18 = arith.constant 2.000000e+00 : f32
    %28 = vector.broadcast %cst_18 : f32 to vector<16x16xf32>
    %29 = arith.mulf %28, %27 : vector<16x16xf32>
    %30 = arith.subf %29, %1 : vector<16x16xf32>
    %31 = arith.truncf %30 : vector<16x16xf32> to vector<16x16xbf16>
    %32 = vector.extract_strided_slice %31 {offsets = [0, 0], sizes = [16, 4], strides = [1, 1]} : vector<16x16xbf16> to vector<16x4xbf16>
    %c0_19 = arith.constant 0 : index
    %c72 = arith.constant 72 : index
    %33 = vector.load %arg11[%c0_19, %c72] : memref<16x720xbf16, #tpu.memory_space<vmem>>, vector<16x4xbf16>
    tpu.vector_store %arg11[%c0_19, %c72], %32 {strides = array<i32>} : memref<16x720xbf16, #tpu.memory_space<vmem>>, vector<16x4xbf16>,
    %34 = vector.extract_strided_slice %31 {offsets = [0, 4], sizes = [16, 4], strides = [1, 1]} : vector<16x16xbf16> to vector<16x4xbf16>
    %c0_20 = arith.constant 0 : index
    %c252 = arith.constant 252 : index
    %35 = vector.load %arg11[%c0_20, %c252] : memref<16x720xbf16, #tpu.memory_space<vmem>>, vector<16x4xbf16>
    tpu.vector_store %arg11[%c0_20, %c252], %34 {strides = array<i32>} : memref<16x720xbf16, #tpu.memory_space<vmem>>, vector<16x4xbf16>,
    %36 = vector.extract_strided_slice %31 {offsets = [0, 8], sizes = [16, 4], strides = [1, 1]} : vector<16x16xbf16> to vector<16x4xbf16>
    %c0_21 = arith.constant 0 : index
    %c432 = arith.constant 432 : index
    %37 = vector.load %arg11[%c0_21, %c432] : memref<16x720xbf16, #tpu.memory_space<vmem>>, vector<16x4xbf16>
    tpu.vector_store %arg11[%c0_21, %c432], %36 {strides = array<i32>} : memref<16x720xbf16, #tpu.memory_space<vmem>>, vector<16x4xbf16>,
    %38 = vector.extract_strided_slice %31 {offsets = [0, 12], sizes = [16, 4], strides = [1, 1]} : vector<16x16xbf16> to vector<16x4xbf16>
    %c0_22 = arith.constant 0 : index
    %c612 = arith.constant 612 : index
    %39 = vector.load %arg11[%c0_22, %c612] : memref<16x720xbf16, #tpu.memory_space<vmem>>, vector<16x4xbf16>
    tpu.vector_store %arg11[%c0_22, %c612], %38 {strides = array<i32>} : memref<16x720xbf16, #tpu.memory_space<vmem>>, vector<16x4xbf16>,
    %c1 = arith.constant 1 : index
    %c0_23 = arith.constant 0 : index
    %c0_24 = arith.constant 0 : index
    %40 = vector.load %arg3[%c1, %c0_23, %c0_24] : memref<2x16x16xbf16, #tpu.memory_space<vmem>>, vector<1x16x16xbf16>
    %41 = vector.shape_cast %40 : vector<1x16x16xbf16> to vector<16x16xbf16>
    %42 = arith.truncf %16 : vector<16x16xf32> to vector<16x16xbf16>
    %cst_25 = arith.constant dense<0.000000e+00> : vector<16x16xf32>
    %43 = tpu.matmul %41, %42, %cst_25 {dimension_numbers = #tpu.dot_dimension_numbers<[1], [0], [0], [1], [0, 0, 1, 1], [], []>} : vector<16x16xbf16>, vector<16x16xbf16>, vector<16x16xf32> -> vector<16x16xf32>
    %44 = arith.truncf %43 : vector<16x16xf32> to vector<16x16xbf16>
    %45 = vector.extract_strided_slice %44 {offsets = [0, 0], sizes = [16, 4], strides = [1, 1]} : vector<16x16xbf16> to vector<16x4xbf16>
    %c0_26 = arith.constant 0 : index
    %c108 = arith.constant 108 : index
    %46 = vector.load %arg11[%c0_26, %c108] : memref<16x720xbf16, #tpu.memory_space<vmem>>, vector<16x4xbf16>
    tpu.vector_store %arg11[%c0_26, %c108], %45 {strides = array<i32>} : memref<16x720xbf16, #tpu.memory_space<vmem>>, vector<16x4xbf16>,
    %47 = vector.extract_strided_slice %44 {offsets = [0, 4], sizes = [16, 4], strides = [1, 1]} : vector<16x16xbf16> to vector<16x4xbf16>
    %c0_27 = arith.constant 0 : index
    %c288 = arith.constant 288 : index
    %48 = vector.load %arg11[%c0_27, %c288] : memref<16x720xbf16, #tpu.memory_space<vmem>>, vector<16x4xbf16>
    tpu.vector_store %arg11[%c0_27, %c288], %47 {strides = array<i32>} : memref<16x720xbf16, #tpu.memory_space<vmem>>, vector<16x4xbf16>,
    %49 = vector.extract_strided_slice %44 {offsets = [0, 8], sizes = [16, 4], strides = [1, 1]} : vector<16x16xbf16> to vector<16x4xbf16>
    %c0_28 = arith.constant 0 : index
    %c468 = arith.constant 468 : index
    %50 = vector.load %arg11[%c0_28, %c468] : memref<16x720xbf16, #tpu.memory_space<vmem>>, vector<16x4xbf16>
    tpu.vector_store %arg11[%c0_28, %c468], %49 {strides = array<i32>} : memref<16x720xbf16, #tpu.memory_space<vmem>>, vector<16x4xbf16>,
    %51 = vector.extract_strided_slice %44 {offsets = [0, 12], sizes = [16, 4], strides = [1, 1]} : vector<16x16xbf16> to vector<16x4xbf16>
    %c0_29 = arith.constant 0 : index
    %c648 = arith.constant 648 : index
    %52 = vector.load %arg11[%c0_29, %c648] : memref<16x720xbf16, #tpu.memory_space<vmem>>, vector<16x4xbf16>
    tpu.vector_store %arg11[%c0_29, %c648], %51 {strides = array<i32>} : memref<16x720xbf16, #tpu.memory_space<vmem>>, vector<16x4xbf16>,
    %53 = arith.truncf %43 : vector<16x16xf32> to vector<16x16xbf16>
    %cst_30 = arith.constant dense<0.000000e+00> : vector<16x16xf32>
    %54 = tpu.matmul %41, %53, %cst_30 {dimension_numbers = #tpu.dot_dimension_numbers<[1], [0], [0], [1], [0, 0, 1, 1], [], []>} : vector<16x16xbf16>, vector<16x16xbf16>, vector<16x16xf32> -> vector<16x16xf32>
    %cst_31 = arith.constant 2.000000e+00 : f32
    %55 = vector.broadcast %cst_31 : f32 to vector<16x16xf32>
    %56 = arith.mulf %55, %54 : vector<16x16xf32>
    %57 = arith.subf %56, %16 : vector<16x16xf32>
    %58 = arith.truncf %57 : vector<16x16xf32> to vector<16x16xbf16>
    %59 = vector.extract_strided_slice %58 {offsets = [0, 0], sizes = [16, 4], strides = [1, 1]} : vector<16x16xbf16> to vector<16x4xbf16>
    %c0_32 = arith.constant 0 : index
    %c144 = arith.constant 144 : index
    %60 = vector.load %arg11[%c0_32, %c144] : memref<16x720xbf16, #tpu.memory_space<vmem>>, vector<16x4xbf16>
    tpu.vector_store %arg11[%c0_32, %c144], %59 {strides = array<i32>} : memref<16x720xbf16, #tpu.memory_space<vmem>>, vector<16x4xbf16>,
    %61 = vector.extract_strided_slice %58 {offsets = [0, 4], sizes = [16, 4], strides = [1, 1]} : vector<16x16xbf16> to vector<16x4xbf16>
    %c0_33 = arith.constant 0 : index
    %c324 = arith.constant 324 : index
    %62 = vector.load %arg11[%c0_33, %c324] : memref<16x720xbf16, #tpu.memory_space<vmem>>, vector<16x4xbf16>
    tpu.vector_store %arg11[%c0_33, %c324], %61 {strides = array<i32>} : memref<16x720xbf16, #tpu.memory_space<vmem>>, vector<16x4xbf16>,
    %63 = vector.extract_strided_slice %58 {offsets = [0, 8], sizes = [16, 4], strides = [1, 1]} : vector<16x16xbf16> to vector<16x4xbf16>
    %c0_34 = arith.constant 0 : index
    %c504 = arith.constant 504 : index
    %64 = vector.load %arg11[%c0_34, %c504] : memref<16x720xbf16, #tpu.memory_space<vmem>>, vector<16x4xbf16>
    tpu.vector_store %arg11[%c0_34, %c504], %63 {strides = array<i32>} : memref<16x720xbf16, #tpu.memory_space<vmem>>, vector<16x4xbf16>,
    %65 = vector.extract_strided_slice %58 {offsets = [0, 12], sizes = [16, 4], strides = [1, 1]} : vector<16x16xbf16> to vector<16x4xbf16>
    %c0_35 = arith.constant 0 : index
    %c684 = arith.constant 684 : index
    %66 = vector.load %arg11[%c0_35, %c684] : memref<16x720xbf16, #tpu.memory_space<vmem>>, vector<16x4xbf16>
    tpu.vector_store %arg11[%c0_35, %c684], %65 {strides = array<i32>} : memref<16x720xbf16, #tpu.memory_space<vmem>>, vector<16x4xbf16>,
    %67 = arith.truncf %3 : vector<16x128xf32> to vector<16x128xbf16>
    %68 = vector.extract_strided_slice %67 {offsets = [0, 0], sizes = [16, 32], strides = [1, 1]} : vector<16x128xbf16> to vector<16x32xbf16>
    %c0_36 = arith.constant 0 : index
    %c4 = arith.constant 4 : index
    %69 = vector.load %arg11[%c0_36, %c4] : memref<16x720xbf16, #tpu.memory_space<vmem>>, vector<16x32xbf16>
    tpu.vector_store %arg11[%c0_36, %c4], %68 {strides = array<i32>} : memref<16x720xbf16, #tpu.memory_space<vmem>>, vector<16x32xbf16>,
    %70 = vector.extract_strided_slice %67 {offsets = [0, 32], sizes = [16, 32], strides = [1, 1]} : vector<16x128xbf16> to vector<16x32xbf16>
    %c0_37 = arith.constant 0 : index
    %c184 = arith.constant 184 : index
    %71 = vector.load %arg11[%c0_37, %c184] : memref<16x720xbf16, #tpu.memory_space<vmem>>, vector<16x32xbf16>
    tpu.vector_store %arg11[%c0_37, %c184], %70 {strides = array<i32>} : memref<16x720xbf16, #tpu.memory_space<vmem>>, vector<16x32xbf16>,
    %72 = vector.extract_strided_slice %67 {offsets = [0, 64], sizes = [16, 32], strides = [1, 1]} : vector<16x128xbf16> to vector<16x32xbf16>
    %c0_38 = arith.constant 0 : index
    %c364 = arith.constant 364 : index
    %73 = vector.load %arg11[%c0_38, %c364] : memref<16x720xbf16, #tpu.memory_space<vmem>>, vector<16x32xbf16>
    tpu.vector_store %arg11[%c0_38, %c364], %72 {strides = array<i32>} : memref<16x720xbf16, #tpu.memory_space<vmem>>, vector<16x32xbf16>,
    %74 = vector.extract_strided_slice %67 {offsets = [0, 96], sizes = [16, 32], strides = [1, 1]} : vector<16x128xbf16> to vector<16x32xbf16>
    %c0_39 = arith.constant 0 : index
    %c544 = arith.constant 544 : index
    %75 = vector.load %arg11[%c0_39, %c544] : memref<16x720xbf16, #tpu.memory_space<vmem>>, vector<16x32xbf16>
    tpu.vector_store %arg11[%c0_39, %c544], %74 {strides = array<i32>} : memref<16x720xbf16, #tpu.memory_space<vmem>>, vector<16x32xbf16>,
    %c0_40 = arith.constant 0 : index
    %c0_41 = arith.constant 0 : index
    %c0_42 = arith.constant 0 : index
    %76 = vector.load %arg3[%c0_40, %c0_41, %c0_42] : memref<2x16x16xbf16, #tpu.memory_space<vmem>>, vector<1x16x16xbf16>
    %77 = vector.shape_cast %76 : vector<1x16x16xbf16> to vector<16x16xbf16>
    %78 = arith.truncf %3 : vector<16x128xf32> to vector<16x128xbf16>
    %cst_43 = arith.constant dense<0.000000e+00> : vector<16x128xf32>
    %79 = tpu.matmul %77, %78, %cst_43 {dimension_numbers = #tpu.dot_dimension_numbers<[1], [0], [0], [1], [0, 0, 1, 1], [], []>} : vector<16x16xbf16>, vector<16x128xbf16>, vector<16x128xf32> -> vector<16x128xf32>
    %80 = arith.truncf %79 : vector<16x128xf32> to vector<16x128xbf16>
    %81 = vector.extract_strided_slice %80 {offsets = [0, 0], sizes = [16, 32], strides = [1, 1]} : vector<16x128xbf16> to vector<16x32xbf16>
    %c0_44 = arith.constant 0 : index
    %c40 = arith.constant 40 : index
    %82 = vector.load %arg11[%c0_44, %c40] : memref<16x720xbf16, #tpu.memory_space<vmem>>, vector<16x32xbf16>
    tpu.vector_store %arg11[%c0_44, %c40], %81 {strides = array<i32>} : memref<16x720xbf16, #tpu.memory_space<vmem>>, vector<16x32xbf16>,
    %83 = vector.extract_strided_slice %80 {offsets = [0, 32], sizes = [16, 32], strides = [1, 1]} : vector<16x128xbf16> to vector<16x32xbf16>
    %c0_45 = arith.constant 0 : index
    %c220 = arith.constant 220 : index
    %84 = vector.load %arg11[%c0_45, %c220] : memref<16x720xbf16, #tpu.memory_space<vmem>>, vector<16x32xbf16>
    tpu.vector_store %arg11[%c0_45, %c220], %83 {strides = array<i32>} : memref<16x720xbf16, #tpu.memory_space<vmem>>, vector<16x32xbf16>,
    %85 = vector.extract_strided_slice %80 {offsets = [0, 64], sizes = [16, 32], strides = [1, 1]} : vector<16x128xbf16> to vector<16x32xbf16>
    %c0_46 = arith.constant 0 : index
    %c400 = arith.constant 400 : index
    %86 = vector.load %arg11[%c0_46, %c400] : memref<16x720xbf16, #tpu.memory_space<vmem>>, vector<16x32xbf16>
    tpu.vector_store %arg11[%c0_46, %c400], %85 {strides = array<i32>} : memref<16x720xbf16, #tpu.memory_space<vmem>>, vector<16x32xbf16>,
    %87 = vector.extract_strided_slice %80 {offsets = [0, 96], sizes = [16, 32], strides = [1, 1]} : vector<16x128xbf16> to vector<16x32xbf16>
    %c0_47 = arith.constant 0 : index
    %c580 = arith.constant 580 : index
    %88 = vector.load %arg11[%c0_47, %c580] : memref<16x720xbf16, #tpu.memory_space<vmem>>, vector<16x32xbf16>
    tpu.vector_store %arg11[%c0_47, %c580], %87 {strides = array<i32>} : memref<16x720xbf16, #tpu.memory_space<vmem>>, vector<16x32xbf16>,
    %89 = arith.truncf %79 : vector<16x128xf32> to vector<16x128xbf16>
    %cst_48 = arith.constant dense<0.000000e+00> : vector<16x128xf32>
    %90 = tpu.matmul %77, %89, %cst_48 {dimension_numbers = #tpu.dot_dimension_numbers<[1], [0], [0], [1], [0, 0, 1, 1], [], []>} : vector<16x16xbf16>, vector<16x128xbf16>, vector<16x128xf32> -> vector<16x128xf32>
    %cst_49 = arith.constant 2.000000e+00 : f32
    %91 = vector.broadcast %cst_49 : f32 to vector<16x128xf32>
    %92 = arith.mulf %91, %90 : vector<16x128xf32>
    %93 = arith.subf %92, %3 : vector<16x128xf32>
    %94 = arith.truncf %93 : vector<16x128xf32> to vector<16x128xbf16>
    %95 = vector.extract_strided_slice %94 {offsets = [0, 0], sizes = [16, 32], strides = [1, 1]} : vector<16x128xbf16> to vector<16x32xbf16>
    %c0_50 = arith.constant 0 : index
    %c76 = arith.constant 76 : index
    %96 = vector.load %arg11[%c0_50, %c76] : memref<16x720xbf16, #tpu.memory_space<vmem>>, vector<16x32xbf16>
    tpu.vector_store %arg11[%c0_50, %c76], %95 {strides = array<i32>} : memref<16x720xbf16, #tpu.memory_space<vmem>>, vector<16x32xbf16>,
    %97 = vector.extract_strided_slice %94 {offsets = [0, 32], sizes = [16, 32], strides = [1, 1]} : vector<16x128xbf16> to vector<16x32xbf16>
    %c0_51 = arith.constant 0 : index
    %c256 = arith.constant 256 : index
    %98 = vector.load %arg11[%c0_51, %c256] : memref<16x720xbf16, #tpu.memory_space<vmem>>, vector<16x32xbf16>
    tpu.vector_store %arg11[%c0_51, %c256], %97 {strides = array<i32>} : memref<16x720xbf16, #tpu.memory_space<vmem>>, vector<16x32xbf16>,
    %99 = vector.extract_strided_slice %94 {offsets = [0, 64], sizes = [16, 32], strides = [1, 1]} : vector<16x128xbf16> to vector<16x32xbf16>
    %c0_52 = arith.constant 0 : index
    %c436 = arith.constant 436 : index
    %100 = vector.load %arg11[%c0_52, %c436] : memref<16x720xbf16, #tpu.memory_space<vmem>>, vector<16x32xbf16>
    tpu.vector_store %arg11[%c0_52, %c436], %99 {strides = array<i32>} : memref<16x720xbf16, #tpu.memory_space<vmem>>, vector<16x32xbf16>,
    %101 = vector.extract_strided_slice %94 {offsets = [0, 96], sizes = [16, 32], strides = [1, 1]} : vector<16x128xbf16> to vector<16x32xbf16>
    %c0_53 = arith.constant 0 : index
    %c616 = arith.constant 616 : index
    %102 = vector.load %arg11[%c0_53, %c616] : memref<16x720xbf16, #tpu.memory_space<vmem>>, vector<16x32xbf16>
    tpu.vector_store %arg11[%c0_53, %c616], %101 {strides = array<i32>} : memref<16x720xbf16, #tpu.memory_space<vmem>>, vector<16x32xbf16>,
    %c1_54 = arith.constant 1 : index
    %c0_55 = arith.constant 0 : index
    %c0_56 = arith.constant 0 : index
    %103 = vector.load %arg3[%c1_54, %c0_55, %c0_56] : memref<2x16x16xbf16, #tpu.memory_space<vmem>>, vector<1x16x16xbf16>
    %104 = vector.shape_cast %103 : vector<1x16x16xbf16> to vector<16x16xbf16>
    %105 = arith.truncf %79 : vector<16x128xf32> to vector<16x128xbf16>
    %cst_57 = arith.constant dense<0.000000e+00> : vector<16x128xf32>
    %106 = tpu.matmul %104, %105, %cst_57 {dimension_numbers = #tpu.dot_dimension_numbers<[1], [0], [0], [1], [0, 0, 1, 1], [], []>} : vector<16x16xbf16>, vector<16x128xbf16>, vector<16x128xf32> -> vector<16x128xf32>
    %107 = arith.truncf %106 : vector<16x128xf32> to vector<16x128xbf16>
    %108 = vector.extract_strided_slice %107 {offsets = [0, 0], sizes = [16, 32], strides = [1, 1]} : vector<16x128xbf16> to vector<16x32xbf16>
    %c0_58 = arith.constant 0 : index
    %c112 = arith.constant 112 : index
    %109 = vector.load %arg11[%c0_58, %c112] : memref<16x720xbf16, #tpu.memory_space<vmem>>, vector<16x32xbf16>
    tpu.vector_store %arg11[%c0_58, %c112], %108 {strides = array<i32>} : memref<16x720xbf16, #tpu.memory_space<vmem>>, vector<16x32xbf16>,
    %110 = vector.extract_strided_slice %107 {offsets = [0, 32], sizes = [16, 32], strides = [1, 1]} : vector<16x128xbf16> to vector<16x32xbf16>
    %c0_59 = arith.constant 0 : index
    %c292 = arith.constant 292 : index
    %111 = vector.load %arg11[%c0_59, %c292] : memref<16x720xbf16, #tpu.memory_space<vmem>>, vector<16x32xbf16>
    tpu.vector_store %arg11[%c0_59, %c292], %110 {strides = array<i32>} : memref<16x720xbf16, #tpu.memory_space<vmem>>, vector<16x32xbf16>,
    %112 = vector.extract_strided_slice %107 {offsets = [0, 64], sizes = [16, 32], strides = [1, 1]} : vector<16x128xbf16> to vector<16x32xbf16>
    %c0_60 = arith.constant 0 : index
    %c472 = arith.constant 472 : index
    %113 = vector.load %arg11[%c0_60, %c472] : memref<16x720xbf16, #tpu.memory_space<vmem>>, vector<16x32xbf16>
    tpu.vector_store %arg11[%c0_60, %c472], %112 {strides = array<i32>} : memref<16x720xbf16, #tpu.memory_space<vmem>>, vector<16x32xbf16>,
    %114 = vector.extract_strided_slice %107 {offsets = [0, 96], sizes = [16, 32], strides = [1, 1]} : vector<16x128xbf16> to vector<16x32xbf16>
    %c0_61 = arith.constant 0 : index
    %c652 = arith.constant 652 : index
    %115 = vector.load %arg11[%c0_61, %c652] : memref<16x720xbf16, #tpu.memory_space<vmem>>, vector<16x32xbf16>
    tpu.vector_store %arg11[%c0_61, %c652], %114 {strides = array<i32>} : memref<16x720xbf16, #tpu.memory_space<vmem>>, vector<16x32xbf16>,
    %116 = arith.truncf %106 : vector<16x128xf32> to vector<16x128xbf16>
    %cst_62 = arith.constant dense<0.000000e+00> : vector<16x128xf32>
    %117 = tpu.matmul %104, %116, %cst_62 {dimension_numbers = #tpu.dot_dimension_numbers<[1], [0], [0], [1], [0, 0, 1, 1], [], []>} : vector<16x16xbf16>, vector<16x128xbf16>, vector<16x128xf32> -> vector<16x128xf32>
    %cst_63 = arith.constant 2.000000e+00 : f32
    %118 = vector.broadcast %cst_63 : f32 to vector<16x128xf32>
    %119 = arith.mulf %118, %117 : vector<16x128xf32>
    %120 = arith.subf %119, %79 : vector<16x128xf32>
    %121 = arith.truncf %120 : vector<16x128xf32> to vector<16x128xbf16>
    %122 = vector.extract_strided_slice %121 {offsets = [0, 0], sizes = [16, 32], strides = [1, 1]} : vector<16x128xbf16> to vector<16x32xbf16>
    %c0_64 = arith.constant 0 : index
    %c148 = arith.constant 148 : index
    %123 = vector.load %arg11[%c0_64, %c148] : memref<16x720xbf16, #tpu.memory_space<vmem>>, vector<16x32xbf16>
    tpu.vector_store %arg11[%c0_64, %c148], %122 {strides = array<i32>} : memref<16x720xbf16, #tpu.memory_space<vmem>>, vector<16x32xbf16>,
    %124 = vector.extract_strided_slice %121 {offsets = [0, 32], sizes = [16, 32], strides = [1, 1]} : vector<16x128xbf16> to vector<16x32xbf16>
    %c0_65 = arith.constant 0 : index
    %c328 = arith.constant 328 : index
    %125 = vector.load %arg11[%c0_65, %c328] : memref<16x720xbf16, #tpu.memory_space<vmem>>, vector<16x32xbf16>
    tpu.vector_store %arg11[%c0_65, %c328], %124 {strides = array<i32>} : memref<16x720xbf16, #tpu.memory_space<vmem>>, vector<16x32xbf16>,
    %126 = vector.extract_strided_slice %121 {offsets = [0, 64], sizes = [16, 32], strides = [1, 1]} : vector<16x128xbf16> to vector<16x32xbf16>
    %c0_66 = arith.constant 0 : index
    %c508 = arith.constant 508 : index
    %127 = vector.load %arg11[%c0_66, %c508] : memref<16x720xbf16, #tpu.memory_space<vmem>>, vector<16x32xbf16>
    tpu.vector_store %arg11[%c0_66, %c508], %126 {strides = array<i32>} : memref<16x720xbf16, #tpu.memory_space<vmem>>, vector<16x32xbf16>,
    %128 = vector.extract_strided_slice %121 {offsets = [0, 96], sizes = [16, 32], strides = [1, 1]} : vector<16x128xbf16> to vector<16x32xbf16>
    %c0_67 = arith.constant 0 : index
    %c688 = arith.constant 688 : index
    %129 = vector.load %arg11[%c0_67, %c688] : memref<16x720xbf16, #tpu.memory_space<vmem>>, vector<16x32xbf16>
    tpu.vector_store %arg11[%c0_67, %c688], %128 {strides = array<i32>} : memref<16x720xbf16, #tpu.memory_space<vmem>>, vector<16x32xbf16>,
    %c0_68 = arith.constant 0 : index
    %c0_69 = arith.constant 0 : index
    %130 = vector.load %arg4[%c0_68, %c0_69] : memref<180x32xbf16, #tpu.memory_space<vmem>>, vector<180x32xbf16>
    %c0_70 = arith.constant 0 : index
    %c0_71 = arith.constant 0 : index
    %131 = vector.load %arg5[%c0_70, %c0_71] : memref<180x32xbf16, #tpu.memory_space<vmem>>, vector<180x32xbf16>
    %c0_72 = arith.constant 0 : index
    %c0_73 = arith.constant 0 : index
    %132 = vector.load %arg7[%c0_72, %c0_73] : memref<1x32xf32, #tpu.memory_space<vmem>>, vector<1x32xf32>
    %c0_74 = arith.constant 0 : index
    %c0_75 = arith.constant 0 : index
    %133 = vector.load %arg8[%c0_74, %c0_75] : memref<1x32xf32, #tpu.memory_space<vmem>>, vector<1x32xf32>
    %c0_76 = arith.constant 0 : index
    %c0_77 = arith.constant 0 : index
    %134 = vector.load %arg11[%c0_76, %c0_77] : memref<16x720xbf16, #tpu.memory_space<vmem>>, vector<16x180xbf16>
    %cst_78 = arith.constant dense<0.000000e+00> : vector<16x32xf32>
    %135 = tpu.matmul %134, %130, %cst_78 {dimension_numbers = #tpu.dot_dimension_numbers<[1], [0], [0], [1], [0, 0, 1, 1], [], []>} : vector<16x180xbf16>, vector<180x32xbf16>, vector<16x32xf32> -> vector<16x32xf32>
    %136 = vector.broadcast %132 : vector<1x32xf32> to vector<16x32xf32>
    %137 = arith.addf %135, %136 : vector<16x32xf32>
    %138 = arith.negf %137 : vector<16x32xf32>
    %139 = math.exp %138 : vector<16x32xf32>
    %cst_79 = arith.constant 1.000000e+00 : f32
    %140 = vector.broadcast %cst_79 : f32 to vector<16x32xf32>
    %141 = arith.addf %140, %139 : vector<16x32xf32>
    %142 = arith.divf %140, %141 : vector<16x32xf32>
    %cst_80 = arith.constant dense<0.000000e+00> : vector<16x32xf32>
    %143 = tpu.matmul %134, %131, %cst_80 {dimension_numbers = #tpu.dot_dimension_numbers<[1], [0], [0], [1], [0, 0, 1, 1], [], []>} : vector<16x180xbf16>, vector<180x32xbf16>, vector<16x32xf32> -> vector<16x32xf32>
    %144 = vector.broadcast %133 : vector<1x32xf32> to vector<16x32xf32>
    %145 = arith.addf %143, %144 : vector<16x32xf32>
    %146 = arith.negf %145 : vector<16x32xf32>
    %147 = math.exp %146 : vector<16x32xf32>
    %cst_81 = arith.constant 1.000000e+00 : f32
    %148 = vector.broadcast %cst_81 : f32 to vector<16x32xf32>
    %149 = arith.addf %148, %147 : vector<16x32xf32>
    %150 = arith.divf %148, %149 : vector<16x32xf32>
    %151 = vector.extract_strided_slice %3 {offsets = [0, 0], sizes = [16, 32], strides = [1, 1]} : vector<16x128xf32> to vector<16x32xf32>
    %152 = arith.mulf %142, %151 : vector<16x32xf32>
    %c0_82 = arith.constant 0 : index
    %c180_83 = arith.constant 180 : index
    %153 = vector.load %arg11[%c0_82, %c180_83] : memref<16x720xbf16, #tpu.memory_space<vmem>>, vector<16x180xbf16>
    %cst_84 = arith.constant dense<0.000000e+00> : vector<16x32xf32>
    %154 = tpu.matmul %153, %130, %cst_84 {dimension_numbers = #tpu.dot_dimension_numbers<[1], [0], [0], [1], [0, 0, 1, 1], [], []>} : vector<16x180xbf16>, vector<180x32xbf16>, vector<16x32xf32> -> vector<16x32xf32>
    %155 = vector.broadcast %132 : vector<1x32xf32> to vector<16x32xf32>
    %156 = arith.addf %154, %155 : vector<16x32xf32>
    %157 = arith.negf %156 : vector<16x32xf32>
    %158 = math.exp %157 : vector<16x32xf32>
    %cst_85 = arith.constant 1.000000e+00 : f32
    %159 = vector.broadcast %cst_85 : f32 to vector<16x32xf32>
    %160 = arith.addf %159, %158 : vector<16x32xf32>
    %161 = arith.divf %159, %160 : vector<16x32xf32>
    %cst_86 = arith.constant dense<0.000000e+00> : vector<16x32xf32>
    %162 = tpu.matmul %153, %131, %cst_86 {dimension_numbers = #tpu.dot_dimension_numbers<[1], [0], [0], [1], [0, 0, 1, 1], [], []>} : vector<16x180xbf16>, vector<180x32xbf16>, vector<16x32xf32> -> vector<16x32xf32>
    %163 = vector.broadcast %133 : vector<1x32xf32> to vector<16x32xf32>
    %164 = arith.addf %162, %163 : vector<16x32xf32>
    %165 = arith.negf %164 : vector<16x32xf32>
    %166 = math.exp %165 : vector<16x32xf32>
    %cst_87 = arith.constant 1.000000e+00 : f32
    %167 = vector.broadcast %cst_87 : f32 to vector<16x32xf32>
    %168 = arith.addf %167, %166 : vector<16x32xf32>
    %169 = arith.divf %167, %168 : vector<16x32xf32>
    %170 = vector.extract_strided_slice %3 {offsets = [0, 32], sizes = [16, 32], strides = [1, 1]} : vector<16x128xf32> to vector<16x32xf32>
    %171 = arith.mulf %161, %170 : vector<16x32xf32>
    %c0_88 = arith.constant 0 : index
    %c360_89 = arith.constant 360 : index
    %172 = vector.load %arg11[%c0_88, %c360_89] : memref<16x720xbf16, #tpu.memory_space<vmem>>, vector<16x180xbf16>
    %cst_90 = arith.constant dense<0.000000e+00> : vector<16x32xf32>
    %173 = tpu.matmul %172, %130, %cst_90 {dimension_numbers = #tpu.dot_dimension_numbers<[1], [0], [0], [1], [0, 0, 1, 1], [], []>} : vector<16x180xbf16>, vector<180x32xbf16>, vector<16x32xf32> -> vector<16x32xf32>
    %174 = vector.broadcast %132 : vector<1x32xf32> to vector<16x32xf32>
    %175 = arith.addf %173, %174 : vector<16x32xf32>
    %176 = arith.negf %175 : vector<16x32xf32>
    %177 = math.exp %176 : vector<16x32xf32>
    %cst_91 = arith.constant 1.000000e+00 : f32
    %178 = vector.broadcast %cst_91 : f32 to vector<16x32xf32>
    %179 = arith.addf %178, %177 : vector<16x32xf32>
    %180 = arith.divf %178, %179 : vector<16x32xf32>
    %cst_92 = arith.constant dense<0.000000e+00> : vector<16x32xf32>
    %181 = tpu.matmul %172, %131, %cst_92 {dimension_numbers = #tpu.dot_dimension_numbers<[1], [0], [0], [1], [0, 0, 1, 1], [], []>} : vector<16x180xbf16>, vector<180x32xbf16>, vector<16x32xf32> -> vector<16x32xf32>
    %182 = vector.broadcast %133 : vector<1x32xf32> to vector<16x32xf32>
    %183 = arith.addf %181, %182 : vector<16x32xf32>
    %184 = arith.negf %183 : vector<16x32xf32>
    %185 = math.exp %184 : vector<16x32xf32>
    %cst_93 = arith.constant 1.000000e+00 : f32
    %186 = vector.broadcast %cst_93 : f32 to vector<16x32xf32>
    %187 = arith.addf %186, %185 : vector<16x32xf32>
    %188 = arith.divf %186, %187 : vector<16x32xf32>
    %189 = vector.extract_strided_slice %3 {offsets = [0, 64], sizes = [16, 32], strides = [1, 1]} : vector<16x128xf32> to vector<16x32xf32>
    %190 = arith.mulf %180, %189 : vector<16x32xf32>
    %c0_94 = arith.constant 0 : index
    %c540_95 = arith.constant 540 : index
    %191 = vector.load %arg11[%c0_94, %c540_95] : memref<16x720xbf16, #tpu.memory_space<vmem>>, vector<16x180xbf16>
    %cst_96 = arith.constant dense<0.000000e+00> : vector<16x32xf32>
    %192 = tpu.matmul %191, %130, %cst_96 {dimension_numbers = #tpu.dot_dimension_numbers<[1], [0], [0], [1], [0, 0, 1, 1], [], []>} : vector<16x180xbf16>, vector<180x32xbf16>, vector<16x32xf32> -> vector<16x32xf32>
    %193 = vector.broadcast %132 : vector<1x32xf32> to vector<16x32xf32>
    %194 = arith.addf %192, %193 : vector<16x32xf32>
    %195 = arith.negf %194 : vector<16x32xf32>
    %196 = math.exp %195 : vector<16x32xf32>
    %cst_97 = arith.constant 1.000000e+00 : f32
    %197 = vector.broadcast %cst_97 : f32 to vector<16x32xf32>
    %198 = arith.addf %197, %196 : vector<16x32xf32>
    %199 = arith.divf %197, %198 : vector<16x32xf32>
    %cst_98 = arith.constant dense<0.000000e+00> : vector<16x32xf32>
    %200 = tpu.matmul %191, %131, %cst_98 {dimension_numbers = #tpu.dot_dimension_numbers<[1], [0], [0], [1], [0, 0, 1, 1], [], []>} : vector<16x180xbf16>, vector<180x32xbf16>, vector<16x32xf32> -> vector<16x32xf32>
    %201 = vector.broadcast %133 : vector<1x32xf32> to vector<16x32xf32>
    %202 = arith.addf %200, %201 : vector<16x32xf32>
    %203 = arith.negf %202 : vector<16x32xf32>
    %204 = math.exp %203 : vector<16x32xf32>
    %cst_99 = arith.constant 1.000000e+00 : f32
    %205 = vector.broadcast %cst_99 : f32 to vector<16x32xf32>
    %206 = arith.addf %205, %204 : vector<16x32xf32>
    %207 = arith.divf %205, %206 : vector<16x32xf32>
    %208 = vector.extract_strided_slice %3 {offsets = [0, 96], sizes = [16, 32], strides = [1, 1]} : vector<16x128xf32> to vector<16x32xf32>
    %209 = arith.mulf %199, %208 : vector<16x32xf32>
    %210 = tpu.concatenate %152, %171, %190, %209 in 1 : vector<16x32xf32>, vector<16x32xf32>, vector<16x32xf32>, vector<16x32xf32> -> vector<16x128xf32>
    %211 = arith.truncf %210 : vector<16x128xf32> to vector<16x128xbf16>
    %212 = vector.extract_strided_slice %211 {offsets = [0, 0], sizes = [16, 32], strides = [1, 1]} : vector<16x128xbf16> to vector<16x32xbf16>
    %c0_100 = arith.constant 0 : index
    %c4_101 = arith.constant 4 : index
    %213 = vector.load %arg11[%c0_100, %c4_101] : memref<16x720xbf16, #tpu.memory_space<vmem>>, vector<16x32xbf16>
    tpu.vector_store %arg11[%c0_100, %c4_101], %212 {strides = array<i32>} : memref<16x720xbf16, #tpu.memory_space<vmem>>, vector<16x32xbf16>,
    %214 = vector.extract_strided_slice %211 {offsets = [0, 32], sizes = [16, 32], strides = [1, 1]} : vector<16x128xbf16> to vector<16x32xbf16>
    %c0_102 = arith.constant 0 : index
    %c184_103 = arith.constant 184 : index
    %215 = vector.load %arg11[%c0_102, %c184_103] : memref<16x720xbf16, #tpu.memory_space<vmem>>, vector<16x32xbf16>
    tpu.vector_store %arg11[%c0_102, %c184_103], %214 {strides = array<i32>} : memref<16x720xbf16, #tpu.memory_space<vmem>>, vector<16x32xbf16>,
    %216 = vector.extract_strided_slice %211 {offsets = [0, 64], sizes = [16, 32], strides = [1, 1]} : vector<16x128xbf16> to vector<16x32xbf16>
    %c0_104 = arith.constant 0 : index
    %c364_105 = arith.constant 364 : index
    %217 = vector.load %arg11[%c0_104, %c364_105] : memref<16x720xbf16, #tpu.memory_space<vmem>>, vector<16x32xbf16>
    tpu.vector_store %arg11[%c0_104, %c364_105], %216 {strides = array<i32>} : memref<16x720xbf16, #tpu.memory_space<vmem>>, vector<16x32xbf16>,
    %218 = vector.extract_strided_slice %211 {offsets = [0, 96], sizes = [16, 32], strides = [1, 1]} : vector<16x128xbf16> to vector<16x32xbf16>
    %c0_106 = arith.constant 0 : index
    %c544_107 = arith.constant 544 : index
    %219 = vector.load %arg11[%c0_106, %c544_107] : memref<16x720xbf16, #tpu.memory_space<vmem>>, vector<16x32xbf16>
    tpu.vector_store %arg11[%c0_106, %c544_107], %218 {strides = array<i32>} : memref<16x720xbf16, #tpu.memory_space<vmem>>, vector<16x32xbf16>,
    %c0_108 = arith.constant 0 : index
    %c0_109 = arith.constant 0 : index
    %c0_110 = arith.constant 0 : index
    %220 = vector.load %arg3[%c0_108, %c0_109, %c0_110] : memref<2x16x16xbf16, #tpu.memory_space<vmem>>, vector<1x16x16xbf16>
    %221 = vector.shape_cast %220 : vector<1x16x16xbf16> to vector<16x16xbf16>
    %222 = arith.truncf %210 : vector<16x128xf32> to vector<16x128xbf16>
    %cst_111 = arith.constant dense<0.000000e+00> : vector<16x128xf32>
    %223 = tpu.matmul %221, %222, %cst_111 {dimension_numbers = #tpu.dot_dimension_numbers<[1], [0], [0], [1], [0, 0, 1, 1], [], []>} : vector<16x16xbf16>, vector<16x128xbf16>, vector<16x128xf32> -> vector<16x128xf32>
    %224 = arith.truncf %223 : vector<16x128xf32> to vector<16x128xbf16>
    %225 = vector.extract_strided_slice %224 {offsets = [0, 0], sizes = [16, 32], strides = [1, 1]} : vector<16x128xbf16> to vector<16x32xbf16>
    %c0_112 = arith.constant 0 : index
    %c40_113 = arith.constant 40 : index
    %226 = vector.load %arg11[%c0_112, %c40_113] : memref<16x720xbf16, #tpu.memory_space<vmem>>, vector<16x32xbf16>
    tpu.vector_store %arg11[%c0_112, %c40_113], %225 {strides = array<i32>} : memref<16x720xbf16, #tpu.memory_space<vmem>>, vector<16x32xbf16>,
    %227 = vector.extract_strided_slice %224 {offsets = [0, 32], sizes = [16, 32], strides = [1, 1]} : vector<16x128xbf16> to vector<16x32xbf16>
    %c0_114 = arith.constant 0 : index
    %c220_115 = arith.constant 220 : index
    %228 = vector.load %arg11[%c0_114, %c220_115] : memref<16x720xbf16, #tpu.memory_space<vmem>>, vector<16x32xbf16>
    tpu.vector_store %arg11[%c0_114, %c220_115], %227 {strides = array<i32>} : memref<16x720xbf16, #tpu.memory_space<vmem>>, vector<16x32xbf16>,
    %229 = vector.extract_strided_slice %224 {offsets = [0, 64], sizes = [16, 32], strides = [1, 1]} : vector<16x128xbf16> to vector<16x32xbf16>
    %c0_116 = arith.constant 0 : index
    %c400_117 = arith.constant 400 : index
    %230 = vector.load %arg11[%c0_116, %c400_117] : memref<16x720xbf16, #tpu.memory_space<vmem>>, vector<16x32xbf16>
    tpu.vector_store %arg11[%c0_116, %c400_117], %229 {strides = array<i32>} : memref<16x720xbf16, #tpu.memory_space<vmem>>, vector<16x32xbf16>,
    %231 = vector.extract_strided_slice %224 {offsets = [0, 96], sizes = [16, 32], strides = [1, 1]} : vector<16x128xbf16> to vector<16x32xbf16>
    %c0_118 = arith.constant 0 : index
    %c580_119 = arith.constant 580 : index
    %232 = vector.load %arg11[%c0_118, %c580_119] : memref<16x720xbf16, #tpu.memory_space<vmem>>, vector<16x32xbf16>
    tpu.vector_store %arg11[%c0_118, %c580_119], %231 {strides = array<i32>} : memref<16x720xbf16, #tpu.memory_space<vmem>>, vector<16x32xbf16>,
    %233 = arith.truncf %223 : vector<16x128xf32> to vector<16x128xbf16>
    %cst_120 = arith.constant dense<0.000000e+00> : vector<16x128xf32>
    %234 = tpu.matmul %221, %233, %cst_120 {dimension_numbers = #tpu.dot_dimension_numbers<[1], [0], [0], [1], [0, 0, 1, 1], [], []>} : vector<16x16xbf16>, vector<16x128xbf16>, vector<16x128xf32> -> vector<16x128xf32>
    %cst_121 = arith.constant 2.000000e+00 : f32
    %235 = vector.broadcast %cst_121 : f32 to vector<16x128xf32>
    %236 = arith.mulf %235, %234 : vector<16x128xf32>
    %237 = arith.subf %236, %210 : vector<16x128xf32>
    %238 = arith.truncf %237 : vector<16x128xf32> to vector<16x128xbf16>
    %239 = vector.extract_strided_slice %238 {offsets = [0, 0], sizes = [16, 32], strides = [1, 1]} : vector<16x128xbf16> to vector<16x32xbf16>
    %c0_122 = arith.constant 0 : index
    %c76_123 = arith.constant 76 : index
    %240 = vector.load %arg11[%c0_122, %c76_123] : memref<16x720xbf16, #tpu.memory_space<vmem>>, vector<16x32xbf16>
    tpu.vector_store %arg11[%c0_122, %c76_123], %239 {strides = array<i32>} : memref<16x720xbf16, #tpu.memory_space<vmem>>, vector<16x32xbf16>,
    %241 = vector.extract_strided_slice %238 {offsets = [0, 32], sizes = [16, 32], strides = [1, 1]} : vector<16x128xbf16> to vector<16x32xbf16>
    %c0_124 = arith.constant 0 : index
    %c256_125 = arith.constant 256 : index
    %242 = vector.load %arg11[%c0_124, %c256_125] : memref<16x720xbf16, #tpu.memory_space<vmem>>, vector<16x32xbf16>
    tpu.vector_store %arg11[%c0_124, %c256_125], %241 {strides = array<i32>} : memref<16x720xbf16, #tpu.memory_space<vmem>>, vector<16x32xbf16>,
    %243 = vector.extract_strided_slice %238 {offsets = [0, 64], sizes = [16, 32], strides = [1, 1]} : vector<16x128xbf16> to vector<16x32xbf16>
    %c0_126 = arith.constant 0 : index
    %c436_127 = arith.constant 436 : index
    %244 = vector.load %arg11[%c0_126, %c436_127] : memref<16x720xbf16, #tpu.memory_space<vmem>>, vector<16x32xbf16>
    tpu.vector_store %arg11[%c0_126, %c436_127], %243 {strides = array<i32>} : memref<16x720xbf16, #tpu.memory_space<vmem>>, vector<16x32xbf16>,
    %245 = vector.extract_strided_slice %238 {offsets = [0, 96], sizes = [16, 32], strides = [1, 1]} : vector<16x128xbf16> to vector<16x32xbf16>
    %c0_128 = arith.constant 0 : index
    %c616_129 = arith.constant 616 : index
    %246 = vector.load %arg11[%c0_128, %c616_129] : memref<16x720xbf16, #tpu.memory_space<vmem>>, vector<16x32xbf16>
    tpu.vector_store %arg11[%c0_128, %c616_129], %245 {strides = array<i32>} : memref<16x720xbf16, #tpu.memory_space<vmem>>, vector<16x32xbf16>,
    %c1_130 = arith.constant 1 : index
    %c0_131 = arith.constant 0 : index
    %c0_132 = arith.constant 0 : index
    %247 = vector.load %arg3[%c1_130, %c0_131, %c0_132] : memref<2x16x16xbf16, #tpu.memory_space<vmem>>, vector<1x16x16xbf16>
    %248 = vector.shape_cast %247 : vector<1x16x16xbf16> to vector<16x16xbf16>
    %249 = arith.truncf %223 : vector<16x128xf32> to vector<16x128xbf16>
    %cst_133 = arith.constant dense<0.000000e+00> : vector<16x128xf32>
    %250 = tpu.matmul %248, %249, %cst_133 {dimension_numbers = #tpu.dot_dimension_numbers<[1], [0], [0], [1], [0, 0, 1, 1], [], []>} : vector<16x16xbf16>, vector<16x128xbf16>, vector<16x128xf32> -> vector<16x128xf32>
    %251 = arith.truncf %250 : vector<16x128xf32> to vector<16x128xbf16>
    %252 = vector.extract_strided_slice %251 {offsets = [0, 0], sizes = [16, 32], strides = [1, 1]} : vector<16x128xbf16> to vector<16x32xbf16>
    %c0_134 = arith.constant 0 : index
    %c112_135 = arith.constant 112 : index
    %253 = vector.load %arg11[%c0_134, %c112_135] : memref<16x720xbf16, #tpu.memory_space<vmem>>, vector<16x32xbf16>
    tpu.vector_store %arg11[%c0_134, %c112_135], %252 {strides = array<i32>} : memref<16x720xbf16, #tpu.memory_space<vmem>>, vector<16x32xbf16>,
    %254 = vector.extract_strided_slice %251 {offsets = [0, 32], sizes = [16, 32], strides = [1, 1]} : vector<16x128xbf16> to vector<16x32xbf16>
    %c0_136 = arith.constant 0 : index
    %c292_137 = arith.constant 292 : index
    %255 = vector.load %arg11[%c0_136, %c292_137] : memref<16x720xbf16, #tpu.memory_space<vmem>>, vector<16x32xbf16>
    tpu.vector_store %arg11[%c0_136, %c292_137], %254 {strides = array<i32>} : memref<16x720xbf16, #tpu.memory_space<vmem>>, vector<16x32xbf16>,
    %256 = vector.extract_strided_slice %251 {offsets = [0, 64], sizes = [16, 32], strides = [1, 1]} : vector<16x128xbf16> to vector<16x32xbf16>
    %c0_138 = arith.constant 0 : index
    %c472_139 = arith.constant 472 : index
    %257 = vector.load %arg11[%c0_138, %c472_139] : memref<16x720xbf16, #tpu.memory_space<vmem>>, vector<16x32xbf16>
    tpu.vector_store %arg11[%c0_138, %c472_139], %256 {strides = array<i32>} : memref<16x720xbf16, #tpu.memory_space<vmem>>, vector<16x32xbf16>,
    %258 = vector.extract_strided_slice %251 {offsets = [0, 96], sizes = [16, 32], strides = [1, 1]} : vector<16x128xbf16> to vector<16x32xbf16>
    %c0_140 = arith.constant 0 : index
    %c652_141 = arith.constant 652 : index
    %259 = vector.load %arg11[%c0_140, %c652_141] : memref<16x720xbf16, #tpu.memory_space<vmem>>, vector<16x32xbf16>
    tpu.vector_store %arg11[%c0_140, %c652_141], %258 {strides = array<i32>} : memref<16x720xbf16, #tpu.memory_space<vmem>>, vector<16x32xbf16>,
    %260 = arith.truncf %250 : vector<16x128xf32> to vector<16x128xbf16>
    %cst_142 = arith.constant dense<0.000000e+00> : vector<16x128xf32>
    %261 = tpu.matmul %248, %260, %cst_142 {dimension_numbers = #tpu.dot_dimension_numbers<[1], [0], [0], [1], [0, 0, 1, 1], [], []>} : vector<16x16xbf16>, vector<16x128xbf16>, vector<16x128xf32> -> vector<16x128xf32>
    %cst_143 = arith.constant 2.000000e+00 : f32
    %262 = vector.broadcast %cst_143 : f32 to vector<16x128xf32>
    %263 = arith.mulf %262, %261 : vector<16x128xf32>
    %264 = arith.subf %263, %223 : vector<16x128xf32>
    %265 = arith.truncf %264 : vector<16x128xf32> to vector<16x128xbf16>
    %266 = vector.extract_strided_slice %265 {offsets = [0, 0], sizes = [16, 32], strides = [1, 1]} : vector<16x128xbf16> to vector<16x32xbf16>
    %c0_144 = arith.constant 0 : index
    %c148_145 = arith.constant 148 : index
    %267 = vector.load %arg11[%c0_144, %c148_145] : memref<16x720xbf16, #tpu.memory_space<vmem>>, vector<16x32xbf16>
    tpu.vector_store %arg11[%c0_144, %c148_145], %266 {strides = array<i32>} : memref<16x720xbf16, #tpu.memory_space<vmem>>, vector<16x32xbf16>,
    %268 = vector.extract_strided_slice %265 {offsets = [0, 32], sizes = [16, 32], strides = [1, 1]} : vector<16x128xbf16> to vector<16x32xbf16>
    %c0_146 = arith.constant 0 : index
    %c328_147 = arith.constant 328 : index
    %269 = vector.load %arg11[%c0_146, %c328_147] : memref<16x720xbf16, #tpu.memory_space<vmem>>, vector<16x32xbf16>
    tpu.vector_store %arg11[%c0_146, %c328_147], %268 {strides = array<i32>} : memref<16x720xbf16, #tpu.memory_space<vmem>>, vector<16x32xbf16>,
    %270 = vector.extract_strided_slice %265 {offsets = [0, 64], sizes = [16, 32], strides = [1, 1]} : vector<16x128xbf16> to vector<16x32xbf16>
    %c0_148 = arith.constant 0 : index
    %c508_149 = arith.constant 508 : index
    %271 = vector.load %arg11[%c0_148, %c508_149] : memref<16x720xbf16, #tpu.memory_space<vmem>>, vector<16x32xbf16>
    tpu.vector_store %arg11[%c0_148, %c508_149], %270 {strides = array<i32>} : memref<16x720xbf16, #tpu.memory_space<vmem>>, vector<16x32xbf16>,
    %272 = vector.extract_strided_slice %265 {offsets = [0, 96], sizes = [16, 32], strides = [1, 1]} : vector<16x128xbf16> to vector<16x32xbf16>
    %c0_150 = arith.constant 0 : index
    %c688_151 = arith.constant 688 : index
    %273 = vector.load %arg11[%c0_150, %c688_151] : memref<16x720xbf16, #tpu.memory_space<vmem>>, vector<16x32xbf16>
    tpu.vector_store %arg11[%c0_150, %c688_151], %272 {strides = array<i32>} : memref<16x720xbf16, #tpu.memory_space<vmem>>, vector<16x32xbf16>,
    %c0_152 = arith.constant 0 : index
    %c0_153 = arith.constant 0 : index
    %274 = vector.load %arg6[%c0_152, %c0_153] : memref<180x32xbf16, #tpu.memory_space<vmem>>, vector<180x32xbf16>
    %c0_154 = arith.constant 0 : index
    %c0_155 = arith.constant 0 : index
    %275 = vector.load %arg9[%c0_154, %c0_155] : memref<1x32xf32, #tpu.memory_space<vmem>>, vector<1x32xf32>
    %c0_156 = arith.constant 0 : index
    %c0_157 = arith.constant 0 : index
    %276 = vector.load %arg11[%c0_156, %c0_157] : memref<16x720xbf16, #tpu.memory_space<vmem>>, vector<16x180xbf16>
    %cst_158 = arith.constant dense<0.000000e+00> : vector<16x32xf32>
    %277 = tpu.matmul %276, %274, %cst_158 {dimension_numbers = #tpu.dot_dimension_numbers<[1], [0], [0], [1], [0, 0, 1, 1], [], []>} : vector<16x180xbf16>, vector<180x32xbf16>, vector<16x32xf32> -> vector<16x32xf32>
    %278 = vector.broadcast %275 : vector<1x32xf32> to vector<16x32xf32>
    %279 = arith.addf %277, %278 : vector<16x32xf32>
    %280 = math.tanh %279 : vector<16x32xf32>
    %281 = vector.extract_strided_slice %3 {offsets = [0, 0], sizes = [16, 32], strides = [1, 1]} : vector<16x128xf32> to vector<16x32xf32>
    %282 = arith.mulf %150, %281 : vector<16x32xf32>
    %cst_159 = arith.constant 1.000000e+00 : f32
    %283 = vector.broadcast %cst_159 : f32 to vector<16x32xf32>
    %284 = arith.subf %283, %150 : vector<16x32xf32>
    %285 = arith.mulf %284, %280 : vector<16x32xf32>
    %286 = arith.addf %282, %285 : vector<16x32xf32>
    %c0_160 = arith.constant 0 : index
    %c180_161 = arith.constant 180 : index
    %287 = vector.load %arg11[%c0_160, %c180_161] : memref<16x720xbf16, #tpu.memory_space<vmem>>, vector<16x180xbf16>
    %cst_162 = arith.constant dense<0.000000e+00> : vector<16x32xf32>
    %288 = tpu.matmul %287, %274, %cst_162 {dimension_numbers = #tpu.dot_dimension_numbers<[1], [0], [0], [1], [0, 0, 1, 1], [], []>} : vector<16x180xbf16>, vector<180x32xbf16>, vector<16x32xf32> -> vector<16x32xf32>
    %289 = vector.broadcast %275 : vector<1x32xf32> to vector<16x32xf32>
    %290 = arith.addf %288, %289 : vector<16x32xf32>
    %291 = math.tanh %290 : vector<16x32xf32>
    %292 = vector.extract_strided_slice %3 {offsets = [0, 32], sizes = [16, 32], strides = [1, 1]} : vector<16x128xf32> to vector<16x32xf32>
    %293 = arith.mulf %169, %292 : vector<16x32xf32>
    %cst_163 = arith.constant 1.000000e+00 : f32
    %294 = vector.broadcast %cst_163 : f32 to vector<16x32xf32>
    %295 = arith.subf %294, %169 : vector<16x32xf32>
    %296 = arith.mulf %295, %291 : vector<16x32xf32>
    %297 = arith.addf %293, %296 : vector<16x32xf32>
    %c0_164 = arith.constant 0 : index
    %c360_165 = arith.constant 360 : index
    %298 = vector.load %arg11[%c0_164, %c360_165] : memref<16x720xbf16, #tpu.memory_space<vmem>>, vector<16x180xbf16>
    %cst_166 = arith.constant dense<0.000000e+00> : vector<16x32xf32>
    %299 = tpu.matmul %298, %274, %cst_166 {dimension_numbers = #tpu.dot_dimension_numbers<[1], [0], [0], [1], [0, 0, 1, 1], [], []>} : vector<16x180xbf16>, vector<180x32xbf16>, vector<16x32xf32> -> vector<16x32xf32>
    %300 = vector.broadcast %275 : vector<1x32xf32> to vector<16x32xf32>
    %301 = arith.addf %299, %300 : vector<16x32xf32>
    %302 = math.tanh %301 : vector<16x32xf32>
    %303 = vector.extract_strided_slice %3 {offsets = [0, 64], sizes = [16, 32], strides = [1, 1]} : vector<16x128xf32> to vector<16x32xf32>
    %304 = arith.mulf %188, %303 : vector<16x32xf32>
    %cst_167 = arith.constant 1.000000e+00 : f32
    %305 = vector.broadcast %cst_167 : f32 to vector<16x32xf32>
    %306 = arith.subf %305, %188 : vector<16x32xf32>
    %307 = arith.mulf %306, %302 : vector<16x32xf32>
    %308 = arith.addf %304, %307 : vector<16x32xf32>
    %c0_168 = arith.constant 0 : index
    %c540_169 = arith.constant 540 : index
    %309 = vector.load %arg11[%c0_168, %c540_169] : memref<16x720xbf16, #tpu.memory_space<vmem>>, vector<16x180xbf16>
    %cst_170 = arith.constant dense<0.000000e+00> : vector<16x32xf32>
    %310 = tpu.matmul %309, %274, %cst_170 {dimension_numbers = #tpu.dot_dimension_numbers<[1], [0], [0], [1], [0, 0, 1, 1], [], []>} : vector<16x180xbf16>, vector<180x32xbf16>, vector<16x32xf32> -> vector<16x32xf32>
    %311 = vector.broadcast %275 : vector<1x32xf32> to vector<16x32xf32>
    %312 = arith.addf %310, %311 : vector<16x32xf32>
    %313 = math.tanh %312 : vector<16x32xf32>
    %314 = vector.extract_strided_slice %3 {offsets = [0, 96], sizes = [16, 32], strides = [1, 1]} : vector<16x128xf32> to vector<16x32xf32>
    %315 = arith.mulf %207, %314 : vector<16x32xf32>
    %cst_171 = arith.constant 1.000000e+00 : f32
    %316 = vector.broadcast %cst_171 : f32 to vector<16x32xf32>
    %317 = arith.subf %316, %207 : vector<16x32xf32>
    %318 = arith.mulf %317, %313 : vector<16x32xf32>
    %319 = arith.addf %315, %318 : vector<16x32xf32>
    %320 = tpu.concatenate %286, %297, %308, %319 in 1 : vector<16x32xf32>, vector<16x32xf32>, vector<16x32xf32>, vector<16x32xf32> -> vector<16x128xf32>
    %321 = vector.shape_cast %320 : vector<16x128xf32> to vector<1x16x128xf32>
    %c0_172 = arith.constant 0 : index
    %c0_173 = arith.constant 0 : index
    %c0_174 = arith.constant 0 : index
    %322 = vector.load %arg10[%c0_172, %c0_173, %c0_174] : memref<1x16x128xf32, #tpu.memory_space<vmem>>, vector<1x16x128xf32>
    tpu.vector_store %arg10[%c0_172, %c0_173, %c0_174], %321 {strides = array<i32>} : memref<1x16x128xf32, #tpu.memory_space<vmem>>, vector<1x16x128xf32>,
    return
  }
  func.func @transform_0(%arg0: i32) -> (i32, i32, i32) {
    %c0_i32 = arith.constant 0 : i32
    %c0_i32_0 = arith.constant 0 : i32
    %c0_i32_1 = arith.constant 0 : i32
    return %arg0, %c0_i32, %c0_i32_0 : i32, i32, i32
  }
  func.func @transform_1(%arg0: i32) -> (i32, i32, i32) {
    %c0_i32 = arith.constant 0 : i32
    %c0_i32_0 = arith.constant 0 : i32
    %c0_i32_1 = arith.constant 0 : i32
    return %arg0, %c0_i32, %c0_i32_0 : i32, i32, i32
  }
  func.func @transform_2(%arg0: i32) -> (i32, i32, i32) {
    %c0_i32 = arith.constant 0 : i32
    %c0_i32_0 = arith.constant 0 : i32
    %c0_i32_1 = arith.constant 0 : i32
    %c0_i32_2 = arith.constant 0 : i32
    return %c0_i32, %c0_i32_0, %c0_i32_1 : i32, i32, i32
  }
  func.func @transform_3(%arg0: i32) -> (i32, i32) {
    %c0_i32 = arith.constant 0 : i32
    %c0_i32_0 = arith.constant 0 : i32
    %c0_i32_1 = arith.constant 0 : i32
    return %c0_i32, %c0_i32_0 : i32, i32
  }
  func.func @transform_4(%arg0: i32) -> (i32, i32) {
    %c0_i32 = arith.constant 0 : i32
    %c0_i32_0 = arith.constant 0 : i32
    %c0_i32_1 = arith.constant 0 : i32
    return %c0_i32, %c0_i32_0 : i32, i32
  }
  func.func @transform_5(%arg0: i32) -> (i32, i32) {
    %c0_i32 = arith.constant 0 : i32
    %c0_i32_0 = arith.constant 0 : i32
    %c0_i32_1 = arith.constant 0 : i32
    return %c0_i32, %c0_i32_0 : i32, i32
  }
  func.func @transform_6(%arg0: i32) -> (i32, i32) {
    %c0_i32 = arith.constant 0 : i32
    %c0_i32_0 = arith.constant 0 : i32
    %c0_i32_1 = arith.constant 0 : i32
    return %c0_i32, %c0_i32_0 : i32, i32
  }
  func.func @transform_7(%arg0: i32) -> (i32, i32) {
    %c0_i32 = arith.constant 0 : i32
    %c0_i32_0 = arith.constant 0 : i32
    %c0_i32_1 = arith.constant 0 : i32
    return %c0_i32, %c0_i32_0 : i32, i32
  }
  func.func @transform_8(%arg0: i32) -> (i32, i32) {
    %c0_i32 = arith.constant 0 : i32
    %c0_i32_0 = arith.constant 0 : i32
    %c0_i32_1 = arith.constant 0 : i32
    return %c0_i32, %c0_i32_0 : i32, i32
  }
  func.func @transform_9(%arg0: i32) -> (i32, i32, i32) {
    %c0_i32 = arith.constant 0 : i32
    %c0_i32_0 = arith.constant 0 : i32
    %c0_i32_1 = arith.constant 0 : i32
    return %arg0, %c0_i32, %c0_i32_0 : i32, i32, i32
  }
}

</mosaic_0001>

<bundles_post_ra>
// kernel: tpu_custom_call.1
= control target key start
LH: loop header
LB: loop body
LE: loop exit
PB: predicated region body
PF: predicated region fallthrough
CT: control target
= control target key end

     0   :  { %s4433_s0 = inlined_call_operand.vmem [shape: f32[2,16,16], index: 0, kind: input, shape index: {}]   ;;  %s4434_s1 = inlined_call_operand.vmem [shape: f32[2,16,128], index: 1, kind: input, shape index: {}]   ;;  %s4435_s2 = inlined_call_operand.vmem [shape: bf16[2,16,16], index: 2, kind: input, shape index: {}]   ;;  %s4436_s3 = inlined_call_operand.vmem [shape: bf16[180,32], index: 3, kind: input, shape index: {}]   ;;  %s4437_s4 = inlined_call_operand.vmem [shape: bf16[180,32], index: 4, kind: input, shape index: {}]   ;;  %s4438_s5 = inlined_call_operand.vmem [shape: bf16[180,32], index: 5, kind: input, shape index: {}]   ;;  %s4439_s6 = inlined_call_operand.vmem [shape: f32[1,32], index: 6, kind: input, shape index: {}]   ;;  %s4440_s7 = inlined_call_operand.vmem [shape: f32[1,32], index: 7, kind: input, shape index: {}]   ;;  %s4441_s8 = inlined_call_operand.vmem [shape: f32[1,32], index: 8, kind: input, shape index: {}]   ;;  %s4442_s9 = inlined_call_operand.hbm [shape: f32[2,16,128], index: 9, kind: output, shape index: {}]  }
   0x1   :  { %4497 = sst [smem:[#allocation7_spill]] %s4433_s0 }
   0x2   :  { %4498 = sst [smem:[#allocation8_spill]] %s4434_s1 }
   0x3   :  { %4499 = sst [smem:[#allocation9_spill]] %s4435_s2 }
   0x4   :  { %4500 = sst [smem:[#allocation10_spill]] %s4436_s3 }
   0x5   :  { %4501 = sst [smem:[#allocation11_spill]] %s4437_s4 }
   0x6   :  { %4502 = sst [smem:[#allocation12_spill]] %s4439_s6 }
   0x7   :  { %14 = vsyncpa [#allocation4], 0 }
   0x8   :  { %16 = vsyncpa [#allocation4 + $0x1], 0  ;;  %s3233_s30 = smov 0   ;;  %s3235_s10 = smov 0  }
   0x9   :  { %s3237_s11 = smov 0   ;;  %s3239_s12 = smov 0  }
   0xa LB: > { %s3254_s13 = sadd.s32 4294967295, %s3154_s12   ;;  %s2590_s14 = sadd.s32 4294967294, %s3154_s12   ;;  %s3154_s12 = sphi %s3239_s12, %s4589_s12   ;;  %s3150_s11 = sphi %s3237_s11, %s4588_s11   ;;  %s3146_s10 = sphi %s3235_s10, %s4587_s10   ;;  %s3142_s30 = sphi %s3233_s30, %s4586_s30  }
   0xb   : > { %s3258_s15 = sadd.s32 1, %s3154_s12   ;;  %s228_s16 = sadd.s32 1, %s3150_s11 }
   0xc   : > { %s225_s17 = ssub.s32 %s3154_s12, %s3258_s15  ;;  %p238_p0 = scmp.ne.s32.totalorder %s3150_s11, %s3146_s10 }
   0xd   : > { %p226_p1 = scmp.eq.s32.totalorder %s225_s17, 0  ;;  %p239_p2 = scmp.eq.s32.totalorder %s3254_s13, 1 }
   0xe   : > { %p244_p3 = scmp.ne.s32.totalorder %s3146_s10, %s3142_s30  ;;  %p245_p4 = scmp.eq.s32.totalorder %s2590_s14, 1 }
   0xf   : > { %s3269_s18 = scalar_select %p226_p1, %s3150_s11, %s228_s16  }
  0x10   : > { %p3271_p5 = por %p239_p2, %p238_p0  ;;  %p3275_p6 = por %p245_p4, %p244_p3 }
  0x11   : > { %4503 = sst [smem:[#allocation6_spill]] %s3269_s18  ;;  %p2593_p7 = scmp.ge.s32.totalorder %s3154_s12, 1 }
  0x12   : > { %p300_p8 = scmp.lt.s32.totalorder %s3154_s12, 3 }
  0x14   : > { %p301_p9 = pnand %p2593_p7, %p300_p8 }
  0x15   : > { %p341_p10 = scmp.lt.s32.totalorder (!%p301_p9), %s3254_s13, 1  ;;  %s4506_s0 = sld [smem:[#allocation7_spill]] (!%p301_p9) }
  0x16   : > { %304 = sbr.rel (%p301_p9) target bundleno = 2071 (0x817), region = 56  ;;  %s4507_s1 = sld [smem:[#allocation8_spill]] (!%p301_p9) }
  0x17   : > { %s4445_s29 = smov (!%p301_p9), 44   ;;  %s4465_s14 = smov (!%p301_p9), 96  }
  0x18   : > { %s4457_s16 = smov (!%p301_p9), 4   ;;  %s4508_s2 = sld [smem:[#allocation9_spill]] (!%p301_p9) }
  0x19   : > { %s3159_s24 = smov (!%p301_p9), 48   ;;  %s4451_s26 = smov (!%p301_p9), 16  }
  0x1a   : > { %s4463_s27 = smov (!%p301_p9), 64   ;;  %s4449_s17 = smov (!%p301_p9), 60  }
  0x1b   : > { %s342_s21 = scalar_select %p341_p10, %s3254_s13, 1  ;;  %vm4479_vm0 = vcmask 130048   ;;  %vm378_vm1 = vcmask 880448   ;;  %vm369_vm2 = vcmask 454048   ;;  %vm387_vm3 = vcmask 257248  }
  0x1c   : > { %s3166_s23 = smov 52   ;;  %vm358_vm4 = vcmask 27648   ;;  %vm429_vm5 = vcmask 322848   ;;  %vm438_vm6 = vcmask 749248   ;;  %vm447_vm7 = vcmask 126048   ;;  %s4514_s3 = sld [smem:[#allocation10_spill]] }
  0x1d   : > { %s2878_s22 = sshll.u32 %s342_s21, 4  ;;  %s4461_s21 = smov 40   ;;  %vm456_vm8 = vcmask 552448   ;;  %vm509_vm9 = vcmask 421248   ;;  %vm565_vm10 = vcmask 290048   ;;  %vm500_vm11 = vcmask 1044448  }
  0x1e   : > { %s345_s25 = scalar_lea.vmem %s4506_s0, %s2878_s22  ;;  %s3289_s28 = scalar_lea.vmem %s4507_s1, %s2878_s22  ;;  %v2880_v14 = vld [vmem:[%s4508_s2] sm:$0xff]  ;;  %v3384_v33 = vld [vmem:[%s4508_s2 + $0x8] sm:$0xff]  ;;  %vm491_vm12 = vcmask 618048   ;;  %vm556_vm13 = vcmask 913248   ;;  %vm4478_vm14 = vcmask 289824   ;;  %vm4476_vm15 = vcmask 585024  }
  0x1f   : > { %v3291_v0 = vld [vmem:[%s345_s25] sm:$0xff]  ;;  %v3293_v1 = vld [vmem:[%s345_s25 + $0x8] sm:$0xff]  ;;  %s4443_s25 = smov 24   ;;  %s4447_s22 = smov 80  }
  0x20   : > { %v3296_v2 = vld [vmem:[%s3289_s28] sm:$0xff]  ;;  %v3299_v3 = vld [vmem:[%s3289_s28 + $0x8] sm:$0xff]  ;;  %v3303_v4 = vpack.c.bf16 %v3291_v0, %v3291_v0  ;;  %v3307_v5 = vpack.c.bf16 %v3293_v1, %v3293_v1  ;;  %s4515_s4 = sld [smem:[#allocation11_spill]]  ;;  %s4528_s0 = smov 32  }
  0x21   : > { %v648_v6 = vpack.c.bf16 %v3296_v2, %v3296_v2  ;;  %v649_v7 = vpack.c.bf16 %v3299_v3, %v3299_v3  ;;  %v3325_v15 = vld [vmem:[%s4508_s2] sm:$0xff]  ;;  %v3402_v38 = vld [vmem:[%s4508_s2 + $0x8] sm:$0xff]  ;;  %s4529_s6 = sld [smem:[#allocation12_spill]]  ;;  %s4549_s1 = smov 8  }
  0x22   : > { %v397_v8 = vunpack.c.l.b16 %v3303_v4  ;;  %v398_v9 = vunpack.c.l.b16 %v3307_v5  ;;  %372 = vrot.lane.b32.xlu1 %v3303_v4, %s4465_s14  ;;  %359 = vst.msk [vmem:[#allocation2] sm:$0xf] %vm358_vm4, %v3303_v4  ;;  %s3112_s18 = scalar_lea.hbm %s4442_s9, 32 }
  0x23   : > { %v702_v10 = vunpack.c.l.b16 %v648_v6  ;;  %670 = vrot.lane.b32.xlu0 %v648_v6, %s4445_s29  ;;  %v703_v11 = vunpack.c.l.b16 %v649_v7  ;;  %652 = vrot.lane.b32.xlu2 %v648_v6, %s4457_s16  ;;  %360 = vst.msk [vmem:[#allocation2 + $0x18] sm:$0xf] %vm358_vm4, %v3307_v5  ;;  %vm4477_vm4 = vcmask 519424  }
  0x24   : > { %v399_v12 = vpack.c.b16 %v398_v9, %v397_v8 }
  0x25   : > { %v704_v13 = vpack.c.b16 %v703_v11, %v702_v10 }
  0x26   : > { %412 = vmatpush.bf16.msra.mxu3 %v399_v12 }
  0x27   : > { %716 = vmatpush.bf16.msra.mxu0 %v704_v13 }
  0x29   : > { %2603 = vmatmul.msk.bf16.vlgmr.msra.gmra.mxu3 %vm4479_vm0, %v2880_v14 }
  0x2a   : > { %2617 = vmatmul.msk.bf16.vlgmr.msra.gmra.mxu0 %vm4479_vm0, %v3325_v15  ;;  %374 = vrot.lane.b32.xlu1 %v3307_v5, %s4465_s14 }
  0x2b   : > { %363 = vrot.lane.b32.xlu0 %v3303_v4, %s3159_s24  ;;  %661 = vrot.lane.b32.xlu2 %v648_v6, %s4443_s25 }
  0x32   : > { %672 = vrot.lane.b32.xlu1 %v649_v7, %s4445_s29  ;;  %s3168_s29 = smov 84  }
  0x33   : > { %654 = vrot.lane.b32.xlu0 %v649_v7, %s4457_s16  ;;  %381 = vrot.lane.b32.xlu2 %v3303_v4, %s4451_s26 }
  0x3a   : > { %365 = vrot.lane.b32.xlu1 %v3307_v5, %s3159_s24  ;;  %s3167_s24 = smov 36  }
  0x3b   : > { %663 = vrot.lane.b32.xlu0 %v649_v7, %s4443_s25  ;;  %s3173_s25 = smov 28  }
  0x42   : > { %688 = vrot.lane.b32.xlu1 %v649_v7, %s4463_s27 }
  0x43   : > { %383 = vrot.lane.b32.xlu0 %v3307_v5, %s4451_s26  ;;  %s3175_s26 = smov 108  }
  0x4b   : > { %686 = vrot.lane.b32.xlu0 %v648_v6, %s4463_s27 }
  0x7d   : > { %v3376_v28 = vpop.permute.xlu2 %652 }
  0x85   : > { %v3391_v34 = vpop.permute.xlu2 %661 }
  0x8d   : > { %v382_v37 = vpop.permute.xlu2 %381 }
  0x8e   : > { %388 = vst.msk [vmem:[#allocation2 + $0x10] sm:$0xf] %vm387_vm3, %v382_v37 }
  0x94   : > { %v373_v31 = vpop.permute.xlu1 %372 }
  0x95   : > { %v3378_v29 = vpop.permute.xlu0 %670  ;;  %379 = vst.msk [vmem:[#allocation2 + $0x8] sm:$0xf] %vm378_vm1, %v373_v31 }
  0x9c   : > { %v375_v36 = vpop.permute.xlu1 %374 }
  0x9d   : > { %v364_v35 = vpop.permute.xlu0 %363  ;;  %380 = vst.msk [vmem:[#allocation2 + $0x20] sm:$0xf] %vm378_vm1, %v375_v36  ;;  %vm574_vm1 = vcmask 716448  }
  0x9e   : > { %370 = vst.msk [vmem:[#allocation2 + $0x4] sm:$0xf] %vm369_vm2, %v364_v35 }
  0xa4   : > { %v3411_v40 = vpop.permute.xlu1 %672 }
  0xa5   : > { %v3409_v39 = vpop.permute.xlu0 %654 }
  0xa7   : > { %v3344_v16 = vpop.f32.mrf.mxu0 }
  0xa8   : > { %v3348_v17 = vpack.c.bf16 %v3344_v16, %v3344_v16 }
  0xaa   : > { %736 = vrot.lane.b32.xlu2 %v3348_v17, %s4449_s17  ;;  %727 = vrot.lane.b32.xlu1 %v3348_v17, %s4461_s21  ;;  %v763_v23 = vunpack.c.l.b16 %v3348_v17 }
  0xac   : > { %v3354_v18 = vpop.f32.mrf.mxu3  ;;  %v366_v42 = vpop.permute.xlu1 %365 }
  0xad   : > { %v419_v19 = vpack.c.bf16 %v3354_v18, %v3354_v18  ;;  %v3413_v41 = vpop.permute.xlu0 %663  ;;  %371 = vst.msk [vmem:[#allocation2 + $0x1c] sm:$0xf] %vm369_vm2, %v366_v42  ;;  %vm518_vm2 = vcmask 847648  }
  0xaf   : > { %441 = vrot.lane.b32.xlu0 %v419_v19, %s4457_s16  ;;  %v3359_v20 = vpop.f32.mrf.mxu0  ;;  %v459_v26 = vunpack.c.l.b16 %v419_v19 }
  0xb0   : > { %v3366_v21 = vpack.c.bf16 %v3359_v20, %v3359_v20 }
  0xb2   : > { %745 = vrot.lane.b32.xlu2 %v3348_v17, %s4447_s22  ;;  %450 = vrot.lane.b32.xlu1 %v419_v19, %s3166_s23  ;;  %v764_v24 = vunpack.c.l.b16 %v3366_v21 }
  0xb4   : > { %v3368_v22 = vpop.f32.mrf.mxu3  ;;  %v765_v30 = vpack.c.b16 %v764_v24, %v763_v23  ;;  %v3423_v46 = vpop.permute.xlu1 %688 }
  0xb5   : > { %v420_v25 = vpack.c.bf16 %v3368_v22, %v3368_v22  ;;  %v384_v43 = vpop.permute.xlu0 %383 }
  0xb6   : > { %389 = vst.msk [vmem:[#allocation2 + $0x28] sm:$0xf] %vm387_vm3, %v384_v43  ;;  %vm583_vm3 = vcmask 93248  }
  0xb7   : > { %738 = vrot.lane.b32.xlu0 %v3366_v21, %s4449_s17  ;;  %v460_v27 = vunpack.c.l.b16 %v420_v25  ;;  %s3174_s17 = smov 124  }
  0xb9   : > { %v461_v32 = vpack.c.b16 %v460_v27, %v459_v26 }
  0xba   : > { %423 = vrot.lane.b32.xlu2 %v419_v19, %s3167_s24 }
  0xbb   : > { %470 = vmatpush.bf16.msra.mxu1 %v461_v32  ;;  %539 = vmatpush.bf16.msra.mxu2 %v461_v32 }
  0xbd   : > { %v3426_v48 = vpop.permute.xlu0 %686 }
  0xbe   : > { %2604 = vmatmul.msk.bf16.vlgmr.msra.gmra.mxu1 %vm4479_vm0, %v2880_v14  ;;  %2611 = vmatmul.msk.bf16.vlgmr.msra.gmra.mxu2 %vm4479_vm0, %v3384_v33 }
  0xbf   : > { %849 = vmatpush.bf16.msrb.mxu2 %v765_v30  ;;  %774 = vmatpush.bf16.msrb.mxu1 %v765_v30 }
  0xc0   : > { %747 = vrot.lane.b32.xlu0 %v3366_v21, %s4447_s22  ;;  %s3169_s22 = smov 120  }
  0xc2   : > { %432 = vrot.lane.b32.xlu2 %v419_v19, %s3168_s29 }
  0xc8   : > { %443 = vrot.lane.b32.xlu0 %v420_v25, %s4457_s16 }
  0xca   : > { %729 = vrot.lane.b32.xlu2 %v3366_v21, %s4461_s21 }
  0xce   : > { %2625 = vmatmul.msk.bf16.vlgmr.msrb.gmra.mxu2 %vm4479_vm0, %v3402_v38  ;;  %2618 = vmatmul.msk.bf16.vlgmr.msrb.gmra.mxu1 %vm4479_vm0, %v3325_v15 }
  0xd0   : > { %425 = vrot.lane.b32.xlu0 %v420_v25, %s3167_s24  ;;  %s3171_s24 = smov 88  }
  0xd2   : > { %452 = vrot.lane.b32.xlu2 %v420_v25, %s3166_s23  ;;  %s3170_s23 = smov 72  }
  0xd8   : > { %434 = vrot.lane.b32.xlu0 %v420_v25, %s3168_s29  ;;  %s4473_s29 = smov 76  }
 0x104   : > { %v3419_v44 = vpop.permute.xlu2 %736 }
 0x10c   : > { %v3421_v45 = vpop.permute.xlu2 %745 }
 0x114   : > { %v424_v47 = vpop.permute.xlu2 %423 }
 0x115   : > { %430 = vst.msk [vmem:[#allocation2] sm:$0xf] %vm429_vm5, %v424_v47 }
 0x11c   : > { %v3428_v49 = vpop.permute.xlu1 %727  ;;  %v433_v50 = vpop.permute.xlu2 %432 }
 0x11d   : > { %439 = vst.msk [vmem:[#allocation2 + $0x4] sm:$0xf] %vm438_vm6, %v433_v50 }
 0x121   : > { %v442_v51 = vpop.permute.xlu0 %441 }
 0x122   : > { %448 = vst.msk [vmem:[#allocation2 + $0xc] sm:$0xf] %vm447_vm7, %v442_v51 }
 0x124   : > { %v451_v52 = vpop.permute.xlu1 %450  ;;  %v3431_v53 = vpop.permute.xlu2 %729 }
 0x125   : > { %457 = vst.msk [vmem:[#allocation2 + $0x10] sm:$0xf] %vm456_vm8, %v451_v52 }
 0x129   : > { %v3433_v54 = vpop.permute.xlu0 %738 }
 0x12c   : > { %v453_v55 = vpop.permute.xlu2 %452 }
 0x12d   : > { %458 = vst.msk [vmem:[#allocation2 + $0x28] sm:$0xf] %vm456_vm8, %v453_v55  ;;  %vm681_vm8 = vcmask 1044320  }
 0x132   : > { %v3435_v56 = vpop.permute.xlu0 %747 }
 0x13a   : > { %v444_v57 = vpop.permute.xlu0 %443 }
 0x13b   : > { %449 = vst.msk [vmem:[#allocation2 + $0x24] sm:$0xf] %vm447_vm7, %v444_v57  ;;  %v472_v58 = vpop.f32.mrf.mxu1  ;;  %vm760_vm7 = vcmask 814624  }
 0x13c   : > { %v477_v59 = vmul.f32 2.0, %v472_v58 }
 0x13e   : > { %v479_v60 = vsub.f32 %v477_v59, %v3291_v0 }
 0x140   : > { %v481_v61 = vpack.c.bf16 %v479_v60, %v479_v60 }
 0x141   : > { %v541_v63 = vpop.f32.mrf.mxu2 }
 0x142   : > { %v426_v62 = vpop.permute.xlu0 %425  ;;  %494 = vrot.lane.b32.xlu0 %v481_v61, %s3169_s22  ;;  %485 = vrot.lane.b32.xlu1 %v481_v61, %s3170_s23  ;;  %v546_v4 = vpack.c.bf16 %v541_v63, %v541_v63 }
 0x143   : > { %431 = vst.msk [vmem:[#allocation2 + $0x18] sm:$0xf] %vm429_vm5, %v426_v62  ;;  %503 = vrot.lane.b32.xlu2 %v481_v61, %s4461_s21  ;;  %v474_v0 = vpop.f32.mrf.mxu1  ;;  %vm4475_vm5 = vcmask 880224  }
 0x144   : > { %v586_v8 = vunpack.c.l.b16 %v546_v4  ;;  %v478_v11 = vmul.f32 2.0, %v474_v0 }
 0x146   : > { %v480_v13 = vsub.f32 %v478_v11, %v3293_v1 }
 0x148   : > { %v482_v19 = vpack.c.bf16 %v480_v13, %v480_v13 }
 0x149   : > { %v543_v6 = vpop.f32.mrf.mxu2 }
 0x14a   : > { %v435_v5 = vpop.permute.xlu0 %434  ;;  %v547_v7 = vpack.c.bf16 %v543_v6, %v543_v6  ;;  %512 = vrot.lane.b32.xlu0 %v481_v61, %s3171_s24  ;;  %568 = vrot.lane.b32.xlu1 %v546_v4, %s4473_s29 }
 0x14b   : > { %440 = vst.msk [vmem:[#allocation2 + $0x1c] sm:$0xf] %vm438_vm6, %v435_v5  ;;  %559 = vrot.lane.b32.xlu2 %v546_v4, %s3173_s25  ;;  %v776_v14 = vpop.f32.mrf.mxu1  ;;  %vm627_vm6 = vcmask 585248  }
 0x14c   : > { %v587_v9 = vunpack.c.l.b16 %v547_v7  ;;  %v781_v30 = vmul.f32 2.0, %v776_v14  ;;  %v3584_v14 = vld [vmem:[%s4514_s3 + $0x28] sm:$0xff] }
 0x14e   : > { %v588_v10 = vpack.c.b16 %v587_v9, %v586_v8  ;;  %v783_v32 = vsub.f32 %v781_v30, %v3296_v2 }
 0x150   : > { %597 = vmatpush.bf16.msrb.mxu3 %v588_v10  ;;  %v3465_v35 = vpack.c.bf16 %v783_v32, %v783_v32  ;;  %v3630_v32 = vld [vmem:[%s4515_s4 + $0x10] sm:$0xff] }
 0x151   : > { %v851_v12 = vpop.f32.mrf.mxu2 }
 0x152   : > { %561 = vrot.lane.b32.xlu0 %v547_v7, %s3173_s25  ;;  %577 = vrot.lane.b32.xlu1 %v546_v4, %s3174_s17  ;;  %v3449_v15 = vpack.c.bf16 %v851_v12, %v851_v12  ;;  %s4510_s25 = smov 60  }
 0x153   : > { %550 = vrot.lane.b32.xlu2 %v546_v4, %s3175_s26  ;;  %2612 = vmatmul.msk.bf16.vlgmr.msrb.gmra.mxu3 %vm4479_vm0, %v3384_v33  ;;  %v778_v26 = vpop.f32.mrf.mxu1 }
 0x154   : > { %v903_v25 = vunpack.c.l.b16 %v3449_v15  ;;  %v782_v31 = vmul.f32 2.0, %v778_v26  ;;  %v3612_v26 = vld [vmem:[%s4514_s3 + $0x18] sm:$0xff] }
 0x156   : > { %v784_v33 = vsub.f32 %v782_v31, %v3299_v3  ;;  %v3625_v31 = vld [vmem:[%s4514_s3 + $0x10] sm:$0xff] }
 0x158   : > { %v3467_v36 = vpack.c.bf16 %v784_v33, %v784_v33  ;;  %v3637_v33 = vld [vmem:[%s4514_s3 + $0x8] sm:$0xff] }
 0x159   : > { %v853_v23 = vpop.f32.mrf.mxu2 }
 0x15a   : > { %v3451_v24 = vpack.c.bf16 %v853_v23, %v853_v23  ;;  %552 = vrot.lane.b32.xlu0 %v547_v7, %s3175_s26  ;;  %496 = vrot.lane.b32.xlu1 %v482_v19, %s3169_s22  ;;  %s4455_s26 = smov 8   ;;  %s4453_s22 = smov 112   ;;  %v3598_v23 = vld [vmem:[%s4514_s3 + $0x20] sm:$0xff] }
 0x15b   : > { %505 = vrot.lane.b32.xlu2 %v482_v19, %s4461_s21 }
 0x15c   : > { %v904_v1 = vunpack.c.l.b16 %v3451_v24 }
 0x15e   : > { %v905_v27 = vpack.c.b16 %v904_v1, %v903_v25 }
 0x160   : > { %914 = vmatpush.bf16.msra.mxu3 %v905_v27  ;;  %v3617_v27 = vld [vmem:[%s4515_s4 + $0x18] sm:$0xff] }
 0x162   : > { %514 = vrot.lane.b32.xlu1 %v482_v19, %s3171_s24  ;;  %876 = vrot.lane.b32.xlu0 %v3449_v15, %s4457_s16  ;;  %s4471_s24 = smov 100  }
 0x163   : > { %487 = vrot.lane.b32.xlu2 %v482_v19, %s3170_s23  ;;  %2626 = vmatmul.msk.bf16.vlgmr.msra.gmra.mxu3 %vm4479_vm0, %v3402_v38  ;;  %s4459_s23 = smov 32   ;;  %vm645_vm0 = vcmask 388448  }
 0x16a   : > { %798 = vrot.lane.b32.xlu1 %v3465_v35, %s4465_s14  ;;  %818 = vrot.lane.b32.xlu0 %v3467_v36, %s4455_s26 }
 0x16b   : > { %570 = vrot.lane.b32.xlu2 %v547_v7, %s4473_s29 }
 0x172   : > { %789 = vrot.lane.b32.xlu1 %v3465_v35, %s4473_s29 }
 0x173   : > { %579 = vrot.lane.b32.xlu2 %v547_v7, %s3174_s17  ;;  %s4509_s17 = smov 16  }
 0x17a   : > { %860 = vrot.lane.b32.xlu1 %v3449_v15, %s4453_s22 }
 0x17b   : > { %816 = vrot.lane.b32.xlu2 %v3465_v35, %s4455_s26  ;;  %s4511_s26 = smov 44  }
 0x182   : > { %878 = vrot.lane.b32.xlu1 %v3451_v24, %s4457_s16  ;;  %s4512_s16 = smov 24  }
 0x183   : > { %800 = vrot.lane.b32.xlu2 %v3467_v36, %s4465_s14  ;;  %s4522_s14 = smov 76  }
 0x18b   : > { %791 = vrot.lane.b32.xlu2 %v3467_v36, %s4473_s29  ;;  %s4550_s29 = smov 112  }
 0x193   : > { %862 = vrot.lane.b32.xlu2 %v3451_v24, %s4453_s22 }
 0x19d   : > { %v504_v2 = vpop.permute.xlu2 %503 }
 0x19e   : > { %510 = vst.msk [vmem:[#allocation2 + $0xc] sm:$0xf] %vm509_vm9, %v504_v2 }
 0x1a5   : > { %v560_v3 = vpop.permute.xlu2 %559 }
 0x1a6   : > { %566 = vst.msk [vmem:[#allocation2 + $0x8] sm:$0xf] %vm565_vm10, %v560_v3 }
 0x1ad   : > { %v551_v37 = vpop.permute.xlu2 %550 }
 0x1b4   : > { %v495_v38 = vpop.permute.xlu0 %494  ;;  %v486_v42 = vpop.permute.xlu1 %485 }
 0x1b5   : > { %501 = vst.msk [vmem:[#allocation2 + $0x4] sm:$0xf] %vm500_vm11, %v495_v38  ;;  %v506_v43 = vpop.permute.xlu2 %505  ;;  %v3659_v38 = vld [vmem:[%s4515_s4] sm:$0xff] }
 0x1b6   : > { %492 = vst.msk [vmem:[#allocation2] sm:$0xf] %vm491_vm12, %v486_v42  ;;  %v674_v42 = vrot.slane %v3378_v29, 4 }
 0x1b7   : > { %557 = vst.msk [vmem:[#allocation2] sm:$0xf] %vm556_vm13, %v551_v37  ;;  %v3654_v37 = vld [vmem:[%s4514_s3] sm:$0xff] }
 0x1b8   : > { %511 = vst.msk [vmem:[#allocation2 + $0x24] sm:$0xf] %vm509_vm9, %v506_v43  ;;  %vm682_vm9 = vcmask 97284  }
 0x1b9   : > { %659 = vst.msk [vmem:[#allocation2] sm:$0xf] %vm4478_vm14, %v3376_v28 }
 0x1ba   : > { %734 = vst.msk [vmem:[#allocation2] sm:$0xf] %vm4476_vm15, %v3428_v49 }
 0x1bc   : > { %v513_v47 = vpop.permute.xlu0 %512  ;;  %v569_v50 = vpop.permute.xlu1 %568 }
 0x1bd   : > { %519 = vst.msk [vmem:[#allocation2 + $0x10] sm:$0xf] %vm518_vm2, %v513_v47  ;;  %v488_v51 = vpop.permute.xlu2 %487 }
 0x1be   : > { %575 = vst.msk [vmem:[#allocation2 + $0xc] sm:$0xf] %vm574_vm1, %v569_v50 }
 0x1bf   : > { %493 = vst.msk [vmem:[#allocation2 + $0x18] sm:$0xf] %vm491_vm12, %v488_v51  ;;  %vm4480_vm12 = vcmask 359424  }
 0x1c0   : > { %693 = vst.msk [vmem:[#allocation2 + $0x10] sm:$0xf] %vm4477_vm4, %v3426_v48  ;;  %v677_v51 = vsel %vm4480_vm12, %v674_v42, %v3378_v29 }
 0x1c4   : > { %v562_v52 = vpop.permute.xlu0 %561  ;;  %v578_v55 = vpop.permute.xlu1 %577 }
 0x1c5   : > { %567 = vst.msk [vmem:[#allocation2 + $0x20] sm:$0xf] %vm565_vm10, %v562_v52  ;;  %v571_v57 = vpop.permute.xlu2 %570  ;;  %vm636_vm10 = vcmask 1011648  }
 0x1c6   : > { %584 = vst.msk [vmem:[#allocation2 + $0x14] sm:$0xf] %vm583_vm3, %v578_v55 }
 0x1c7   : > { %576 = vst.msk [vmem:[#allocation2 + $0x24] sm:$0xf] %vm574_vm1, %v571_v57  ;;  %vm4481_vm1 = vcmask 388224  }
 0x1cc   : > { %v553_v28 = vpop.permute.xlu0 %552  ;;  %v497_v49 = vpop.permute.xlu1 %496 }
 0x1cd   : > { %558 = vst.msk [vmem:[#allocation2 + $0x18] sm:$0xf] %vm556_vm13, %v553_v28  ;;  %v580_v58 = vpop.permute.xlu2 %579  ;;  %vm3664_vm13 = vmor %vm682_vm9, %vm681_vm8  ;;  %vm618_vm8 = vcmask 158848   ;;  %vm871_vm9 = vcmask 1044352  }
 0x1ce   : > { %660 = vst.msk [vmem:[#allocation2 + $0x18] sm:$0xf] %vm4478_vm14, %v3409_v39 }
 0x1cf   : > { %502 = vst.msk [vmem:[#allocation2 + $0x1c] sm:$0xf] %vm500_vm11, %v497_v49 }
 0x1d0   : > { %585 = vst.msk [vmem:[#allocation2 + $0x2c] sm:$0xf] %vm583_vm3, %v580_v58  ;;  %vm4486_vm3 = vcmask 552224   ;;  %v993_v58 = vld [vmem:[%s4514_s3 + $0x58] sm:$0x3] }
 0x1d1   : > { %735 = vst.msk [vmem:[#allocation2 + $0x18] sm:$0xf] %vm4476_vm15, %v3431_v53  ;;  %vm4485_vm15 = vcmask 916480  }
 0x1d4   : > { %v515_v59 = vpop.permute.xlu1 %514  ;;  %v877_v1 = vpop.permute.xlu0 %876 }
 0x1d5   : > { %520 = vst.msk [vmem:[#allocation2 + $0x28] sm:$0xf] %vm518_vm2, %v515_v59  ;;  %v3511_v60 = vpop.permute.xlu2 %816  ;;  %vm4487_vm2 = vcmask 257024  }
 0x1d6   : > { %v599_v61 = vpop.f32.mrf.mxu3  ;;  %694 = vst.msk [vmem:[#allocation2 + $0x28] sm:$0xf] %vm4477_vm4, %v3423_v46  ;;  %vm742_vm4 = vcmask 1011424  }
 0x1d7   : > { %v604_v39 = vmul.f32 2.0, %v599_v61  ;;  %v1078_v61 = vunpack.c.l.b16 %v993_v58 }
 0x1d9   : > { %v606_v62 = vsub.f32 %v604_v39, %v3354_v18  ;;  %v1016_v39 = vld [vmem:[%s4515_s4 + $0x58] sm:$0x3] }
 0x1db   : > { %v608_v63 = vpack.c.bf16 %v606_v62, %v606_v62  ;;  %v1090_v62 = vpack.c.b16 %v1078_v61, %v1078_v61 }
 0x1dc   : > { %v3516_v4 = vpop.permute.xlu1 %798  ;;  %v3646_v2 = vpop.permute.xlu0 %818 }
 0x1dd   : > { %v3518_v53 = vpop.permute.xlu2 %800  ;;  %630 = vrot.lane.b32.xlu0 %v608_v63, %s4453_s22  ;;  %621 = vrot.lane.b32.xlu1 %v608_v63, %s4463_s27 }
 0x1de   : > { %v601_v48 = vpop.f32.mrf.mxu3 }
 0x1df   : > { %v605_v5 = vmul.f32 2.0, %v601_v48 }
 0x1e1   : > { %v607_v6 = vsub.f32 %v605_v5, %v3368_v22 }
 0x1e3   : > { %v609_v7 = vpack.c.bf16 %v607_v6, %v607_v6  ;;  %v820_v6 = vrot.slane %v3511_v60, 4 }
 0x1e4   : > { %v790_v0 = vpop.permute.xlu1 %789 }
 0x1e5   : > { %796 = vst.msk [vmem:[#allocation2] sm:$0xf] %vm4475_vm5, %v790_v0  ;;  %v792_v46 = vpop.permute.xlu2 %791  ;;  %612 = vrot.lane.b32.xlu0 %v608_v63, %s4509_s17  ;;  %632 = vrot.lane.b32.xlu1 %v609_v7, %s4453_s22  ;;  %s4467_s22 = smov 20   ;;  %v3735_v0 = vld [vmem:[%s4515_s4 + $0x50] sm:$0xff] }
 0x1e6   : > { %797 = vst.msk [vmem:[#allocation2 + $0x18] sm:$0xf] %vm4475_vm5, %v792_v46  ;;  %623 = vrot.lane.b32.xlu2 %v609_v7, %s4463_s27  ;;  %v916_v18 = vpop.f32.mrf.mxu3  ;;  %vm872_vm5 = vcmask 130052   ;;  %s4525_s27 = smov 100  }
 0x1e7   : > { %v921_v8 = vmul.f32 2.0, %v916_v18  ;;  %vm3686_vm14 = vmor %vm872_vm5, %vm871_vm9  ;;  %vm4496_vm5 = vcmask 683424   ;;  %vm4482_vm9 = vcmask 1041408  }
 0x1e8   : > { %v3716_v5 = vsel %vm4482_vm9, %v1090_v62, 0 }
 0x1e9   : > { %v923_v9 = vsub.f32 %v921_v8, %v3344_v16  ;;  %v3560_v16 = vld [vmem:[%s4514_s3 + $0x38] sm:$0xff]  ;;  %1128 = vmatpush.bf16.msra.mxu1 %v3716_v5 }
 0x1ea   : > { %1110 = vmatpush.bf16.msrb.mxu0 %v3560_v16 }
 0x1eb   : > { %v925_v12 = vpack.c.bf16 %v923_v9, %v923_v9 }
 0x1ec   : > { %v3605_v25 = vpop.permute.xlu1 %860 }
 0x1ed   : > { %639 = vrot.lane.b32.xlu0 %v608_v63, %s4459_s23  ;;  %614 = vrot.lane.b32.xlu1 %v609_v7, %s4509_s17  ;;  %s4469_s17 = smov 116   ;;  %v3591_v19 = vpop.permute.xlu2 %862  ;;  %v864_v29 = vrot.slane %v3605_v25, 4 }
 0x1ee   : > { %754 = vrot.lane.b32.xlu2 %v3348_v17, %s4471_s24  ;;  %v918_v22 = vpop.f32.mrf.mxu3  ;;  %v3565_v17 = vld [vmem:[%s4515_s4 + $0x38] sm:$0xff] }
 0x1ef   : > { %v922_v10 = vmul.f32 2.0, %v918_v22  ;;  %1251 = vmatpush.bf16.msra.mxu2 %v3565_v17  ;;  %v867_v49 = vsel %vm4485_vm15, %v864_v29, %v3605_v25 }
 0x1f1   : > { %v924_v11 = vsub.f32 %v922_v10, %v3359_v20  ;;  %v3572_v20 = vld [vmem:[%s4514_s3 + $0x30] sm:$0xff]  ;;  %v3778_v10 = vld [vmem:[%s4514_s3 + $0x40] sm:$0xff] }
 0x1f2   : > { %1111 = vmatpush.bf16.msrb.mxu0 %v3572_v20 }
 0x1f3   : > { %v926_v13 = vpack.c.bf16 %v924_v11, %v924_v11 }
 0x1f5   : > { %938 = vrot.lane.b32.xlu0 %v925_v12, %s4461_s21  ;;  %641 = vrot.lane.b32.xlu1 %v609_v7, %s4459_s23  ;;  %s4513_s23 = smov 80   ;;  %v3728_v7 = vld [vmem:[%s4514_s3 + $0x50] sm:$0xff] }
 0x1f6   : > { %949 = vrot.lane.b32.xlu2 %v926_v13, %s4510_s25  ;;  %1112 = vmatpush.bf16.msrb.mxu0 %v3584_v14 }
 0x1f7   : > { %1129 = vmatpush.bf16.msra.mxu1 %v3728_v7 }
 0x1fa   : > { %1113 = vmatpush.bf16.msrb.mxu0 %v3598_v23 }
 0x1fd   : > { %929 = vrot.lane.b32.xlu0 %v925_v12, %s4467_s22  ;;  %947 = vrot.lane.b32.xlu1 %v925_v12, %s4510_s25 }
 0x1fe   : > { %809 = vrot.lane.b32.xlu2 %v3467_v36, %s4469_s17  ;;  %1114 = vmatpush.bf16.msrb.mxu0 %v3612_v26  ;;  %v3644_v36 = vpop.permute.xlu1 %878 }
 0x202   : > { %1115 = vmatpush.bf16.msrb.mxu0 %v3625_v31 }
 0x205   : > { %756 = vrot.lane.b32.xlu0 %v3366_v21, %s4471_s24  ;;  %940 = vrot.lane.b32.xlu1 %v926_v13, %s4461_s21  ;;  %v3577_v21 = vld [vmem:[%s4515_s4 + $0x30] sm:$0xff]  ;;  %s4526_s21 = smov 96   ;;  %s4534_s24 = smov 4  }
 0x206   : > { %894 = vrot.lane.b32.xlu2 %v3449_v15, %s4511_s26  ;;  %1252 = vmatpush.bf16.msra.mxu2 %v3577_v21 }
 0x207   : > { %1116 = vmatpush.bf16.msrb.mxu0 %v3637_v33 }
 0x20b   : > { %1117 = vmatpush.bf16.msrb.mxu0 %v3654_v37 }
 0x20d   : > { %885 = vrot.lane.b32.xlu0 %v3449_v15, %s4512_s16  ;;  %931 = vrot.lane.b32.xlu1 %v926_v13, %s4467_s22  ;;  %v3589_v15 = vld [vmem:[%s4515_s4 + $0x28] sm:$0xff]  ;;  %s4527_s22 = smov 64  }
 0x20e   : > { %964 = vrot.lane.b32.xlu2 %v926_v13, %s4513_s23  ;;  %1253 = vmatpush.bf16.msra.mxu2 %v3589_v15 }
 0x20f   : > { %1405 = vmatpush.bf16.msra.mxu0 %v3565_v17 }
 0x213   : > { %1406 = vmatpush.bf16.msra.mxu0 %v3577_v21 }
 0x215   : > { %896 = vrot.lane.b32.xlu0 %v3451_v24, %s4511_s26  ;;  %807 = vrot.lane.b32.xlu1 %v3465_v35, %s4469_s17  ;;  %v3642_v35 = vld [vmem:[%s4515_s4 + $0x8] sm:$0xff]  ;;  %s4542_s17 = smov 40  }
 0x217   : > { %1407 = vmatpush.bf16.msra.mxu0 %v3589_v15 }
 0x21d   : > { %887 = vrot.lane.b32.xlu1 %v3451_v24, %s4512_s16  ;;  %v3603_v24 = vld [vmem:[%s4515_s4 + $0x20] sm:$0xff] }
 0x21e   : > { %1254 = vmatpush.bf16.msra.mxu2 %v3603_v24  ;;  %1408 = vmatpush.bf16.msra.mxu0 %v3603_v24 }
 0x222   : > { %1255 = vmatpush.bf16.msra.mxu2 %v3617_v27  ;;  %1409 = vmatpush.bf16.msra.mxu0 %v3617_v27 }
 0x225   : > { %962 = vrot.lane.b32.xlu1 %v925_v12, %s4513_s23 }
 0x226   : > { %1256 = vmatpush.bf16.msra.mxu2 %v3630_v32  ;;  %1410 = vmatpush.bf16.msra.mxu0 %v3630_v32 }
 0x22a   : > { %1257 = vmatpush.bf16.msra.mxu2 %v3642_v35  ;;  %1411 = vmatpush.bf16.msra.mxu0 %v3642_v35 }
 0x22e   : > { %1258 = vmatpush.bf16.msra.mxu2 %v3659_v38  ;;  %1412 = vmatpush.bf16.msra.mxu0 %v3659_v38 }
 0x240   : > { %v624_v30 = vpop.permute.xlu2 %623 }
 0x241   : > { %629 = vst.msk [vmem:[#allocation2 + $0x20] sm:$0xf] %vm627_vm6, %v624_v30 }
 0x248   : > { %v755_v3 = vpop.permute.xlu2 %754 }
 0x249   : > { %761 = vst.msk [vmem:[#allocation2 + $0x10] sm:$0xf] %vm760_vm7, %v755_v3 }
 0x24f   : > { %v631_v43 = vpop.permute.xlu0 %630  ;;  %v622_v50 = vpop.permute.xlu1 %621 }
 0x250   : > { %637 = vst.msk [vmem:[#allocation2 + $0xc] sm:$0xf] %vm636_vm10, %v631_v43  ;;  %v3673_v52 = vpop.permute.xlu2 %949 }
 0x251   : > { %628 = vst.msk [vmem:[#allocation2 + $0x8] sm:$0xf] %vm627_vm6, %v622_v50  ;;  %vm667_vm6 = vcmask 716224  }
 0x252   : > { %684 = vst.msk [vmem:[#allocation2 + $0x8] sm:$0xff] %vm3664_vm13, %v677_v51 }
 0x253   : > { %752 = vst.msk [vmem:[#allocation2 + $0xc] sm:$0xf] %vm4481_vm1, %v3421_v45  ;;  %v675_v45 = vrot.slane %v3411_v40, 4 }
 0x254   : > { %805 = vst.msk [vmem:[#allocation2 + $0x8] sm:$0xf] %vm4487_vm2, %v3516_v4  ;;  %v865_v4 = vrot.slane %v3591_v19, 4 }
 0x255   : > { %883 = vst.msk [vmem:[#allocation2 + $0x8] sm:$0xf] %vm4486_vm3, %v877_v1  ;;  %v821_v1 = vrot.slane %v3646_v2, 4 }
 0x256   : > { %v868_v18 = vsel %vm4485_vm15, %v865_v4, %v3591_v19  ;;  %vm4494_vm15 = vcmask 978624  }
 0x257   : > { %v613_v55 = vpop.permute.xlu0 %612  ;;  %v633_v57 = vpop.permute.xlu1 %632 }
 0x258   : > { %619 = vst.msk [vmem:[#allocation2 + $0x4] sm:$0xf] %vm618_vm8, %v613_v55  ;;  %v810_v59 = vpop.permute.xlu2 %809 }
 0x259   : > { %668 = vst.msk [vmem:[#allocation2 + $0x4] sm:$0xf] %vm667_vm6, %v3391_v34  ;;  %v678_v34 = vsel %vm4480_vm12, %v675_v45, %v3411_v40  ;;  %vm827_vm12 = vcmask 1044288  }
 0x25a   : > { %743 = vst.msk [vmem:[#allocation2 + $0x4] sm:$0xf] %vm742_vm4, %v3419_v44  ;;  %v1224_v44 = vunpack.c.l.b16 %v1016_v39 }
 0x25b   : > { %874 = vst.msk [vmem:[#allocation2] sm:$0xff] %vm3686_vm14, %v867_v49 }
 0x25c   : > { %638 = vst.msk [vmem:[#allocation2 + $0x24] sm:$0xf] %vm636_vm10, %v633_v57  ;;  %v1236_v63 = vpack.c.b16 %v1224_v44, %v1224_v44  ;;  %vm828_vm10 = vcmask 64516  }
 0x25d   : > { %685 = vst.msk [vmem:[#allocation2 + $0x20] sm:$0xff] %vm3664_vm13, %v678_v34 }
 0x25e   : > { %753 = vst.msk [vmem:[#allocation2 + $0x24] sm:$0xf] %vm4481_vm1, %v3435_v56  ;;  %v3723_v56 = vsel %vm4482_vm9, %v1236_v63, 0  ;;  %vm822_vm1 = vcmask 64512   ;;  %vm3741_vm9 = vmor %vm828_vm10, %vm827_vm12  ;;  %vm4483_vm12 = vcmask 847424   ;;  %vm958_vm10 = vcmask 228356  }
 0x25f   : > { %815 = vst.msk [vmem:[#allocation2 + $0x24] sm:$0xf] %vm4496_vm5, %v810_v59  ;;  %v640_v48 = vpop.permute.xlu0 %639  ;;  %v615_v40 = vpop.permute.xlu1 %614  ;;  %1269 = vmatpush.bf16.msrb.mxu3 %v3723_v56  ;;  %1423 = vmatpush.bf16.msrb.mxu2 %v3723_v56  ;;  %v823_v8 = vsel %vm822_vm1, %v820_v6, %v3511_v60  ;;  %v3766_v60 = vld [vmem:[%s4515_s4 + $0x48] sm:$0xff]  ;;  %v824_v3 = vsel %vm822_vm1, %v821_v1, %v3646_v2 }
 0x260   : > { %646 = vst.msk [vmem:[#allocation2 + $0x14] sm:$0xf] %vm645_vm0, %v640_v48 }
 0x261   : > { %620 = vst.msk [vmem:[#allocation2 + $0x1c] sm:$0xf] %vm618_vm8, %v615_v40  ;;  %vm4493_vm8 = vcmask 355424   ;;  %v952_v40 = vrot.slane %v3673_v52, 4 }
 0x262   : > { %669 = vst.msk [vmem:[#allocation2 + $0x1c] sm:$0xf] %vm667_vm6, %v3413_v41  ;;  %v3758_v41 = vld [vmem:[%s4514_s3 + $0x48] sm:$0xff]  ;;  %v2629_v11 = vld [vmem:[#allocation2] sm:$0xf]  ;;  %s4562_s3 = smov 20  }
 0x263   : > { %744 = vst.msk [vmem:[#allocation2 + $0x1c] sm:$0xf] %vm742_vm4, %v3433_v54  ;;  %v895_v54 = vpop.permute.xlu2 %894  ;;  %1270 = vmatpush.bf16.msrb.mxu3 %v3735_v0  ;;  %1424 = vmatpush.bf16.msrb.mxu2 %v3735_v0 }
 0x264   : > { %875 = vst.msk [vmem:[#allocation2 + $0x18] sm:$0xff] %vm3686_vm14, %v868_v18  ;;  %1130 = vmatpush.bf16.msra.mxu1 %v3758_v41 }
 0x265   : > { %830 = vst.msk [vmem:[#allocation2 + $0x10] sm:$0xff] %vm3741_vm9, %v823_v8 }
 0x266   : > { %901 = vst.msk [vmem:[#allocation2 + $0x14] sm:$0xf] %vm4493_vm8, %v895_v54 }
 0x267   : > { %v939_v22 = vpop.permute.xlu0 %938  ;;  %806 = vst.msk [vmem:[#allocation2 + $0x20] sm:$0xf] %vm4487_vm2, %v3518_v53  ;;  %v642_v9 = vpop.permute.xlu1 %641  ;;  %1271 = vmatpush.bf16.msrb.mxu3 %v3766_v60  ;;  %v3785_v53 = vld [vmem:[%s4515_s4 + $0x40] sm:$0xff]  ;;  %1425 = vmatpush.bf16.msrb.mxu2 %v3766_v60  ;;  %vm4495_vm2 = vcmask 490496  }
 0x268   : > { %945 = vst.msk [vmem:[#allocation2 + $0x8] sm:$0xf] %vm4483_vm12, %v939_v22  ;;  %1131 = vmatpush.bf16.msra.mxu1 %v3778_v10  ;;  %v955_v18 = vsel %vm4495_vm2, %v952_v40, %v3673_v52 }
 0x269   : > { %647 = vst.msk [vmem:[#allocation2 + $0x2c] sm:$0xf] %vm645_vm0, %v642_v9  ;;  %vm4484_vm0 = vcmask 421024  }
 0x26a   : > { %884 = vst.msk [vmem:[#allocation2 + $0x20] sm:$0xf] %vm4486_vm3, %v3644_v36  ;;  %vm3832_vm3 = vmor %vm958_vm10, %vm500_vm11  ;;  %vm4490_vm11 = vcmask 621568   ;;  %vm4488_vm10 = vcmask 195584  }
 0x26b   : > { %v2907_v12 = vld [vmem:[#allocation2 + $0x14] sm:$0xf0]  ;;  %1272 = vmatpush.bf16.msrb.mxu3 %v3785_v53  ;;  %1426 = vmatpush.bf16.msrb.mxu2 %v3785_v53  ;;  %v965_v44 = vpop.permute.xlu2 %964 }
 0x26c   : > { %v2630_v13 = vor.u32 %v2907_v12, %v2629_v11  ;;  %1339 = vmatpush.bf16.msrb.mxu1 %v3560_v16 }
 0x26e   : > { %1118 = vmatmul.bf16.vlgmr.msrb.gmra.mxu0 %v2630_v13  ;;  %1259 = vmatmul.bf16.vlgmr.msra.gmra.mxu2 %v2630_v13 }
 0x26f   : > { %v930_v19 = vpop.permute.xlu0 %929  ;;  %v3794_v25 = vpop.permute.xlu1 %947  ;;  %1357 = vmatpush.bf16.msra.mxu3 %v3716_v5  ;;  %1577 = vmatpush.bf16.msra.mxu2 %v3565_v17  ;;  %v2745_v43 = vld [vmem:[#allocation2 + $0x8] sm:$0xf] }
 0x270   : > { %936 = vst.msk [vmem:[#allocation2 + $0x4] sm:$0xf] %vm4484_vm0, %v930_v19  ;;  %1595 = vmatpush.bf16.msrb.mxu0 %v3723_v56  ;;  %1340 = vmatpush.bf16.msrb.mxu1 %v3572_v20  ;;  %v2908_v51 = vld [vmem:[#allocation2 + $0x8] sm:$0xf]  ;;  %v951_v45 = vrot.slane %v3794_v25, 4 }
 0x272   : > { %v954_v48 = vsel %vm4495_vm2, %v951_v45, %v3794_v25 }
 0x273   : > { %1358 = vmatpush.bf16.msra.mxu3 %v3728_v7  ;;  %1578 = vmatpush.bf16.msra.mxu2 %v3577_v21 }
 0x274   : > { %1596 = vmatpush.bf16.msrb.mxu0 %v3735_v0  ;;  %1341 = vmatpush.bf16.msrb.mxu1 %v3584_v14 }
 0x277   : > { %v757_v30 = vpop.permute.xlu0 %756  ;;  %v941_v36 = vpop.permute.xlu1 %940  ;;  %1359 = vmatpush.bf16.msra.mxu3 %v3758_v41  ;;  %1579 = vmatpush.bf16.msra.mxu2 %v3589_v15  ;;  %v2731_v49 = vld [vmem:[#allocation2 + $0x4] sm:$0xf] }
 0x278   : > { %762 = vst.msk [vmem:[#allocation2 + $0x28] sm:$0xf] %vm760_vm7, %v757_v30  ;;  %1597 = vmatpush.bf16.msrb.mxu0 %v3766_v60  ;;  %1342 = vmatpush.bf16.msrb.mxu1 %v3598_v23  ;;  %v2906_v39 = vld [vmem:[#allocation2 + $0x4] sm:$0xf] }
 0x279   : > { %831 = vst.msk [vmem:[#allocation2 + $0x28] sm:$0xff] %vm3741_vm9, %v824_v3  ;;  %v3871_v3 = vld [vmem:[%s3289_s28] sm:$0xff] }
 0x27a   : > { %946 = vst.msk [vmem:[#allocation2 + $0x20] sm:$0xf] %vm4483_vm12, %v941_v36  ;;  %vm4491_vm12 = vcmask 650624  }
 0x27b   : > { %1360 = vmatpush.bf16.msra.mxu3 %v3778_v10  ;;  %1580 = vmatpush.bf16.msra.mxu2 %v3603_v24 }
 0x27c   : > { %1598 = vmatpush.bf16.msrb.mxu0 %v3785_v53  ;;  %1343 = vmatpush.bf16.msrb.mxu1 %v3612_v26 }
 0x27f   : > { %v886_v2 = vpop.permute.xlu0 %885  ;;  %v932_v42 = vpop.permute.xlu1 %931  ;;  %1581 = vmatpush.bf16.msra.mxu2 %v3617_v27 }
 0x280   : > { %937 = vst.msk [vmem:[#allocation2 + $0x1c] sm:$0xf] %vm4484_vm0, %v932_v42  ;;  %1344 = vmatpush.bf16.msrb.mxu1 %v3625_v31  ;;  %vm4492_vm0 = vcmask 424960  }
 0x281   : > { %v2911_v50 = vld [vmem:[#allocation2 + $0x1c] sm:$0xf0] }
 0x282   : > { %v2733_v29 = vld [vmem:[#allocation2 + $0x1c] sm:$0xf0]  ;;  %v2746_v55 = vor.u32 %v2911_v50, %v2745_v43 }
 0x283   : > { %v2736_v57 = vor.u32 %v2908_v51, %v2733_v29  ;;  %1582 = vmatpush.bf16.msra.mxu2 %v3630_v32 }
 0x284   : > { %1498 = vrot.lane.b32.xlu2 %v2746_v55, %s4512_s16  ;;  %1345 = vmatpush.bf16.msrb.mxu1 %v3637_v33 }
 0x285   : > { %1331 = vrot.lane.b32.xlu0 %v2736_v57, %s4522_s14 }
 0x287   : > { %v897_v58 = vpop.permute.xlu0 %896  ;;  %v808_v59 = vpop.permute.xlu1 %807  ;;  %v2909_v61 = vld [vmem:[#allocation2 + $0x18] sm:$0xf0]  ;;  %1583 = vmatpush.bf16.msra.mxu2 %v3642_v35 }
 0x288   : > { %v2631_v34 = vld [vmem:[#allocation2 + $0x18] sm:$0xf0]  ;;  %902 = vst.msk [vmem:[#allocation2 + $0x2c] sm:$0xf] %vm4493_vm8, %v897_v58  ;;  %v2732_v62 = vor.u32 %v2909_v61, %v2731_v49  ;;  %1346 = vmatpush.bf16.msrb.mxu1 %v3654_v37 }
 0x289   : > { %v2634_v63 = vor.u32 %v2906_v39, %v2631_v34  ;;  %970 = vst.msk [vmem:[#allocation2 + $0x2c] sm:$0xf] %vm4491_vm12, %v965_v44 }
 0x28a   : > { %814 = vst.msk [vmem:[#allocation2 + $0xc] sm:$0xf] %vm4496_vm5, %v808_v59  ;;  %1329 = vrot.lane.b32.xlu1 %v2732_v62, %s4522_s14 }
 0x28b   : > { %2679 = vmatmul.msk.bf16.vlgmr.msra.gmra.mxu1 %vm4492_vm0, %v2634_v63  ;;  %892 = vst.msk [vmem:[#allocation2 + $0xc] sm:$0xf] %vm4494_vm15, %v886_v2  ;;  %2726 = vmatmul.msk.bf16.vlgmr.msrb.gmra.mxu3 %vm4492_vm0, %v2634_v63  ;;  %v3878_v2 = vld [vmem:[%s3289_s28 + $0x8] sm:$0xff] }
 0x28c   : > { %1529 = vmatpush.bf16.msra.mxu1 %v3716_v5  ;;  %960 = vst.msk [vmem:[#allocation2 + $0xc] sm:$0xff] %vm3832_vm3, %v954_v48  ;;  %1511 = vmatpush.bf16.msrb.mxu3 %v3560_v16 }
 0x28d   : > { %1584 = vmatpush.bf16.msra.mxu2 %v3659_v38 }
 0x28f   : > { %v888_v6 = vpop.permute.xlu1 %887 }
 0x290   : > { %1530 = vmatpush.bf16.msra.mxu1 %v3728_v7  ;;  %893 = vst.msk [vmem:[#allocation2 + $0x24] sm:$0xf] %vm4494_vm15, %v888_v6  ;;  %1512 = vmatpush.bf16.msrb.mxu3 %v3572_v20  ;;  %v2765_v25 = vld [vmem:[#allocation2 + $0x28] sm:$0xf0] }
 0x291   : > { %961 = vst.msk [vmem:[#allocation2 + $0x24] sm:$0xff] %vm3832_vm3, %v955_v18 }
 0x293   : > { %v2910_v54 = vld [vmem:[#allocation2 + $0xc] sm:$0xf]  ;;  %v2753_v22 = vld [vmem:[#allocation2 + $0x10] sm:$0xf] }
 0x294   : > { %1531 = vmatpush.bf16.msra.mxu1 %v3758_v41  ;;  %1513 = vmatpush.bf16.msrb.mxu3 %v3584_v14  ;;  %v2763_v30 = vld [vmem:[#allocation2 + $0x10] sm:$0xf] }
 0x297   : > { %v963_v8 = vpop.permute.xlu1 %962 }
 0x298   : > { %1532 = vmatpush.bf16.msra.mxu1 %v3778_v10  ;;  %969 = vst.msk [vmem:[#allocation2 + $0x14] sm:$0xf] %vm4491_vm12, %v963_v8  ;;  %v2747_v9 = vld [vmem:[#allocation2 + $0x20] sm:$0xf0]  ;;  %v2912_v52 = vld [vmem:[#allocation2 + $0x24] sm:$0xf0]  ;;  %1514 = vmatpush.bf16.msrb.mxu3 %v3598_v23 }
 0x299   : > { %v2750_v11 = vor.u32 %v2910_v54, %v2747_v9  ;;  %v2754_v12 = vor.u32 %v2912_v52, %v2753_v22  ;;  %v2914_v13 = vld [vmem:[#allocation2 + $0x24] sm:$0xf0] }
 0x29a   : > { %v2764_v36 = vor.u32 %v2914_v13, %v2763_v30 }
 0x29b   : > { %1500 = vrot.lane.b32.xlu0 %v2750_v11, %s4512_s16  ;;  %1502 = vrot.lane.b32.xlu1 %v2754_v12, %s4512_s16 }
 0x29c   : > { %1515 = vmatpush.bf16.msrb.mxu3 %v3612_v26 }
 0x29f   : > { %v2913_v19 = vld [vmem:[#allocation2 + $0x14] sm:$0xf] }
 0x2a0   : > { %v2768_v1 = vor.u32 %v2913_v19, %v2765_v25  ;;  %1516 = vmatpush.bf16.msrb.mxu3 %v3625_v31 }
 0x2a2   : > { %1663 = vrot.lane.b32.xlu2 %v2768_v1, %s4525_s27 }
 0x2a3   : > { %1661 = vrot.lane.b32.xlu0 %v2764_v36, %s4525_s27  ;;  %1473 = vrot.lane.b32.xlu1 %v3871_v3, %s4526_s21 }
 0x2a4   : > { %1517 = vmatpush.bf16.msrb.mxu3 %v3637_v33 }
 0x2a8   : > { %1518 = vmatpush.bf16.msrb.mxu3 %v3654_v37 }
 0x2aa   : > { %1475 = vrot.lane.b32.xlu2 %v3878_v2, %s4526_s21 }
 0x2ab   : > { %1643 = vrot.lane.b32.xlu0 %v3871_v3, %s4527_s22  ;;  %1645 = vrot.lane.b32.xlu1 %v3878_v2, %s4527_s22 }
 0x2b2   : > { %1803 = vrot.lane.b32.xlu2 %v3871_v3, %s4528_s0 }
 0x2b3   : > { %1805 = vrot.lane.b32.xlu0 %v3878_v2, %s4528_s0 }
 0x2f7   : > { %v1332_v42 = vpop.permute.xlu0 %1331 }
 0x2f8   : > { %2737 = vmatmul.msk.bf16.vlgmr.msra.gmra.mxu3 %vm4492_vm0, %v1332_v42  ;;  %2740 = vmatmul.msk.bf16.vlgmr.msrb.gmra.mxu2 %vm4492_vm0, %v1332_v42 }
 0x2f9   : > { %1689 = vmatpush.bf16.msra.mxu3 %v3716_v5  ;;  %1755 = vmatpush.bf16.msrb.mxu2 %v3723_v56 }
 0x2fc   : > { %v1330_v43 = vpop.permute.xlu1 %1329 }
 0x2fd   : > { %1690 = vmatpush.bf16.msra.mxu3 %v3728_v7  ;;  %1756 = vmatpush.bf16.msrb.mxu2 %v3735_v0  ;;  %v1334_v50 = vsel %vm4490_vm11, %v1330_v43, %v1332_v42 }
 0x2fe   : > { %1347 = vmatmul.bf16.vlgmr.msrb.gmra.mxu1 %v1334_v50  ;;  %1413 = vmatmul.bf16.vlgmr.msra.gmra.mxu0 %v1334_v50 }
 0x2ff   : > { %1671 = vmatpush.bf16.msrb.mxu1 %v3560_v16  ;;  %1737 = vmatpush.bf16.msra.mxu0 %v3565_v17  ;;  %v3910_v16 = vld [vmem:[%s4440_s7] ss:$0 sm:$0xff]  ;;  %v1260_v17 = vpop.f32.mrf.mxu2 }
 0x301   : > { %1691 = vmatpush.bf16.msra.mxu3 %v3758_v41  ;;  %1757 = vmatpush.bf16.msrb.mxu2 %v3766_v60 }
 0x303   : > { %1672 = vmatpush.bf16.msrb.mxu1 %v3572_v20  ;;  %1738 = vmatpush.bf16.msra.mxu0 %v3577_v21  ;;  %v1499_v20 = vpop.permute.xlu2 %1498  ;;  %v1261_v21 = vadd.f32 %v3910_v16, %v1260_v17 }
 0x305   : > { %1692 = vmatpush.bf16.msra.mxu3 %v3778_v10  ;;  %1758 = vmatpush.bf16.msrb.mxu2 %v3785_v53 }
 0x307   : > { %1673 = vmatpush.bf16.msrb.mxu1 %v3584_v14  ;;  %1739 = vmatpush.bf16.msra.mxu0 %v3589_v15 }
 0x30b   : > { %1674 = vmatpush.bf16.msrb.mxu1 %v3598_v23  ;;  %1740 = vmatpush.bf16.msra.mxu0 %v3603_v24  ;;  %v1664_v24 = vpop.permute.xlu2 %1663 }
 0x30d   : > { %v1501_v5 = vpop.permute.xlu0 %1500  ;;  %v1503_v56 = vpop.permute.xlu1 %1502 }
 0x30e   : > { %v1505_v14 = vsel %vm4488_vm10, %v1499_v20, %v1501_v5  ;;  %v1506_v15 = vsel %vm4488_vm10, %v1501_v5, %v1503_v56  ;;  %v1274_v7 = vpop.f32.mrf.mxu3  ;;  %vm4489_vm10 = vcmask 818176  }
 0x30f   : > { %v3917_v0 = vadd.f32 %v1274_v7, %v1261_v21  ;;  %1519 = vmatmul.bf16.vlgmr.msrb.gmra.mxu3 %v1505_v14  ;;  %2755 = vmatmul.msk.bf16.vlgmr.msra.gmra.mxu1 %vm4492_vm0, %v1506_v15 }
 0x310   : > { %1585 = vmatmul.bf16.vlgmr.msra.gmra.mxu2 %v1505_v14  ;;  %2758 = vmatmul.msk.bf16.vlgmr.msrb.gmra.mxu0 %vm4492_vm0, %v1506_v15 }
 0x311   : > { %1675 = vmatpush.bf16.msrb.mxu1 %v3612_v26  ;;  %1741 = vmatpush.bf16.msra.mxu0 %v3617_v27  ;;  %v3932_v26 = vpop.f32.mrf.mxu0  ;;  %v3934_v27 = vpop.f32.mrf.mxu1 }
 0x315   : > { %1676 = vmatpush.bf16.msrb.mxu1 %v3625_v31  ;;  %1742 = vmatpush.bf16.msra.mxu0 %v3630_v32  ;;  %v1662_v23 = vpop.permute.xlu0 %1661  ;;  %v3936_v31 = vpop.f32.mrf.mxu2 }
 0x316   : > { %v1666_v41 = vsel %vm4489_vm10, %v1662_v23, %v1664_v24  ;;  %v3938_v32 = vpop.f32.mrf.mxu3 }
 0x319   : > { %1677 = vmatpush.bf16.msrb.mxu1 %v3637_v33  ;;  %1743 = vmatpush.bf16.msra.mxu0 %v3642_v35  ;;  %v3940_v33 = vpop.f32.mrf.mxu0  ;;  %v3942_v35 = vpop.f32.mrf.mxu1 }
 0x31d   : > { %1678 = vmatpush.bf16.msrb.mxu1 %v3654_v37  ;;  %1744 = vmatpush.bf16.msra.mxu0 %v3659_v38  ;;  %v3947_v37 = vld [vmem:[%s4529_s6] ss:$0 sm:$0xff] }
 0x31f   : > { %2769 = vmatmul.msk.bf16.vlgmr.msra.gmra.mxu3 %vm4492_vm0, %v1664_v24 }
 0x320   : > { %1679 = vmatmul.bf16.vlgmr.msrb.gmra.mxu1 %v1666_v41  ;;  %1745 = vmatmul.bf16.vlgmr.msra.gmra.mxu0 %v1666_v41 }
 0x321   : > { %2772 = vmatmul.msk.bf16.vlgmr.msrb.gmra.mxu2 %vm4492_vm0, %v1664_v24 }
 0x37b   : > { %v1362_v38 = vpop.f32.mrf.mxu3  ;;  %v1428_v60 = vpop.f32.mrf.mxu2 }
 0x37c   : > { %v1348_v10 = vpop.f32.mrf.mxu1  ;;  %v1414_v53 = vpop.f32.mrf.mxu0 }
 0x37d   : > { %v1349_v51 = vadd.f32 %v3947_v37, %v1348_v10  ;;  %v1415_v29 = vadd.f32 %v3910_v16, %v1414_v53 }
 0x37f   : > { %v1363_v55 = vadd.f32 %v1362_v38, %v1349_v51  ;;  %v1429_v57 = vadd.f32 %v1428_v60, %v1415_v29 }
 0x381   : > { %v2738_v45 = vmul.f32 -1.442695, %v1363_v55  ;;  %v2741_v49 = vmul.f32 -1.442695, %v1429_v57 }
 0x383   : > { %3007 = vpow2.f32 %v2738_v45  ;;  %v1364_v34 = vpop.f32.mrf.mxu3  ;;  %v1430_v44 = vpop.f32.mrf.mxu2 }
 0x384   : > { %3009 = vpow2.f32 %v2741_v49  ;;  %v1350_v58 = vpop.f32.mrf.mxu1  ;;  %v1416_v59 = vpop.f32.mrf.mxu0 }
 0x385   : > { %v1351_v61 = vadd.f32 %v3947_v37, %v1350_v58  ;;  %v1417_v39 = vadd.f32 %v3910_v16, %v1416_v59  ;;  %v1474_v45 = vpop.permute.xlu1 %1473 }
 0x387   : > { %v1365_v62 = vadd.f32 %v1364_v34, %v1351_v61  ;;  %v1431_v63 = vadd.f32 %v1430_v44, %v1417_v39 }
 0x389   : > { %v3008_v48 = vpop.eup %3007  ;;  %v2739_v40 = vmul.f32 -1.442695, %v1365_v62  ;;  %v2742_v8 = vmul.f32 -1.442695, %v1431_v63 }
 0x38a   : > { %v3010_v6 = vpop.eup %3009  ;;  %v1373_v18 = vadd.f32 1.0, %v3008_v48 }
 0x38b   : > { %v1439_v54 = vadd.f32 1.0, %v3010_v6  ;;  %3011 = vpow2.f32 %v2739_v40 }
 0x38c   : > { %3013 = vrcp.f32 %v1373_v18  ;;  %v1534_v22 = vpop.f32.mrf.mxu1  ;;  %v1384_v43 = vand.u32 2147483647, %v1373_v18  ;;  %v1386_v5 = vand.u32 2147483648, %v1373_v18  ;;  %vm1380_vm12 = vweird.f32 %v1373_v18 }
 0x38d   : > { %3015 = vrcp.f32 %v1439_v54  ;;  %v1600_v9 = vpop.f32.mrf.mxu0  ;;  %v1450_v7 = vand.u32 2147483647, %v1439_v54  ;;  %v1452_v23 = vand.u32 2147483648, %v1439_v54  ;;  %vm1446_vm0 = vweird.f32 %v1439_v54 }
 0x38e   : > { %3017 = vpow2.f32 %v2742_v8  ;;  %vm3963_vm8 = vcmp.eq.f32.partialorder %v1384_v43, 8.507059e+37  ;;  %v1387_v49 = vor.u32 1.1754944e-38, %v1386_v5 }
 0x38f   : > { %vm3967_vm15 = vcmp.eq.f32.partialorder %v1450_v7, 8.507059e+37  ;;  %v1453_v59 = vor.u32 1.1754944e-38, %v1452_v23 }
 0x391   : > { %v3012_v52 = vpop.eup %3011 }
 0x392   : > { %v3014_v11 = vpop.eup %3013  ;;  %v3953_v12 = vadd.f32 1.0, %v3012_v52  ;;  %v1520_v19 = vpop.f32.mrf.mxu3 }
 0x393   : > { %v3016_v13 = vpop.eup %3015  ;;  %v1376_v25 = vmul.f32 %v3014_v11, %v1373_v18  ;;  %v1521_v30 = vadd.f32 %v3947_v37, %v1520_v19  ;;  %v1586_v36 = vpop.f32.mrf.mxu2  ;;  %vm1381_vm10 = vweird.f32 %v3014_v11 }
 0x394   : > { %v3018_v1 = vpop.eup %3017  ;;  %3019 = vrcp.f32 %v3953_v12  ;;  %v1442_v42 = vmul.f32 %v3016_v13, %v1439_v54  ;;  %v1587_v17 = vadd.f32 %v3910_v16, %v1586_v36  ;;  %v1536_v20 = vpop.f32.mrf.mxu1  ;;  %vm1447_vm11 = vweird.f32 %v3016_v13  ;;  %vm1382_vm2 = vmor %vm1380_vm12, %vm1381_vm10 }
 0x395   : > { %v3957_v50 = vadd.f32 1.0, %v3018_v1  ;;  %v1377_v21 = vsub.f32 1.0, %v1376_v25  ;;  %v1535_v56 = vadd.f32 %v1534_v22, %v1521_v30  ;;  %v3960_v14 = vpop.f32.mrf.mxu0  ;;  %vm1448_vm5 = vmor %vm1446_vm0, %vm1447_vm11  ;;  %v1401_v48 = vand.u32 2147483648, %v3953_v12 }
 0x396   : > { %v1443_v15 = vsub.f32 1.0, %v1442_v42  ;;  %v1601_v24 = vadd.f32 %v1600_v9, %v1587_v17 }
 0x397   : > { %3021 = vrcp.f32 %v3957_v50  ;;  %v1378_v41 = vmul.f32 %v3014_v11, %v1377_v21  ;;  %v2756_v38 = vmul.f32 -1.442695, %v1535_v56  ;;  %v1402_v30 = vor.u32 1.1754944e-38, %v1401_v48 }
 0x398   : > { %v1444_v60 = vmul.f32 %v3016_v13, %v1443_v15  ;;  %v2759_v10 = vmul.f32 -1.442695, %v1601_v24  ;;  %v1465_v42 = vand.u32 2147483647, %v3957_v50  ;;  %v1467_v5 = vand.u32 2147483648, %v3957_v50  ;;  %v1476_v15 = vpop.permute.xlu2 %1475 }
 0x399   : > { %v1379_v53 = vadd.f32 %v3014_v11, %v1378_v41  ;;  %3023 = vpow2.f32 %v2756_v38 }
 0x39a   : > { %v3020_v29 = vpop.eup %3019  ;;  %v1445_v55 = vadd.f32 %v3016_v13, %v1444_v60  ;;  %3025 = vpow2.f32 %v2759_v10  ;;  %v1522_v58 = vpop.f32.mrf.mxu3  ;;  %vm1466_vm10 = vcmp.eq.f32.partialorder %v1465_v42, 8.507059e+37 }
 0x39b   : > { %v1383_v61 = vsel %vm1382_vm2, %v3014_v11, %v1379_v53  ;;  %v1391_v39 = vmul.f32 %v3020_v29, %v3953_v12  ;;  %v1523_v34 = vadd.f32 %v3947_v37, %v1522_v58  ;;  %v3974_v44 = vpop.f32.mrf.mxu2  ;;  %vm1395_vm2 = vweird.f32 %v3953_v12 }
 0x39c   : > { %v1449_v62 = vsel %vm1448_vm5, %v3016_v13, %v1445_v55  ;;  %v1388_v63 = vsel %vm3963_vm8, %v1387_v49, %v1383_v61  ;;  %vm1396_vm5 = vweird.f32 %v3020_v29  ;;  %v1399_v13 = vand.u32 2147483647, %v3953_v12 }
 0x39d   : > { %v3022_v40 = vpop.eup %3021  ;;  %v3981_v6 = vsel %vm3967_vm15, %v1453_v59, %v1449_v62  ;;  %v1479_v18 = vmul.f32 %v1474_v45, %v1388_v63  ;;  %v1392_v8 = vsub.f32 1.0, %v1391_v39  ;;  %v1537_v54 = vadd.f32 %v1536_v20, %v1523_v34  ;;  %v1680_v9 = vpop.f32.mrf.mxu1  ;;  %vm1397_vm8 = vmor %vm1395_vm2, %vm1396_vm5 }
 0x39e   : > { %v3984_v22 = vmul.f32 %v1474_v45, %v3981_v6  ;;  %v1457_v52 = vmul.f32 %v3022_v40, %v3957_v50  ;;  %vm1461_vm15 = vweird.f32 %v3957_v50  ;;  %v1746_v1 = vpop.f32.mrf.mxu0  ;;  %v1681_v20 = vadd.f32 %v3947_v37, %v1680_v9 }
 0x39f   : > { %1813 = vrot.lane.b32.xlu1 %v1479_v18, %s4528_s0  ;;  %v1393_v11 = vmul.f32 %v3020_v29, %v1392_v8  ;;  %v3024_v19 = vpop.eup %3023  ;;  %v2757_v25 = vmul.f32 -1.442695, %v1537_v54  ;;  %vm1462_vm12 = vweird.f32 %v3022_v40  ;;  %v1747_v23 = vadd.f32 %v3910_v16, %v1746_v1 }
 0x3a0   : > { %v1458_v36 = vsub.f32 1.0, %v1457_v52  ;;  %v3026_v43 = vpop.eup %3025  ;;  %v3992_v17 = vadd.f32 1.0, %v3024_v19  ;;  %vm1400_vm0 = vcmp.eq.f32.partialorder %v1399_v13, 8.507059e+37  ;;  %vm1463_vm11 = vmor %vm1461_vm15, %vm1462_vm12  ;;  %v1468_v12 = vor.u32 1.1754944e-38, %v1467_v5 }
 0x3a1   : > { %v1394_v21 = vadd.f32 %v3020_v29, %v1393_v11  ;;  %v3996_v56 = vadd.f32 1.0, %v3026_v43  ;;  %3027 = vpow2.f32 %v2757_v25 }
 0x3a2   : > { %v1459_v7 = vmul.f32 %v3022_v40, %v1458_v36  ;;  %3029 = vrcp.f32 %v3992_v17  ;;  %v1694_v24 = vpop.f32.mrf.mxu3  ;;  %v1556_v8 = vand.u32 2147483647, %v3992_v17  ;;  %v1558_v54 = vand.u32 2147483648, %v3992_v17 }
 0x3a3   : > { %v1398_v41 = vsel %vm1397_vm8, %v3020_v29, %v1394_v21  ;;  %3031 = vrcp.f32 %v3996_v56  ;;  %v1695_v38 = vadd.f32 %v1694_v24, %v1681_v20  ;;  %v1624_v19 = vand.u32 2147483648, %v3996_v56  ;;  %v1644_v21 = vpop.permute.xlu0 %1643 }
 0x3a4   : > { %v1403_v60 = vsel %vm1400_vm0, %v1402_v30, %v1398_v41  ;;  %v1460_v10 = vadd.f32 %v3022_v40, %v1459_v7  ;;  %v1760_v53 = vpop.f32.mrf.mxu2  ;;  %v1622_v30 = vand.u32 2147483647, %v3996_v56  ;;  %vm1552_vm15 = vweird.f32 %v3992_v17 }
 0x3a5   : > { %v1480_v51 = vmul.f32 %v1476_v15, %v1403_v60  ;;  %v2770_v55 = vmul.f32 -1.442695, %v1695_v38  ;;  %v1761_v57 = vadd.f32 %v1760_v53, %v1747_v23  ;;  %v1682_v16 = vpop.f32.mrf.mxu1  ;;  %vm1618_vm8 = vweird.f32 %v3996_v56 }
 0x3a6   : > { %v1464_v45 = vsel %vm1463_vm11, %v3022_v40, %v1460_v10  ;;  %v1683_v34 = vadd.f32 %v3947_v37, %v1682_v16  ;;  %v1559_v5 = vor.u32 1.1754944e-38, %v1558_v54  ;;  %vm1557_vm0 = vcmp.eq.f32.partialorder %v1556_v8, 8.507059e+37 }
 0x3a7   : > { %v4006_v49 = vsel %vm1466_vm10, %v1468_v12, %v1464_v45  ;;  %1815 = vrot.lane.b32.xlu2 %v1480_v51, %s4528_s0  ;;  %v3028_v29 = vpop.eup %3027  ;;  %3033 = vpow2.f32 %v2770_v55  ;;  %v2773_v58 = vmul.f32 -1.442695, %v1761_v57  ;;  %v1625_v23 = vor.u32 1.1754944e-38, %v1624_v19 }
 0x3a8   : > { %v4010_v59 = vmul.f32 %v1476_v15, %v4006_v49  ;;  %v3030_v61 = vpop.eup %3029  ;;  %v4012_v50 = vadd.f32 1.0, %v3028_v29  ;;  %vm1623_vm10 = vcmp.eq.f32.partialorder %v1622_v30, 8.507059e+37 }
 0x3a9   : > { %v3032_v39 = vpop.eup %3031  ;;  %3035 = vpow2.f32 %v2773_v58  ;;  %v1548_v62 = vmul.f32 %v3030_v61, %v3992_v17  ;;  %vm1553_vm2 = vweird.f32 %v3030_v61 }
 0x3aa   : > { %3037 = vrcp.f32 %v4012_v50  ;;  %v1696_v63 = vpop.f32.mrf.mxu3  ;;  %v1614_v48 = vmul.f32 %v3032_v39, %v3996_v56  ;;  %vm1619_vm5 = vweird.f32 %v3032_v39  ;;  %vm1554_vm12 = vmor %vm1552_vm15, %vm1553_vm2  ;;  %v1573_v53 = vand.u32 2147483648, %v4012_v50 }
 0x3ab   : > { %v1697_v40 = vadd.f32 %v1696_v63, %v1683_v34  ;;  %v1549_v18 = vsub.f32 1.0, %v1548_v62  ;;  %vm1620_vm11 = vmor %vm1618_vm8, %vm1619_vm5  ;;  %v1571_v55 = vand.u32 2147483647, %v4012_v50  ;;  %vm1567_vm5 = vweird.f32 %v4012_v50 }
 0x3ac   : > { %v1615_v9 = vsub.f32 1.0, %v1614_v48 }
 0x3ad   : > { %v3034_v52 = vpop.eup %3033  ;;  %v2771_v11 = vmul.f32 -1.442695, %v1697_v40  ;;  %v1550_v13 = vmul.f32 %v3030_v61, %v1549_v18  ;;  %vm1572_vm8 = vcmp.eq.f32.partialorder %v1571_v55, 8.507059e+37 }
 0x3ae   : > { %v4021_v25 = vadd.f32 1.0, %v3034_v52  ;;  %v1616_v1 = vmul.f32 %v3032_v39, %v1615_v9 }
 0x3af   : > { %v3036_v36 = vpop.eup %3035  ;;  %3039 = vpow2.f32 %v2771_v11  ;;  %v1551_v42 = vadd.f32 %v3030_v61, %v1550_v13 }
 0x3b0   : > { %v3038_v43 = vpop.eup %3037  ;;  %3041 = vrcp.f32 %v4021_v25  ;;  %v4027_v20 = vadd.f32 1.0, %v3036_v36  ;;  %v1617_v15 = vadd.f32 %v3032_v39, %v1616_v1  ;;  %v1716_v40 = vand.u32 2147483647, %v4021_v25  ;;  %v1804_v1 = vpop.permute.xlu2 %1803 }
 0x3b1   : > { %v1555_v7 = vsel %vm1554_vm12, %v3030_v61, %v1551_v42  ;;  %v1563_v24 = vmul.f32 %v3038_v43, %v4012_v50  ;;  %vm1568_vm2 = vweird.f32 %v3038_v43  ;;  %v4043_v61 = vpop.permute.xlu1 %1645  ;;  %v1718_v18 = vand.u32 2147483648, %v4021_v25 }
 0x3b2   : > { %3043 = vrcp.f32 %v4027_v20  ;;  %v1560_v17 = vsel %vm1557_vm0, %v1559_v5, %v1555_v7  ;;  %v1621_v56 = vsel %vm1620_vm11, %v3032_v39, %v1617_v15  ;;  %vm1569_vm15 = vmor %vm1567_vm5, %vm1568_vm2  ;;  %v1574_v39 = vor.u32 1.1754944e-38, %v1573_v53 }
 0x3b3   : > { %v4033_v41 = vsel %vm1623_vm10, %v1625_v23, %v1621_v56  ;;  %v1649_v38 = vmul.f32 %v1644_v21, %v1560_v17  ;;  %v1564_v60 = vsub.f32 1.0, %v1563_v24  ;;  %vm1712_vm0 = vweird.f32 %v4021_v25 }
 0x3b4   : > { %v4036_v10 = vmul.f32 %v1644_v21, %v4033_v41  ;;  %v1784_v9 = vand.u32 2147483648, %v4027_v20  ;;  %v1782_v13 = vand.u32 2147483647, %v4027_v20  ;;  %v1719_v30 = vor.u32 1.1754944e-38, %v1718_v18 }
 0x3b5   : > { %v3040_v12 = vpop.eup %3039  ;;  %1821 = vrot.lane.b32.xlu0 %v1649_v38, %s4527_s22  ;;  %v1565_v51 = vmul.f32 %v3038_v43, %v1564_v60  ;;  %vm1778_vm2 = vweird.f32 %v4027_v20  ;;  %vm1717_vm5 = vcmp.eq.f32.partialorder %v1716_v40, 8.507059e+37  ;;  %v4060_v60 = vpop.permute.xlu0 %1805 }
 0x3b6   : > { %v3042_v57 = vpop.eup %3041  ;;  %v1706_v45 = vadd.f32 1.0, %v3040_v12  ;;  %v1785_v21 = vor.u32 1.1754944e-38, %v1784_v9 }
 0x3b7   : > { %v1566_v16 = vadd.f32 %v3038_v43, %v1565_v51  ;;  %v1708_v29 = vmul.f32 %v3042_v57, %v4021_v25  ;;  %vm1713_vm12 = vweird.f32 %v3042_v57 }
 0x3b8   : > { %v3044_v58 = vpop.eup %3043  ;;  %3045 = vrcp.f32 %v1706_v45  ;;  %vm1714_vm10 = vmor %vm1712_vm0, %vm1713_vm12  ;;  %v1733_v24 = vand.u32 2147483648, %v1706_v45  ;;  %v1731_v56 = vand.u32 2147483647, %v1706_v45  ;;  %vm1727_vm0 = vweird.f32 %v1706_v45 }
 0x3b9   : > { %v1570_v34 = vsel %vm1569_vm15, %v3038_v43, %v1566_v16  ;;  %v1709_v62 = vsub.f32 1.0, %v1708_v29  ;;  %v1774_v63 = vmul.f32 %v3044_v58, %v4027_v20  ;;  %vm1779_vm11 = vweird.f32 %v3044_v58 }
 0x3ba   : > { %v1575_v48 = vsel %vm1572_vm8, %v1574_v39, %v1570_v34  ;;  %vm1780_vm15 = vmor %vm1778_vm2, %vm1779_vm11  ;;  %vm1783_vm8 = vcmp.eq.f32.partialorder %v1782_v13, 8.507059e+37  ;;  %v1734_v53 = vor.u32 1.1754944e-38, %v1733_v24  ;;  %v1122_v39 = vadd.f32 %v3947_v37, %v3940_v33 }
 0x3bb   : > { %v1650_v50 = vmul.f32 %v4043_v61, %v1575_v48  ;;  %v1710_v8 = vmul.f32 %v3042_v57, %v1709_v62  ;;  %v1775_v54 = vsub.f32 1.0, %v1774_v63 }
 0x3bc   : > { %v1136_v34 = vadd.f32 %v3942_v35, %v1122_v39 }
 0x3bd   : > { %1823 = vrot.lane.b32.xlu1 %v1650_v50, %s4527_s22  ;;  %v1711_v52 = vadd.f32 %v3042_v57, %v1710_v8  ;;  %v1776_v11 = vmul.f32 %v3044_v58, %v1775_v54 }
 0x3be   : > { %v3046_v19 = vpop.eup %3045  ;;  %v2681_v62 = vmul.f32 -1.442695, %v1136_v34 }
 0x3bf   : > { %v1715_v36 = vsel %vm1714_vm10, %v3042_v57, %v1711_v52  ;;  %v1777_v42 = vadd.f32 %v3044_v58, %v1776_v11  ;;  %v1723_v43 = vmul.f32 %v3046_v19, %v1706_v45  ;;  %vm1728_vm12 = vweird.f32 %v3046_v19 }
 0x3c0   : > { %v1720_v25 = vsel %vm1717_vm5, %v1719_v30, %v1715_v36  ;;  %vm1729_vm11 = vmor %vm1727_vm0, %vm1728_vm12  ;;  %vm1732_vm10 = vcmp.eq.f32.partialorder %v1731_v56, 8.507059e+37  ;;  %v1120_v57 = vadd.f32 %v3947_v37, %v3932_v26  ;;  %vm1838_vm12 = vcmask 523264  }
 0x3c1   : > { %v1781_v5 = vsel %vm1780_vm15, %v3044_v58, %v1777_v42  ;;  %v1809_v15 = vmul.f32 %v1804_v1, %v1720_v25  ;;  %v1724_v7 = vsub.f32 1.0, %v1723_v43  ;;  %vm1835_vm0 = vcmask 261120  }
 0x3c2   : > { %v4054_v23 = vsel %vm1783_vm8, %v1785_v21, %v1781_v5  ;;  %v1134_v16 = vadd.f32 %v3934_v27, %v1120_v57 }
 0x3c3   : > { %v4057_v17 = vmul.f32 %v1804_v1, %v4054_v23  ;;  %1829 = vrot.lane.b32.xlu2 %v1809_v15, %s4526_s21  ;;  %v1725_v20 = vmul.f32 %v3046_v19, %v1724_v7 }
 0x3c4   : > { %v2680_v29 = vmul.f32 -1.442695, %v1134_v16 }
 0x3c5   : > { %v1726_v38 = vadd.f32 %v3046_v19, %v1725_v20 }
 0x3c6   : > { %3047 = vpow2.f32 %v2680_v29 }
 0x3c7   : > { %v1730_v12 = vsel %vm1729_vm11, %v3046_v19, %v1726_v38  ;;  %vm1841_vm11 = vcmask 785408  }
 0x3c8   : > { %v1735_v51 = vsel %vm1732_vm10, %v1734_v53, %v1730_v12 }
 0x3c9   : > { %v1810_v55 = vmul.f32 %v4060_v60, %v1735_v51 }
 0x3cb   : > { %1831 = vrot.lane.b32.xlu0 %v1810_v55, %s4526_s21 }
 0x3cc   : > { %v3048_v58 = vpop.eup %3047 }
 0x3cd   : > { %v1144_v45 = vadd.f32 1.0, %v3048_v58 }
 0x3cf   : > { %3049 = vrcp.f32 %v1144_v45  ;;  %v1157_v8 = vand.u32 2147483648, %v1144_v45  ;;  %vm1151_vm5 = vweird.f32 %v1144_v45  ;;  %v1155_v54 = vand.u32 2147483647, %v1144_v45 }
 0x3d0   : > { %3051 = vpow2.f32 %v2681_v62 }
 0x3d1   : > { %v1158_v37 = vor.u32 1.1754944e-38, %v1157_v8  ;;  %vm1156_vm8 = vcmp.eq.f32.partialorder %v1155_v54, 8.507059e+37 }
 0x3d5   : > { %v3050_v63 = vpop.eup %3049 }
 0x3d6   : > { %v1147_v48 = vmul.f32 %v3050_v63, %v1144_v45  ;;  %v3052_v18 = vpop.eup %3051  ;;  %vm1152_vm2 = vweird.f32 %v3050_v63 }
 0x3d7   : > { %v1145_v50 = vadd.f32 1.0, %v3052_v18  ;;  %vm1153_vm15 = vmor %vm1151_vm5, %vm1152_vm2 }
 0x3d8   : > { %v1148_v40 = vsub.f32 1.0, %v1147_v48 }
 0x3d9   : > { %3053 = vrcp.f32 %v1145_v50  ;;  %v1172_v15 = vand.u32 2147483648, %v1145_v50  ;;  %vm1166_vm2 = vweird.f32 %v1145_v50  ;;  %v1170_v7 = vand.u32 2147483647, %v1145_v50 }
 0x3da   : > { %v1149_v26 = vmul.f32 %v3050_v63, %v1148_v40 }
 0x3db   : > { %v1173_v20 = vor.u32 1.1754944e-38, %v1172_v15 }
 0x3dc   : > { %v1150_v27 = vadd.f32 %v3050_v63, %v1149_v26 }
 0x3de   : > { %v1154_v9 = vsel %vm1153_vm15, %v3050_v63, %v1150_v27  ;;  %vm1171_vm15 = vcmp.eq.f32.partialorder %v1170_v7, 8.507059e+37 }
 0x3df   : > { %v3054_v52 = vpop.eup %3053  ;;  %v1159_v35 = vsel %vm1156_vm8, %v1158_v37, %v1154_v9  ;;  %vm4535_vm8 = vcmask 130048  }
 0x3e0   : > { %v1162_v11 = vmul.f32 %v3054_v52, %v1145_v50  ;;  %v1317_v19 = vmul.f32 %v3871_v3, %v1159_v35  ;;  %vm1167_vm10 = vweird.f32 %v3054_v52 }
 0x3e1   : > { %vm1168_vm5 = vmor %vm1166_vm2, %vm1167_vm10  ;;  %vm4536_vm10 = vcmask 359424   ;;  %vm4537_vm2 = vcmask 289824  }
 0x3e2   : > { %v1163_v36 = vsub.f32 1.0, %v1162_v11 }
 0x3e4   : > { %v1164_v5 = vmul.f32 %v3054_v52, %v1163_v36 }
 0x3e6   : > { %v1165_v3 = vadd.f32 %v3054_v52, %v1164_v5 }
 0x3e8   : > { %v1169_v24 = vsel %vm1168_vm5, %v3054_v52, %v1165_v3  ;;  %vm4538_vm5 = vmmov %vm4536_vm10  ;;  %v4139_v3 = vpop.f32.mrf.mxu2 }
 0x3e9   : > { %v1174_v56 = vsel %vm1171_vm15, %v1173_v20, %v1169_v24  ;;  %vm4539_vm15 = vcmask 519424  }
 0x3ea   : > { %v1318_v38 = vmul.f32 %v3878_v2, %v1174_v56  ;;  %v2915_v2 = vld [vmem:[%s4508_s2] sm:$0xff] }
 0x401   : > { %v1816_v33 = vpop.permute.xlu2 %1815 }
 0x402   : > { %v1837_v12 = vsel %vm1835_vm0, %v1318_v38, %v1816_v33 }
 0x411   : > { %v1814_v13 = vpop.permute.xlu1 %1813 }
 0x412   : > { %v1836_v1 = vsel %vm1835_vm0, %v1317_v19, %v1814_v13  ;;  %v2916_v13 = vld [vmem:[%s4508_s2 + $0x8] sm:$0xff]  ;;  %s4551_s2 = smov 116  }
 0x41d   : > { %v1830_v42 = vpop.permute.xlu2 %1829 }
 0x427   : > { %v1822_v30 = vpop.permute.xlu0 %1821 }
 0x428   : > { %v1839_v43 = vsel %vm1838_vm12, %v1836_v1, %v1822_v30 }
 0x429   : > { %v4074_v25 = vsel %vm1841_vm11, %v1839_v43, %v1830_v42 }
 0x42a   : > { %v1844_v21 = vpack.c.bf16 %v4074_v25, %v4074_v25 }
 0x42c   : > { %1848 = vrot.lane.b32.xlu0 %v1844_v21, %s4534_s24  ;;  %1864 = vrot.lane.b32.xlu1 %v1844_v21, %s4511_s26  ;;  %v1891_v29 = vunpack.c.l.b16 %v1844_v21 }
 0x42f   : > { %v1824_v53 = vpop.permute.xlu1 %1823 }
 0x430   : > { %v1840_v51 = vsel %vm1838_vm12, %v1837_v12, %v1824_v53 }
 0x434   : > { %1856 = vrot.lane.b32.xlu1 %v1844_v21, %s4512_s16 }
 0x43c   : > { %1876 = vrot.lane.b32.xlu1 %v1844_v21, %s4527_s22 }
 0x43d   : > { %v1832_v55 = vpop.permute.xlu0 %1831 }
 0x43e   : > { %v4086_v57 = vsel %vm1841_vm11, %v1840_v51, %v1832_v55 }
 0x43f   : > { %v1845_v16 = vpack.c.bf16 %v4086_v57, %v4086_v57 }
 0x441   : > { %1866 = vrot.lane.b32.xlu2 %v1845_v16, %s4511_s26  ;;  %v1892_v58 = vunpack.c.l.b16 %v1845_v16 }
 0x443   : > { %v1893_v45 = vpack.c.b16 %v1892_v58, %v1891_v29 }
 0x444   : > { %1850 = vrot.lane.b32.xlu1 %v1845_v16, %s4534_s24 }
 0x445   : > { %1905 = vmatpush.bf16.msrb.mxu3 %v1893_v45  ;;  %v4173_v45 = vld [vmem:[%s4438_s5 + $0x38] sm:$0xff] }
 0x446   : > { %2249 = vmatpush.bf16.msrb.mxu0 %v4173_v45 }
 0x448   : > { %2779 = vmatmul.msk.bf16.vlgmr.msrb.gmra.mxu3 %vm4535_vm8, %v2915_v2  ;;  %vm4540_vm8 = vmmov %vm4539_vm15 }
 0x449   : > { %1858 = vrot.lane.b32.xlu2 %v1845_v16, %s4512_s16 }
 0x451   : > { %1878 = vrot.lane.b32.xlu2 %v1845_v16, %s4527_s22 }
 0x49b   : > { %v1867_v39 = vpop.permute.xlu2 %1866 }
 0x49c   : > { %v1869_v34 = vrot.slane %v1867_v39, 4 }
 0x49e   : > { %v1871_v62 = vsel %vm4536_vm10, %v1869_v34, %v1867_v39  ;;  %v1849_v63 = vpop.permute.xlu0 %1848  ;;  %v1865_v48 = vpop.permute.xlu1 %1864  ;;  %vm4541_vm10 = vmmov %vm4537_vm2  ;;  %v4180_v34 = vld [vmem:[%s4438_s5 + $0x30] sm:$0xff] }
 0x49f   : > { %1875 = vst.msk [vmem:[#allocation2 + $0x20] sm:$0xff] %vm3664_vm13, %v1871_v62  ;;  %v1868_v40 = vrot.slane %v1865_v48, 4  ;;  %2250 = vmatpush.bf16.msrb.mxu0 %v4180_v34 }
 0x4a0   : > { %1854 = vst.msk [vmem:[#allocation2] sm:$0xf] %vm4537_vm2, %v1849_v63  ;;  %vm4545_vm2 = vcmask 585024   ;;  %v4189_v63 = vld [vmem:[%s4438_s5 + $0x28] sm:$0xff] }
 0x4a1   : > { %v1870_v18 = vsel %vm4538_vm5, %v1868_v40, %v1865_v48  ;;  %vm4546_vm5 = vmmov %vm4545_vm2  ;;  %v4197_v40 = vld [vmem:[%s4438_s5 + $0x20] sm:$0xff] }
 0x4a2   : > { %1874 = vst.msk [vmem:[#allocation2 + $0x8] sm:$0xff] %vm3664_vm13, %v1870_v18  ;;  %vm4543_vm13 = vcmask 130048   ;;  %v4203_v18 = vld [vmem:[%s4438_s5 + $0x18] sm:$0xff] }
 0x4a3   : > { %v1859_v50 = vpop.permute.xlu2 %1858  ;;  %2251 = vmatpush.bf16.msrb.mxu0 %v4189_v63 }
 0x4a4   : > { %1863 = vst.msk [vmem:[#allocation2 + $0x1c] sm:$0xf] %vm667_vm6, %v1859_v50 }
 0x4a6   : > { %v1857_v26 = vpop.permute.xlu1 %1856 }
 0x4a7   : > { %1862 = vst.msk [vmem:[#allocation2 + $0x4] sm:$0xf] %vm667_vm6, %v1857_v26  ;;  %vm4544_vm6 = vmmov %vm4543_vm13  ;;  %2252 = vmatpush.bf16.msrb.mxu0 %v4197_v40  ;;  %v4211_v26 = vld [vmem:[%s4438_s5 + $0x10] sm:$0xff] }
 0x4ab   : > { %v1879_v27 = vpop.permute.xlu2 %1878  ;;  %2253 = vmatpush.bf16.msrb.mxu0 %v4203_v18 }
 0x4ac   : > { %1883 = vst.msk [vmem:[#allocation2 + $0x28] sm:$0xf] %vm4539_vm15, %v1879_v27  ;;  %vm4547_vm15 = vcmask 388224   ;;  %v4217_v27 = vld [vmem:[%s4438_s5 + $0x8] sm:$0xff] }
 0x4ae   : > { %v1877_v8 = vpop.permute.xlu1 %1876 }
 0x4af   : > { %1882 = vst.msk [vmem:[#allocation2 + $0x10] sm:$0xf] %vm4540_vm8, %v1877_v8  ;;  %vm4548_vm8 = vmmov %vm4547_vm15  ;;  %2254 = vmatpush.bf16.msrb.mxu0 %v4211_v26 }
 0x4b3   : > { %2255 = vmatpush.bf16.msrb.mxu0 %v4217_v27 }
 0x4b6   : > { %v1851_v54 = vpop.permute.xlu1 %1850 }
 0x4b7   : > { %1855 = vst.msk [vmem:[#allocation2 + $0x18] sm:$0xf] %vm4541_vm10, %v1851_v54  ;;  %vm4554_vm10 = vcmask 552224  }
 0x4cb   : > { %v4110_v9 = vpop.f32.mrf.mxu3 }
 0x4cc   : > { %v1912_v47 = vpack.c.bf16 %v4110_v9, %v4110_v9 }
 0x4ce   : > { %1940 = vrot.lane.b32.xlu1 %v1912_v47, %s4525_s27  ;;  %1924 = vrot.lane.b32.xlu2 %v1912_v47, %s4510_s25  ;;  %v1948_v52 = vunpack.c.l.b16 %v1912_v47 }
 0x4cf   : > { %1916 = vrot.lane.b32.xlu0 %v1912_v47, %s4542_s17 }
 0x4d3   : > { %v4117_v33 = vpop.f32.mrf.mxu3 }
 0x4d4   : > { %v1913_v37 = vpack.c.bf16 %v4117_v33, %v4117_v33 }
 0x4d6   : > { %1942 = vrot.lane.b32.xlu2 %v1913_v37, %s4525_s27  ;;  %1918 = vrot.lane.b32.xlu1 %v1913_v37, %s4542_s17  ;;  %v1949_v35 = vunpack.c.l.b16 %v1913_v37 }
 0x4d7   : > { %1932 = vrot.lane.b32.xlu0 %v1912_v47, %s4513_s23 }
 0x4d8   : > { %v1950_v11 = vpack.c.b16 %v1949_v35, %v1948_v52  ;;  %v4232_v35 = vld [vmem:[%s4438_s5] sm:$0xff] }
 0x4d9   : > { %2256 = vmatpush.bf16.msrb.mxu0 %v4232_v35 }
 0x4da   : > { %1959 = vmatpush.bf16.msra.mxu1 %v1950_v11  ;;  %2027 = vmatpush.bf16.msra.mxu2 %v1950_v11 }
 0x4dd   : > { %2780 = vmatmul.msk.bf16.vlgmr.msra.gmra.mxu1 %vm4543_vm13, %v2915_v2  ;;  %2787 = vmatmul.msk.bf16.vlgmr.msra.gmra.mxu2 %vm4544_vm6, %v2916_v13  ;;  %vm4555_vm13 = vcmask 916480  }
 0x4de   : > { %1934 = vrot.lane.b32.xlu1 %v1913_v37, %s4513_s23  ;;  %2306 = vmatpush.bf16.msrb.mxu2 %v4173_v45 }
 0x4df   : > { %1926 = vrot.lane.b32.xlu0 %v1913_v37, %s4510_s25  ;;  %2430 = vmatpush.bf16.msra.mxu0 %v4173_v45 }
 0x4e2   : > { %2307 = vmatpush.bf16.msrb.mxu2 %v4180_v34 }
 0x4e3   : > { %2431 = vmatpush.bf16.msra.mxu0 %v4180_v34 }
 0x4e6   : > { %2308 = vmatpush.bf16.msrb.mxu2 %v4189_v63 }
 0x4e7   : > { %2432 = vmatpush.bf16.msra.mxu0 %v4189_v63 }
 0x4ea   : > { %2309 = vmatpush.bf16.msrb.mxu2 %v4197_v40 }
 0x4eb   : > { %2433 = vmatpush.bf16.msra.mxu0 %v4197_v40 }
 0x4ee   : > { %2310 = vmatpush.bf16.msrb.mxu2 %v4203_v18 }
 0x4ef   : > { %2434 = vmatpush.bf16.msra.mxu0 %v4203_v18 }
 0x4f2   : > { %2311 = vmatpush.bf16.msrb.mxu2 %v4211_v26 }
 0x4f3   : > { %2435 = vmatpush.bf16.msra.mxu0 %v4211_v26 }
 0x4f6   : > { %2312 = vmatpush.bf16.msrb.mxu2 %v4217_v27 }
 0x4f7   : > { %2436 = vmatpush.bf16.msra.mxu0 %v4217_v27 }
 0x4fa   : > { %2313 = vmatpush.bf16.msrb.mxu2 %v4232_v35 }
 0x4fb   : > { %2437 = vmatpush.bf16.msra.mxu0 %v4232_v35 }
 0x528   : > { %v1925_v19 = vpop.permute.xlu2 %1924 }
 0x529   : > { %1930 = vst.msk [vmem:[#allocation2 + $0x4] sm:$0xf] %vm742_vm4, %v1925_v19 }
 0x530   : > { %v1943_v1 = vpop.permute.xlu2 %1942 }
 0x531   : > { %1947 = vst.msk [vmem:[#allocation2 + $0x28] sm:$0xf] %vm760_vm7, %v1943_v1 }
 0x540   : > { %v1941_v30 = vpop.permute.xlu1 %1940 }
 0x541   : > { %1946 = vst.msk [vmem:[#allocation2 + $0x10] sm:$0xf] %vm760_vm7, %v1941_v30  ;;  %v1917_v36 = vpop.permute.xlu0 %1916  ;;  %vm4553_vm7 = vcmask 257024  }
 0x542   : > { %1922 = vst.msk [vmem:[#allocation2] sm:$0xf] %vm4545_vm2, %v1917_v36 }
 0x548   : > { %v1919_v42 = vpop.permute.xlu1 %1918 }
 0x549   : > { %v1933_v43 = vpop.permute.xlu0 %1932  ;;  %1923 = vst.msk [vmem:[#allocation2 + $0x18] sm:$0xf] %vm4546_vm5, %v1919_v42  ;;  %vm4558_vm5 = vcmask 683424  }
 0x54a   : > { %1938 = vst.msk [vmem:[#allocation2 + $0xc] sm:$0xf] %vm4547_vm15, %v1933_v43  ;;  %vm4559_vm15 = vmmov %vm4553_vm7 }
 0x550   : > { %v1935_v21 = vpop.permute.xlu1 %1934 }
 0x551   : > { %v1927_v5 = vpop.permute.xlu0 %1926  ;;  %1939 = vst.msk [vmem:[#allocation2 + $0x24] sm:$0xf] %vm4548_vm8, %v1935_v21  ;;  %vm4560_vm8 = vmmov %vm4555_vm13 }
 0x552   : > { %1931 = vst.msk [vmem:[#allocation2 + $0x1c] sm:$0xf] %vm742_vm4, %v1927_v5  ;;  %vm4552_vm4 = vmmov %vm4544_vm6  ;;  %vm4556_vm6 = vcmask 880224  }
 0x553   : > { %vm4557_vm2 = vmmov %vm4556_vm6 }
 0x55a   : > { %v1961_v15 = vpop.f32.mrf.mxu1 }
 0x55b   : > { %v1966_v7 = vmul.f32 2.0, %v1961_v15 }
 0x55d   : > { %v1968_v24 = vsub.f32 %v1966_v7, %v4074_v25 }
 0x55f   : > { %v1970_v20 = vpack.c.bf16 %v1968_v24, %v1968_v24 }
 0x560   : > { %v2029_v56 = vpop.f32.mrf.mxu2 }
 0x561   : > { %1998 = vrot.lane.b32.xlu2 %v1970_v20, %s4549_s1  ;;  %1982 = vrot.lane.b32.xlu0 %v1970_v20, %s4526_s21  ;;  %v4146_v51 = vpack.c.bf16 %v2029_v56, %v2029_v56 }
 0x562   : > { %1974 = vrot.lane.b32.xlu1 %v1970_v20, %s4522_s14  ;;  %v1963_v38 = vpop.f32.mrf.mxu1 }
 0x563   : > { %v1967_v53 = vmul.f32 2.0, %v1963_v38  ;;  %v2074_v25 = vunpack.c.l.b16 %v4146_v51 }
 0x565   : > { %v1969_v12 = vsub.f32 %v1967_v53, %v4086_v57 }
 0x567   : > { %v4148_v55 = vpack.c.bf16 %v1969_v12, %v1969_v12 }
 0x568   : > { %v2031_v16 = vpop.f32.mrf.mxu2 }
 0x569   : > { %v4150_v29 = vpack.c.bf16 %v2031_v16, %v2031_v16  ;;  %2038 = vrot.lane.b32.xlu2 %v4146_v51, %s4550_s29  ;;  %1990 = vrot.lane.b32.xlu0 %v1970_v20, %s4551_s2 }
 0x56a   : > { %1984 = vrot.lane.b32.xlu1 %v4148_v55, %s4526_s21 }
 0x56b   : > { %v2075_v58 = vunpack.c.l.b16 %v4150_v29 }
 0x56d   : > { %v2076_v57 = vpack.c.b16 %v2075_v58, %v2074_v25  ;;  %v2927_v25 = vld [vmem:[%s4438_s5 + $0x50] sm:$0xff]  ;;  %v2925_v58 = vld [vmem:[%s4438_s5 + $0x40] sm:$0xff] }
 0x56f   : > { %2085 = vmatpush.bf16.msra.mxu3 %v2076_v57 }
 0x571   : > { %2050 = vrot.lane.b32.xlu2 %v4146_v51, %s4534_s24  ;;  %2000 = vrot.lane.b32.xlu0 %v4148_v55, %s4549_s1 }
 0x572   : > { %2788 = vmatmul.msk.bf16.vlgmr.msra.gmra.mxu3 %vm4552_vm4, %v2916_v13  ;;  %vm4561_vm4 = vmmov %vm4554_vm10 }
 0x579   : > { %2040 = vrot.lane.b32.xlu0 %v4150_v29, %s4550_s29  ;;  %1976 = vrot.lane.b32.xlu2 %v4148_v55, %s4522_s14 }
 0x581   : > { %2052 = vrot.lane.b32.xlu0 %v4150_v29, %s4534_s24 }
 0x5bb   : > { %v1999_v2 = vpop.permute.xlu2 %1998 }
 0x5bc   : > { %v2002_v39 = vrot.slane %v1999_v2, 4 }
 0x5be   : > { %v2004_v62 = vsel %vm822_vm1, %v2002_v39, %v1999_v2 }
 0x5bf   : > { %2008 = vst.msk [vmem:[#allocation2 + $0x10] sm:$0xff] %vm3741_vm9, %v2004_v62 }
 0x5c3   : > { %v2039_v48 = vpop.permute.xlu2 %2038 }
 0x5c4   : > { %v2042_v8 = vrot.slane %v2039_v48, 4 }
 0x5c6   : > { %v2044_v52 = vsel %vm4555_vm13, %v2042_v8, %v2039_v48 }
 0x5cb   : > { %v2051_v50 = vpop.permute.xlu2 %2050 }
 0x5d3   : > { %v1983_v54 = vpop.permute.xlu0 %1982  ;;  %v1977_v37 = vpop.permute.xlu2 %1976 }
 0x5d4   : > { %1988 = vst.msk [vmem:[#allocation2 + $0x8] sm:$0xf] %vm4553_vm7, %v1983_v54  ;;  %v1975_v47 = vpop.permute.xlu1 %1974  ;;  %vm4566_vm7 = vcmask 978624  }
 0x5d5   : > { %2056 = vst.msk [vmem:[#allocation2 + $0x8] sm:$0xf] %vm4554_vm10, %v2051_v50  ;;  %vm4567_vm10 = vcmask 847424  }
 0x5d6   : > { %1980 = vst.msk [vmem:[#allocation2] sm:$0xf] %vm4556_vm6, %v1975_v47  ;;  %vm4569_vm6 = vcmask 355424  }
 0x5d7   : > { %2048 = vst.msk [vmem:[#allocation2] sm:$0xff] %vm3686_vm14, %v2044_v52 }
 0x5d8   : > { %1981 = vst.msk [vmem:[#allocation2 + $0x18] sm:$0xf] %vm4557_vm2, %v1977_v37  ;;  %vm4570_vm2 = vmmov %vm4567_vm10 }
 0x5db   : > { %v1991_v11 = vpop.permute.xlu0 %1990 }
 0x5dc   : > { %1996 = vst.msk [vmem:[#allocation2 + $0xc] sm:$0xf] %vm4558_vm5, %v1991_v11  ;;  %v1985_v13 = vpop.permute.xlu1 %1984  ;;  %vm4571_vm5 = vcmask 424960  }
 0x5dd   : > { %1989 = vst.msk [vmem:[#allocation2 + $0x20] sm:$0xf] %vm4559_vm15, %v1985_v13  ;;  %vm4572_vm15 = vcmask 683424  }
 0x5de   : > { %v2791_v15 = vld [vmem:[#allocation2] sm:$0xf] }
 0x5e3   : > { %v2001_v19 = vpop.permute.xlu0 %2000 }
 0x5e4   : > { %v2003_v1 = vrot.slane %v2001_v19, 4 }
 0x5e6   : > { %v2005_v30 = vsel %vm822_vm1, %v2003_v1, %v2001_v19  ;;  %vm4564_vm1 = vcmask 421024  }
 0x5e7   : > { %2009 = vst.msk [vmem:[#allocation2 + $0x28] sm:$0xff] %vm3741_vm9, %v2005_v30  ;;  %vm4565_vm9 = vcmask 490496   ;;  %vm4568_vm13 = vmmov %vm4564_vm1 }
 0x5eb   : > { %v2041_v36 = vpop.permute.xlu0 %2040 }
 0x5ec   : > { %v2043_v42 = vrot.slane %v2041_v36, 4 }
 0x5ee   : > { %v2045_v43 = vsel %vm4560_vm8, %v2043_v42, %v2041_v36  ;;  %vm4573_vm8 = vmmov %vm4566_vm7 }
 0x5ef   : > { %2049 = vst.msk [vmem:[#allocation2 + $0x18] sm:$0xff] %vm3686_vm14, %v2045_v43  ;;  %vm4563_vm14 = vcmask 1041408  }
 0x5f3   : > { %v2053_v21 = vpop.permute.xlu0 %2052 }
 0x5f4   : > { %2057 = vst.msk [vmem:[#allocation2 + $0x20] sm:$0xf] %vm4561_vm4, %v2053_v21  ;;  %vm4574_vm4 = vmmov %vm4565_vm9 }
 0x5f5   : > { %v2087_v5 = vpop.f32.mrf.mxu3 }
 0x5f6   : > { %v2092_v46 = vmul.f32 2.0, %v2087_v5  ;;  %v2929_v7 = vld [vmem:[#allocation2 + $0x14] sm:$0xf0] }
 0x5f7   : > { %v2792_v24 = vor.u32 %v2929_v7, %v2791_v15 }
 0x5f8   : > { %v2094_v20 = vsub.f32 %v2092_v46, %v4110_v9  ;;  %v2158_v9 = vld [vmem:[%s4438_s5 + $0x58] sm:$0x3] }
 0x5f9   : > { %2257 = vmatmul.bf16.vlgmr.msrb.gmra.mxu0 %v2792_v24 }
 0x5fa   : > { %v2096_v56 = vpack.c.bf16 %v2094_v20, %v2094_v20 }
 0x5fc   : > { %2108 = vrot.lane.b32.xlu0 %v2096_v56, %s4542_s17  ;;  %2100 = vrot.lane.b32.xlu1 %v2096_v56, %s4562_s3 }
 0x5fd   : > { %2116 = vrot.lane.b32.xlu2 %v2096_v56, %s4510_s25  ;;  %v2089_v28 = vpop.f32.mrf.mxu3 }
 0x5fe   : > { %v2093_v38 = vmul.f32 2.0, %v2089_v28 }
 0x600   : > { %v2095_v53 = vsub.f32 %v2093_v38, %v4117_v33  ;;  %v2219_v33 = vunpack.c.l.b16 %v2158_v9  ;;  %v2727_v9 = vmul.f32 -1.442695, %v3917_v0 }
 0x602   : > { %v2097_v12 = vpack.c.bf16 %v2095_v53, %v2095_v53  ;;  %v2231_v16 = vpack.c.b16 %v2219_v33, %v2219_v33  ;;  %3055 = vpow2.f32 %v2727_v9 }
 0x604   : > { %2060 = vrot.lane.b32.xlu0 %v4150_v29, %s4512_s16  ;;  %2110 = vrot.lane.b32.xlu1 %v2097_v12, %s4542_s17 }
 0x605   : > { %2102 = vrot.lane.b32.xlu2 %v2097_v12, %s4562_s3 }
 0x608   : > { %v3056_v33 = vpop.eup %3055 }
 0x60c   : > { %2118 = vrot.lane.b32.xlu0 %v2097_v12, %s4510_s25  ;;  %1992 = vrot.lane.b32.xlu1 %v4148_v55, %s4551_s2  ;;  %v2247_v55 = vsel %vm4563_vm14, %v2231_v16, 0  ;;  %vm4575_vm14 = vmmov %vm4569_vm6  ;;  %v1285_v16 = vadd.f32 1.0, %v3056_v33 }
 0x60d   : > { %2058 = vrot.lane.b32.xlu2 %v4146_v51, %s4512_s16  ;;  %2267 = vmatpush.bf16.msrb.mxu1 %v2247_v55 }
 0x60e   : > { %2324 = vmatpush.bf16.msrb.mxu3 %v2247_v55  ;;  %2448 = vmatpush.bf16.msra.mxu2 %v2247_v55  ;;  %3057 = vrcp.f32 %v1285_v16 }
 0x611   : > { %2268 = vmatpush.bf16.msrb.mxu1 %v2927_v25 }
 0x612   : > { %2325 = vmatpush.bf16.msrb.mxu3 %v2927_v25  ;;  %2449 = vmatpush.bf16.msra.mxu2 %v2927_v25 }
 0x614   : > { %2128 = vrot.lane.b32.xlu0 %v2096_v56, %s4513_s23  ;;  %2066 = vrot.lane.b32.xlu1 %v4146_v51, %s4511_s26  ;;  %v2926_v51 = vld [vmem:[%s4438_s5 + $0x48] sm:$0xff] }
 0x615   : > { %2068 = vrot.lane.b32.xlu2 %v4150_v29, %s4511_s26  ;;  %2269 = vmatpush.bf16.msrb.mxu1 %v2926_v51 }
 0x616   : > { %2326 = vmatpush.bf16.msrb.mxu3 %v2926_v51  ;;  %2450 = vmatpush.bf16.msra.mxu2 %v2926_v51 }
 0x619   : > { %2270 = vmatpush.bf16.msrb.mxu1 %v2925_v58 }
 0x61a   : > { %2327 = vmatpush.bf16.msrb.mxu3 %v2925_v58  ;;  %2451 = vmatpush.bf16.msra.mxu2 %v2925_v58 }
 0x61c   : > { %2130 = vrot.lane.b32.xlu1 %v2097_v12, %s4513_s23 }
 0x61d   : > { %2373 = vmatpush.bf16.msra.mxu1 %v4173_v45 }
 0x61e   : > { %2391 = vmatpush.bf16.msra.mxu3 %v2247_v55  ;;  %v3058_v55 = vpop.eup %3057 }
 0x621   : > { %2374 = vmatpush.bf16.msra.mxu1 %v4180_v34 }
 0x622   : > { %2392 = vmatpush.bf16.msra.mxu3 %v2927_v25  ;;  %v1288_v25 = vmul.f32 %v3058_v55, %v1285_v16 }
 0x625   : > { %2375 = vmatpush.bf16.msra.mxu1 %v4189_v63 }
 0x626   : > { %2393 = vmatpush.bf16.msra.mxu3 %v2926_v51  ;;  %v1748_v51 = vpop.f32.mrf.mxu0 }
 0x629   : > { %2376 = vmatpush.bf16.msra.mxu1 %v4197_v40 }
 0x62a   : > { %2394 = vmatpush.bf16.msra.mxu3 %v2925_v58 }
 0x62d   : > { %2377 = vmatpush.bf16.msra.mxu1 %v4203_v18 }
 0x631   : > { %2378 = vmatpush.bf16.msra.mxu1 %v4211_v26 }
 0x635   : > { %2379 = vmatpush.bf16.msra.mxu1 %v4217_v27 }
 0x639   : > { %2380 = vmatpush.bf16.msra.mxu1 %v4232_v35 }
 0x657   : > { %v2117_v29 = vpop.permute.xlu2 %2116 }
 0x658   : > { %v2120_v2 = vrot.slane %v2117_v29, 4 }
 0x65a   : > { %v2122_v62 = vsel %vm4565_vm9, %v2120_v2, %v2117_v29  ;;  %v1289_v29 = vsub.f32 1.0, %v1288_v25 }
 0x65c   : > { %v1290_v58 = vmul.f32 %v3058_v55, %v1289_v29 }
 0x65e   : > { %v1291_v0 = vadd.f32 %v3058_v55, %v1290_v58 }
 0x65f   : > { %v2103_v57 = vpop.permute.xlu2 %2102 }
 0x660   : > { %2107 = vst.msk [vmem:[#allocation2 + $0x1c] sm:$0xf] %vm4564_vm1, %v2103_v57  ;;  %vm4576_vm1 = vcmask 650624   ;;  %v4323_v57 = vld [vmem:[%s4441_s8] ss:$0 sm:$0xff] }
 0x661   : > { %vm4577_vm9 = vmmov %vm4576_vm1 }
 0x667   : > { %v2059_v39 = vpop.permute.xlu2 %2058  ;;  %v2931_v50 = vld [vmem:[#allocation2 + $0x18] sm:$0xf0] }
 0x668   : > { %2064 = vst.msk [vmem:[#allocation2 + $0xc] sm:$0xf] %vm4566_vm7, %v2059_v39  ;;  %v2793_v8 = vld [vmem:[#allocation2 + $0x18] sm:$0xf0]  ;;  %vm4579_vm7 = vmmov %vm4571_vm5 }
 0x669   : > { %2126 = vst.msk [vmem:[#allocation2 + $0xc] sm:$0xff] %vm3832_vm3, %v2122_v62 }
 0x66e   : > { %v2109_v45 = vpop.permute.xlu0 %2108  ;;  %v2101_v34 = vpop.permute.xlu1 %2100 }
 0x66f   : > { %2114 = vst.msk [vmem:[#allocation2 + $0x8] sm:$0xf] %vm4567_vm10, %v2109_v45  ;;  %v2069_v48 = vpop.permute.xlu2 %2068  ;;  %vm1293_vm10 = vweird.f32 %v3058_v55 }
 0x670   : > { %2106 = vst.msk [vmem:[#allocation2 + $0x4] sm:$0xf] %vm4568_vm13, %v2101_v34  ;;  %v2861_v36 = vld [vmem:[#allocation2 + $0x10] sm:$0xf]  ;;  %v2932_v43 = vld [vmem:[#allocation2 + $0xc] sm:$0xf]  ;;  %vm1292_vm13 = vweird.f32 %v1285_v16 }
 0x671   : > { %2073 = vst.msk [vmem:[#allocation2 + $0x2c] sm:$0xf] %vm4569_vm6, %v2069_v48  ;;  %v2866_v24 = vld [vmem:[#allocation2 + $0x10] sm:$0xf]  ;;  %v1298_v34 = vand.u32 2147483648, %v1285_v16  ;;  %vm1294_vm6 = vmor %vm1292_vm13, %vm1293_vm10 }
 0x676   : > { %v2061_v63 = vpop.permute.xlu0 %2060  ;;  %v2111_v40 = vpop.permute.xlu1 %2110  ;;  %v2930_v11 = vld [vmem:[#allocation2 + $0x8] sm:$0xf] }
 0x677   : > { %2115 = vst.msk [vmem:[#allocation2 + $0x20] sm:$0xf] %vm4570_vm2, %v2111_v40  ;;  %v2844_v18 = vld [vmem:[#allocation2 + $0x4] sm:$0xf]  ;;  %v2853_v20 = vld [vmem:[#allocation2 + $0x8] sm:$0xf]  ;;  %v2258_v2 = vpop.f32.mrf.mxu0 }
 0x678   : > { %v2928_v54 = vld [vmem:[#allocation2 + $0x4] sm:$0xf]  ;;  %v2845_v47 = vor.u32 %v2931_v50, %v2844_v18  ;;  %v2259_v48 = vadd.f32 %v4323_v57, %v2258_v2  ;;  %v1299_v18 = vor.u32 1.1754944e-38, %v1298_v34 }
 0x679   : > { %v2796_v37 = vor.u32 %v2928_v54, %v2793_v8  ;;  %v1295_v8 = vsel %vm1294_vm6, %v3058_v55, %v1291_v0 }
 0x67a   : > { %2297 = vrot.lane.b32.xlu2 %v2845_v47, %s4522_s14 }
 0x67b   : > { %2841 = vmatmul.msk.bf16.vlgmr.msrb.gmra.mxu1 %vm4571_vm5, %v2796_v37  ;;  %vm4580_vm5 = vcmask 195584  }
 0x67e   : > { %v2119_v26 = vpop.permute.xlu0 %2118  ;;  %v1993_v52 = vpop.permute.xlu1 %1992  ;;  %v2846_v27 = vld [vmem:[#allocation2 + $0x1c] sm:$0xf0] }
 0x67f   : > { %v2121_v13 = vrot.slane %v2119_v26, 4  ;;  %1997 = vst.msk [vmem:[#allocation2 + $0x24] sm:$0xf] %vm4572_vm15, %v1993_v52  ;;  %v2849_v19 = vor.u32 %v2930_v11, %v2846_v27  ;;  %v2933_v7 = vld [vmem:[#allocation2 + $0x1c] sm:$0xf0]  ;;  %vm4581_vm15 = vmmov %vm4579_vm7  ;;  %v4354_v29 = vpop.f32.mrf.mxu0 }
 0x680   : > { %2065 = vst.msk [vmem:[#allocation2 + $0x24] sm:$0xf] %vm4573_vm8, %v2061_v63  ;;  %v2854_v28 = vor.u32 %v2933_v7, %v2853_v20  ;;  %v1296_v63 = vand.u32 2147483647, %v1285_v16  ;;  %v3089_v27 = vld [vmem:[%s3289_s28] sm:$0xff]  ;;  %vm4582_vm8 = vmmov %vm4580_vm5 }
 0x681   : > { %v2123_v1 = vsel %vm4574_vm4, %v2121_v13, %v2119_v26  ;;  %2299 = vrot.lane.b32.xlu0 %v2849_v19, %s4522_s14  ;;  %vm4583_vm4 = vcmask 818176  }
 0x682   : > { %2127 = vst.msk [vmem:[#allocation2 + $0x24] sm:$0xff] %vm3832_vm3, %v2123_v1  ;;  %vm4578_vm3 = vcmask 621568   ;;  %vm1297_vm2 = vcmp.eq.f32.partialorder %v1296_v63, 8.507059e+37 }
 0x683   : > { %v1300_v54 = vsel %vm1297_vm2, %v1299_v18, %v1295_v8  ;;  %v2339_v8 = vsub.f32 1.0, %v4006_v49 }
 0x684   : > { %v2281_v37 = vsub.f32 1.0, %v1300_v54  ;;  %v2279_v13 = vmul.f32 %v3089_v27, %v1300_v54 }
 0x686   : > { %v2129_v35 = vpop.permute.xlu0 %2128  ;;  %v2067_v30 = vpop.permute.xlu1 %2066 }
 0x687   : > { %2072 = vst.msk [vmem:[#allocation2 + $0x14] sm:$0xf] %vm4575_vm14, %v2067_v30  ;;  %vm4584_vm14 = vmmov %vm4579_vm7 }
 0x688   : > { %2134 = vst.msk [vmem:[#allocation2 + $0x14] sm:$0xf] %vm4576_vm1, %v2129_v35 }
 0x689   : > { %v2934_v42 = vld [vmem:[#allocation2 + $0x24] sm:$0xf0]  ;;  %v2855_v21 = vld [vmem:[#allocation2 + $0x20] sm:$0xf0] }
 0x68a   : > { %v2862_v5 = vor.u32 %v2934_v42, %v2861_v36  ;;  %v2858_v46 = vor.u32 %v2932_v43, %v2855_v21  ;;  %v2936_v4 = vld [vmem:[#allocation2 + $0x24] sm:$0xf0]  ;;  %v4339_v21 = vld [vmem:[%s4440_s7] ss:$0 sm:$0xff] }
 0x68b   : > { %v2867_v56 = vor.u32 %v2936_v4, %v2866_v24  ;;  %v1749_v4 = vadd.f32 %v4339_v21, %v1748_v51  ;;  %v2338_v51 = vsub.f32 1.0, %v3981_v6 }
 0x68c   : > { %2365 = vrot.lane.b32.xlu2 %v2862_v5, %s4512_s16  ;;  %2363 = vrot.lane.b32.xlu1 %v2858_v46, %s4512_s16  ;;  %v1589_v5 = vadd.f32 %v4339_v21, %v3974_v44 }
 0x68d   : > { %v1763_v7 = vadd.f32 %v4139_v3, %v1749_v4 }
 0x68e   : > { %v2131_v15 = vpop.permute.xlu1 %2130  ;;  %v1603_v46 = vadd.f32 %v3960_v14, %v1589_v5 }
 0x68f   : > { %2135 = vst.msk [vmem:[#allocation2 + $0x2c] sm:$0xf] %vm4577_vm9, %v2131_v15  ;;  %v2935_v38 = vld [vmem:[#allocation2 + $0x14] sm:$0xf]  ;;  %v2774_v24 = vmul.f32 -1.442695, %v1763_v7 }
 0x690   : > { %v2760_v15 = vmul.f32 -1.442695, %v1603_v46 }
 0x694   : > { %2421 = vrot.lane.b32.xlu2 %v2867_v56, %s4525_s27  ;;  %2361 = vrot.lane.b32.xlu1 %v2854_v28, %s4512_s16 }
 0x696   : > { %v2868_v53 = vld [vmem:[#allocation2 + $0x28] sm:$0xf0] }
 0x697   : > { %v2871_v12 = vor.u32 %v2935_v38, %v2868_v53 }
 0x699   : > { %2423 = vrot.lane.b32.xlu0 %v2871_v12, %s4525_s27 }
 0x6d4   : > { %v2298_v39 = vpop.permute.xlu2 %2297 }
 0x6e6   : > { %v2366_v52 = vpop.permute.xlu2 %2365 }
 0x6ee   : > { %v2422_v36 = vpop.permute.xlu2 %2421 }
 0x6f3   : > { %v2300_v62 = vpop.permute.xlu0 %2299 }
 0x6f4   : > { %v2301_v45 = vsel %vm4578_vm3, %v2298_v39, %v2300_v62  ;;  %2850 = vmatmul.msk.bf16.vlgmr.msrb.gmra.mxu3 %vm4579_vm7, %v2300_v62 }
 0x6f5   : > { %2314 = vmatmul.bf16.vlgmr.msrb.gmra.mxu2 %v2301_v45 }
 0x6f8   : > { %v2272_v40 = vpop.f32.mrf.mxu1 }
 0x6f9   : > { %v2273_v50 = vadd.f32 %v2272_v40, %v2259_v48 }
 0x6fb   : > { %3059 = vtanh.f32 %v2273_v50 }
 0x6fc   : > { %3061 = vpow2.f32 %v2760_v15 }
 0x6fd   : > { %3063 = vpow2.f32 %v2774_v24 }
 0x6fe   : > { %v2364_v47 = vpop.permute.xlu1 %2363 }
 0x6ff   : > { %v2368_v19 = vsel %vm4580_vm5, %v2364_v47, %v2366_v52 }
 0x700   : > { %v4349_v14 = vpop.f32.mrf.mxu1 }
 0x701   : > { %v3060_v26 = vpop.eup %3059 }
 0x702   : > { %v2283_v11 = vmul.f32 %v3060_v26, %v2281_v37  ;;  %v3062_v20 = vpop.eup %3061 }
 0x703   : > { %v1612_v56 = vadd.f32 1.0, %v3062_v20  ;;  %v3064_v53 = vpop.eup %3063 }
 0x704   : > { %v4330_v1 = vadd.f32 %v2283_v11, %v2279_v13  ;;  %2863 = vmatmul.msk.bf16.vlgmr.msra.gmra.mxu3 %vm4581_vm15, %v2368_v19  ;;  %v4347_v44 = vadd.f32 1.0, %v3064_v53  ;;  %v2405_v19 = vsub.f32 1.0, %v4033_v41 }
 0x705   : > { %3065 = vrcp.f32 %v1612_v56  ;;  %v1639_v11 = vand.u32 2147483648, %v1612_v56  ;;  %vm1633_vm9 = vweird.f32 %v1612_v56 }
 0x706   : > { %v2362_v35 = vpop.permute.xlu1 %2361  ;;  %v1799_v20 = vand.u32 2147483648, %v4347_v44  ;;  %vm1793_vm13 = vweird.f32 %v4347_v44 }
 0x707   : > { %v2367_v30 = vsel %vm4582_vm8, %v2362_v35, %v2364_v47  ;;  %v1637_v35 = vand.u32 2147483647, %v1612_v56  ;;  %v1640_v4 = vor.u32 1.1754944e-38, %v1639_v11 }
 0x708   : > { %2381 = vmatmul.bf16.vlgmr.msra.gmra.mxu1 %v2367_v30 }
 0x709   : > { %vm1638_vm7 = vcmp.eq.f32.partialorder %v1637_v35, 8.507059e+37 }
 0x70b   : > { %v2424_v42 = vpop.permute.xlu0 %2423  ;;  %v3066_v33 = vpop.eup %3065 }
 0x70c   : > { %v2425_v43 = vsel %vm4583_vm4, %v2422_v36, %v2424_v42  ;;  %2872 = vmatmul.msk.bf16.vlgmr.msra.gmra.mxu2 %vm4584_vm14, %v2424_v42  ;;  %v1629_v55 = vmul.f32 %v3066_v33, %v1612_v56  ;;  %vm1634_vm1 = vweird.f32 %v3066_v33 }
 0x70d   : > { %2438 = vmatmul.bf16.vlgmr.msra.gmra.mxu0 %v2425_v43  ;;  %vm1635_vm3 = vmor %vm1633_vm9, %vm1634_vm1 }
 0x70e   : > { %v1630_v62 = vsub.f32 1.0, %v1629_v55 }
 0x710   : > { %v1631_v50 = vmul.f32 %v3066_v33, %v1630_v62 }
 0x712   : > { %v1632_v37 = vadd.f32 %v3066_v33, %v1631_v50 }
 0x714   : > { %v1636_v5 = vsel %vm1635_vm3, %v3066_v33, %v1632_v37 }
 0x715   : > { %v1641_v7 = vsel %vm1638_vm7, %v1640_v4, %v1636_v5 }
 0x777   : > { %v2329_v28 = vpop.f32.mrf.mxu3 }
 0x778   : > { %v2315_v38 = vpop.f32.mrf.mxu2 }
 0x779   : > { %v2316_v12 = vadd.f32 %v4323_v57, %v2315_v38  ;;  %v1797_v38 = vand.u32 2147483647, %v4347_v44 }
 0x77b   : > { %v2330_v9 = vadd.f32 %v2329_v28, %v2316_v12  ;;  %v2406_v28 = vsub.f32 1.0, %v1641_v7  ;;  %vm1798_vm2 = vcmp.eq.f32.partialorder %v1797_v38, 8.507059e+37 }
 0x77d   : > { %3067 = vtanh.f32 %v2330_v9 }
 0x77e   : > { %3069 = vrcp.f32 %v4347_v44 }
 0x77f   : > { %v2331_v16 = vpop.f32.mrf.mxu3 }
 0x780   : > { %v2317_v3 = vpop.f32.mrf.mxu2 }
 0x781   : > { %v2318_v25 = vadd.f32 %v4323_v57, %v2317_v3 }
 0x783   : > { %v3068_v58 = vpop.eup %3067  ;;  %v2332_v2 = vadd.f32 %v2331_v16, %v2318_v25  ;;  %v2404_v16 = vmul.f32 %v4043_v61, %v1641_v7  ;;  %v1800_v25 = vor.u32 1.1754944e-38, %v1799_v20 }
 0x784   : > { %v2340_v39 = vmul.f32 %v3068_v58, %v2338_v51  ;;  %v4356_v0 = vpop.eup %3069 }
 0x785   : > { %3071 = vtanh.f32 %v2332_v2  ;;  %v2382_v45 = vpop.f32.mrf.mxu1  ;;  %v1789_v6 = vmul.f32 %v4356_v0, %v4347_v44  ;;  %vm1794_vm10 = vweird.f32 %v4356_v0 }
 0x786   : > { %v2383_v34 = vadd.f32 %v4323_v57, %v2382_v45  ;;  %v2342_v48 = vadd.f32 %v2340_v39, %v3984_v22  ;;  %vm1795_vm6 = vmor %vm1793_vm13, %vm1794_vm10 }
 0x787   : > { %v2396_v63 = vpop.f32.mrf.mxu3  ;;  %v1790_v26 = vsub.f32 1.0, %v1789_v6 }
 0x788   : > { %v2397_v40 = vadd.f32 %v2396_v63, %v2383_v34  ;;  %2470 = vrot.lane.b32.xlu0 %v2342_v48, %s4528_s0 }
 0x789   : > { %v1791_v46 = vmul.f32 %v4356_v0, %v1790_v26 }
 0x78a   : > { %3073 = vtanh.f32 %v2397_v40  ;;  %v2439_v18 = vpop.f32.mrf.mxu0 }
 0x78b   : > { %v3072_v54 = vpop.eup %3071  ;;  %v2440_v22 = vadd.f32 %v4323_v57, %v2439_v18  ;;  %v1792_v24 = vadd.f32 %v4356_v0, %v1791_v46 }
 0x78c   : > { %v2341_v47 = vmul.f32 %v3072_v54, %v2339_v8 }
 0x78d   : > { %v2384_v52 = vpop.f32.mrf.mxu1  ;;  %v1796_v3 = vsel %vm1795_vm6, %v4356_v0, %v1792_v24  ;;  %v1263_v0 = vadd.f32 %v4339_v21, %v3936_v31 }
 0x78e   : > { %v2385_v27 = vadd.f32 %v4323_v57, %v2384_v52  ;;  %v2343_v13 = vadd.f32 %v2341_v47, %v4010_v59  ;;  %v1801_v2 = vsel %vm1798_vm2, %v1800_v25, %v1796_v3 }
 0x78f   : > { %v2398_v49 = vpop.f32.mrf.mxu3  ;;  %v2453_v30 = vpop.f32.mrf.mxu2  ;;  %v2461_v62 = vmul.f32 %v4060_v60, %v1801_v2  ;;  %v1277_v34 = vadd.f32 %v3938_v32, %v1263_v0  ;;  %v2261_v60 = vadd.f32 %v4323_v57, %v4354_v29 }
 0x790   : > { %v3074_v36 = vpop.eup %3073  ;;  %v2399_v42 = vadd.f32 %v2398_v49, %v2385_v27  ;;  %v2454_v43 = vadd.f32 %v2453_v30, %v2440_v22  ;;  %2472 = vrot.lane.b32.xlu1 %v2343_v13, %s4528_s0  ;;  %s2937_s0 = sshll.u32 %s3254_s13, 4  ;;  %v3091_v22 = vld [vmem:[%s3289_s28 + $0x8] sm:$0xff] }
 0x791   : > { %v2407_v15 = vmul.f32 %v3074_v36, %v2405_v19  ;;  %v2728_v48 = vmul.f32 -1.442695, %v1277_v34  ;;  %v2275_v18 = vadd.f32 %v4349_v14, %v2261_v60  ;;  %s2512_s17 = scalar_lea.hbm %s4442_s9, %s2937_s0 }
 0x792   : > { %3075 = vtanh.f32 %v2399_v42  ;;  %v2441_v59 = vpop.f32.mrf.mxu0  ;;  %s2515_s25 = sshll.u32 %s2512_s17, 4  ;;  %s2516_s25 = int_to_ptr.hbm [resolvable:$true] %s2515_s25 }
 0x793   : > { %3077 = vtanh.f32 %v2454_v43  ;;  %v2409_v41 = vadd.f32 %v2407_v15, %v4036_v10  ;;  %v2442_v56 = vadd.f32 %v4323_v57, %v2441_v59  ;;  %v2462_v10 = vsub.f32 1.0, %v4054_v23  ;;  %s3106_s28 = sshra.s32 %s2516_s25, 4  ;;  %s3107_s28 = int_to_ptr.hbm [resolvable:$true] %s3106_s28 }
 0x794   : > { %v2463_v23 = vsub.f32 1.0, %v1801_v2  ;;  %s3108_s6 = scalar_lea.hbm %s3107_s28, 16  ;;  %p3113_p0 = scmp.lt.s32.totalorder %s3107_s28, %s4442_s9 }
 0x795   : > { %2478 = vrot.lane.b32.xlu2 %v2409_v41, %s4527_s22  ;;  %p3109_p11 = scmp.ne.s32.totalorder %s3107_s28, %s3108_s6  ;;  %p3114_p1 = scmp.lt.s32.totalorder %s3112_s18, %s3108_s6 }
 0x797   : > { %v2455_v53 = vpop.f32.mrf.mxu2  ;;  %p3110_p12 = pnand %p3109_p11, %p3271_p5  ;;  %p3115_p2 = por %p3114_p1, %p3113_p0 }
 0x798   : > { %v3076_v12 = vpop.eup %3075  ;;  %v2456_v9 = vadd.f32 %v2455_v53, %v2442_v56 }
 0x799   : > { %v3078_v33 = vpop.eup %3077  ;;  %v2408_v55 = vmul.f32 %v3076_v12, %v2406_v28  ;;  %p3111_p13 = pneg %p3110_p12 }
 0x79a   : > { %v2464_v51 = vmul.f32 %v3078_v33, %v2462_v10  ;;  %3079 = vtanh.f32 %v2456_v9 }
 0x79b   : > { %v2410_v58 = vadd.f32 %v2408_v55, %v2404_v16  ;;  %3081 = vpow2.f32 %v2728_v48  ;;  %p3116_p3 = pnand %p3115_p2, %p3111_p13 }
 0x79c   : > { %v2466_v44 = vadd.f32 %v2464_v51, %v4057_v17 }
 0x79d   : > { %2480 = vrot.lane.b32.xlu0 %v2410_v58, %s4527_s22 }
 0x79e   : > { %2486 = vrot.lane.b32.xlu1 %v2466_v44, %s4526_s21 }
 0x7a0   : > { %v3080_v39 = vpop.eup %3079 }
 0x7a1   : > { %v2465_v61 = vmul.f32 %v3080_v39, %v2463_v23  ;;  %v3082_v17 = vpop.eup %3081 }
 0x7a2   : > { %v1286_v63 = vadd.f32 1.0, %v3082_v17 }
 0x7a3   : > { %v2467_v45 = vadd.f32 %v2465_v61, %v2461_v62 }
 0x7a4   : > { %3083 = vrcp.f32 %v1286_v63  ;;  %v1313_v31 = vand.u32 2147483648, %v1286_v63  ;;  %vm1307_vm15 = vweird.f32 %v1286_v63  ;;  %v1311_v32 = vand.u32 2147483647, %v1286_v63 }
 0x7a5   : > { %2488 = vrot.lane.b32.xlu2 %v2467_v45, %s4526_s21  ;;  %3085 = vtanh.f32 %v2275_v18  ;;  %s338_s21 = sand.u32 1, %s3146_s10  }
 0x7a6   : > { %v1314_v47 = vor.u32 1.1754944e-38, %v1313_v31  ;;  %vm1312_vm4 = vcmp.eq.f32.partialorder %v1311_v32, 8.507059e+37  ;;  %s2594_s22 = sshll.u32 %s338_s21, 4  ;;  %s2501_s13 = scalar_lea.sflag [#allocation4], %s338_s21 }
 0x7a7   : > { %s340_s4 = scalar_lea.vmem [#allocation3], %s2594_s22 }
 0x7a8   : > { %s2513_s2 = sshll.u32 %s340_s4, 4  ;;  %s2514_s2 = int_to_ptr.vmem [resolvable:$true] %s2513_s2 }
 0x7aa   : > { %v3084_v40 = vpop.eup %3083 }
 0x7ab   : > { %v1303_v50 = vmul.f32 %v3084_v40, %v1286_v63  ;;  %vm1308_vm5 = vweird.f32 %v3084_v40  ;;  %v3086_v26 = vpop.eup %3085 }
 0x7ac   : > { %vm1309_vm8 = vmor %vm1307_vm15, %vm1308_vm5 }
 0x7ad   : > { %v1304_v6 = vsub.f32 1.0, %v1303_v50 }
 0x7af   : > { %v1305_v8 = vmul.f32 %v3084_v40, %v1304_v6 }
 0x7b1   : > { %v1306_v54 = vadd.f32 %v3084_v40, %v1305_v8 }
 0x7b3   : > { %v1310_v21 = vsel %vm1309_vm8, %v3084_v40, %v1306_v54 }
 0x7b4   : > { %v1315_v37 = vsel %vm1312_vm4, %v1314_v47, %v1310_v21 }
 0x7b5   : > { %v2282_v52 = vsub.f32 1.0, %v1315_v37  ;;  %v2280_v27 = vmul.f32 %v3091_v22, %v1315_v37 }
 0x7b7   : > { %v2284_v29 = vmul.f32 %v3086_v26, %v2282_v52 }
 0x7b9   : > { %v2286_v19 = vadd.f32 %v2284_v29, %v2280_v27 }
 0x7ef   : > { %v2479_v57 = vpop.permute.xlu2 %2478 }
 0x7fa   : > { %v2471_v11 = vpop.permute.xlu0 %2470 }
 0x7fb   : > { %v2492_v13 = vsel %vm1835_vm0, %v4330_v1, %v2471_v11 }
 0x7fc   : > { %v2494_v43 = vsel %vm1838_vm12, %v2492_v13, %v2479_v57 }
 0x7ff   : > { %v2489_v30 = vpop.permute.xlu2 %2488 }
 0x802   : > { %v2473_v14 = vpop.permute.xlu1 %2472 }
 0x803   : > { %v2493_v35 = vsel %vm1835_vm0, %v2286_v19, %v2473_v14 }
 0x80f   : > { %v2481_v49 = vpop.permute.xlu0 %2480 }
 0x810   : > { %v2495_v36 = vsel %vm1838_vm12, %v2493_v35, %v2481_v49  ;;  %v2487_v42 = vpop.permute.xlu1 %2486 }
 0x811   : > { %v2497_v5 = vsel %vm1841_vm11, %v2495_v36, %v2489_v30  ;;  %v2496_v46 = vsel %vm1841_vm11, %v2494_v43, %v2487_v42 }
 0x812   : > { %2499 = vst [vmem:[%s340_s4 + $0x8] sm:$0xff] %v2497_v5 }
 0x813   : > { %2498 = vst [vmem:[%s340_s4] sm:$0xff] %v2496_v46 }
 0x814   : > { %3119 = shalt.err (!%p3116_p3)
}
 0x815   : > { %s3182_s16 = smov 128  }
 0x816   : > { %2938 = dma.vmem_to_hbm [thread:$0]  (%p3271_p5), %s2514_s2, 256, %s2516_s25, %s2501_s13, %s3182_s16, %s3182_s16, %s4549_s1  }
 0x817 PF: > { %p2944_p4 = scmp.ge.s32.totalorder %s3154_s12, 2  ;;  %s2530_s27 = sand.u32 1, %s3142_s30  }
 0x818   : > { %s2531_s21 = scalar_lea.sflag [#allocation4], %s2530_s27 }
 0x819   : > { %p2941_p7 = pnand %p2944_p4, %p3275_p6 }
 0x81b   : > { %p2942_p8 = pneg %p2941_p7 }
 0x81d   : > { %3137 = dma.done.wait (%p2942_p8), %s2531_s21, 256  }
 0x81e   : > { %3139 = vsyncadd (%p2942_p8), %s2531_s21, 4294967040  ;;  %s4585_s22 = sld [smem:[#allocation6_spill]]  ;;  %p19_p9 = scmp.ge.s32.totalorder %s3258_s15, 4  }
 0x81f   : > { %s4586_s30 = smov %s3146_s10  ;;  %s4587_s10 = smov %s3150_s11 }
 0x820   : > { %s4589_s12 = smov %s3258_s15  ;;  %21 = sbr.rel (!%p19_p9) target bundleno = 10 (0xa), region = 95 }
 0x824   : > { %s4588_s11 = smov %s4585_s22 }
 0x825   :  { %2537 = vsyncpa [#allocation4], 1 }
 0x826   :  { %2539 = vsyncpa [#allocation4 + $0x1], 1 }

</bundles_post_ra>
